<compile_context>
chip_gen: v6e
topology: v6e:2x2x1
jax: 0.10.0
libtpu: 0.0.40
codegen_flags: <defaults>
</compile_context>

<pallas_src>
import math

import numpy as np
import jax
import jax.numpy as jnp
from jax.experimental import pallas as pl
from jax.experimental.pallas import tpu as pltpu


def _round_up(x, m):
    return ((x + m - 1) // m) * m


# ----------------------------------------------------------------------------
# Pallas kernel: grid = (batch, q_tile, head); one (TQ, S_pad) logits tile per step.
# ----------------------------------------------------------------------------
def global_pointer_kernel(x_ref, wq_ref, wk_ref, bq_ref, bk_ref,
                          cos_ref, sin_ref, mcol_ref, mrow_ref,
                          o_ref, q_scr, k_scr, bias_scr):
    # x_ref:    (1, S_pad, hidden)  bf16, resident per batch
    # wq_ref:   (hidden, heads*d)   bf16, resident (constant index map)
    # wk_ref:   (hidden, heads*d)   bf16
    # bq_ref:   (1, heads*d)        f32
    # bk_ref:   (1, heads*d)        f32
    # cos_ref:  (S_pad, d)          f32 de-interleaved cos table
    # sin_ref:  (S_pad, d)          f32 de-interleaved sin table (rotate-half sign folded in)
    # mcol_ref: (1, S_pad, 1)       f32 sequence mask (column form)
    # mrow_ref: (1, 1, S_pad)       f32 sequence mask (row form)
    # o_ref:    (1, 1, TQ, S_pad)   logits tile for one (batch, head, q-tile)
    # q_scr:    (heads, TQ, d)      bf16 scratch: RoPE'd, masked, scaled q (current q-tile)
    # k_scr:    (heads, S_pad, d)   bf16 scratch: RoPE'd, masked k (full padded sequence)
    # bias_scr: (TQ, S_pad)         f32 scratch: additive mask + strict-lower-tri bias
    qi = pl.program_id(1)
    h = pl.program_id(2)
    heads, TQ, d = q_scr.shape
    S = k_scr.shape[1]
    half = d // 2
    scale = 1.0 / math.sqrt(d)
    neg = jnp.float32(-1e12 * scale)
    q_start = pl.multiple_of(qi * TQ, TQ)

    # ---- once per (batch, q-tile): all-heads projection + RoPE + mask/tril bias ----
    @pl.when(h == 0)
    def _prologue():
        m_q = mcol_ref[0, pl.ds(q_start, TQ), :]                    # (TQ, 1)
        m_row = mrow_ref[0]                                         # (1, S)

        # Combined additive bias: -1e12*scale fill for masked pairs + strict lower tri.
        row = jax.lax.broadcasted_iota(jnp.int32, (TQ, S), 0) + q_start
        col = jax.lax.broadcasted_iota(jnp.int32, (TQ, S), 1)
        valid = m_q * m_row                                         # (TQ, S)
        bias_scr[...] = neg * (1.0 - valid) + jnp.where(row > col, neg, 0.0)

        def rope_split(big, cos_t, sin_t, row_scale, out_scr):
            # big: (rows, heads*d) f32; apply rotate-half RoPE + row scaling per head
            # (static lane slices) and distribute into per-head bf16 scratch slots.
            for hh in range(heads):
                t = big[:, hh * d:(hh + 1) * d]
                t2 = jnp.concatenate([t[:, half:], t[:, :half]], axis=1)
                out_scr[hh] = ((t * cos_t + t2 * sin_t) * row_scale).astype(out_scr.dtype)

        # q projection for this query-row tile: all heads in one lane-dense bf16 matmul.
        xq = x_ref[0, pl.ds(q_start, TQ), :]                        # (TQ, hidden) bf16
        qw_all = jnp.dot(xq, wq_ref[...],
                         preferred_element_type=jnp.float32) + bq_ref[...]
        cos_q = cos_ref[pl.ds(q_start, TQ), :]
        sin_q = sin_ref[pl.ds(q_start, TQ), :]
        rope_split(qw_all, cos_q, sin_q, m_q * scale, q_scr)        # 1/sqrt(d) folded into q

        # k projection for the full (padded) sequence: once per batch element.
        @pl.when(qi == 0)
        def _k_projection():
            kw_all = jnp.dot(x_ref[0], wk_ref[...],
                             preferred_element_type=jnp.float32) + bk_ref[...]
            m_k = mcol_ref[0]                                       # (S, 1)
            rope_split(kw_all, cos_ref[...], sin_ref[...], m_k, k_scr)

    # ---- every step: one (TQ, d) x (S, d)^T bf16 MXU matmul + bias add + store -----
    q_h = q_scr[h]                                                  # (TQ, d) bf16
    k_h = k_scr[h]                                                  # (S, d)  bf16
    logits = jax.lax.dot_general(q_h, k_h, (((1,), (1,)), ((), ())),
                                 preferred_element_type=jnp.float32)
    o_ref[0, 0] = (logits + bias_scr[...]).astype(o_ref.dtype)


# ----------------------------------------------------------------------------
# One-time parameter preparation (off the per-call hot path).
# ----------------------------------------------------------------------------
def prepare_global_pointer_params(w, b, *, heads, head_size, max_seq_len):
    hidden, out_dim = w.shape
    d = head_size
    half = d // 2
    assert out_dim == heads * 2 * d
    S_max = _round_up(max(max_seq_len, 1), 128)

    # Sinusoidal tables ('zero' merge): pos[..., ::2]=sin, [..., 1::2]=cos, then
    # torch .repeat(1,1,1,2) == tile (concatenate two copies).
    pos = jnp.arange(S_max, dtype=jnp.float32)
    idx = jnp.arange(half, dtype=jnp.float32)
    freqs = jnp.power(10000.0, -2.0 * idx / d)
    ang = pos[:, None] * freqs[None, :]                             # (S_max, d/2)
    cos_t = jnp.concatenate([jnp.cos(ang), jnp.cos(ang)], axis=-1)  # (S_max, d)
    sin_t = jnp.concatenate([jnp.sin(ang), jnp.sin(ang)], axis=-1)

    # De-interleave columns: new j <- perm[j] = [0,2,...,d-2, 1,3,...,d-1].  In that
    # layout the RoPE pair-swap is a rotate by d/2 with a sign flip on the first half,
    # which is folded into the sin table.
    perm = np.concatenate([np.arange(0, d, 2), np.arange(1, d, 2)])
    sign = np.concatenate([-np.ones(half, np.float32), np.ones(half, np.float32)])
    cos_p = cos_t[:, perm]
    sin_p = sin_t[:, perm] * jnp.asarray(sign)[None, :]

    # Head-concatenated, de-interleaved projection weights; bf16 for the MXU.
    w3 = w.astype(jnp.float32).reshape(hidden, heads, 2 * d)
    wq = w3[:, :, :d][:, :, perm].reshape(hidden, heads * d).astype(jnp.bfloat16)
    wk = w3[:, :, d:][:, :, perm].reshape(hidden, heads * d).astype(jnp.bfloat16)
    b3 = b.astype(jnp.float32).reshape(heads, 2 * d)
    bq = b3[:, :d][:, perm].reshape(1, heads * d)
    bk = b3[:, d:][:, perm].reshape(1, heads * d)

    return dict(wq=wq, wk=wk, bq=bq, bk=bk, cos=cos_p, sin=sin_p,
                heads=heads, head_size=d, hidden=hidden, max_s_pad=S_max)


def _vmem_limit_bytes():
    # Generation-aware VMEM budget: leave headroom on v7x (64 MiB physical), allow
    # bigger tiles on the 128 MiB parts (v5e / v6e).
    try:
        cap = pltpu.get_tpu_info().vmem_capacity_bytes
    except Exception:
        cap = 64 * 1024 * 1024
    return int(min(cap * 3 // 4, 100 * 1024 * 1024))


# ----------------------------------------------------------------------------
# Wrapper (per-call path)
# ----------------------------------------------------------------------------
def global_pointer(x, mask, params, *, out_dtype=jnp.float32, max_q_block=512):
    B, S, hidden = x.shape
    heads = params["heads"]
    d = params["head_size"]
    assert hidden == params["hidden"]

    S_pad = _round_up(max(S, 1), 128)
    assert S_pad <= params["max_s_pad"], "increase max_seq_len in prepare_global_pointer_params"

    # Query-row tile: largest multiple of 128 (<= max_q_block) dividing S_pad, so the
    # output / bias VMEM footprint is independent of S^2 (important on v7x).
    TQ = next(c for c in (max_q_block, 512, 256, 128)
              if c % 128 == 0 and c <= S_pad and S_pad % c == 0)

    if mask is None:
        mask = jnp.ones((B, S), jnp.float32)
    mask_pad = jnp.pad(mask.astype(jnp.float32), ((0, 0), (0, S_pad - S)))
    mask_col = mask_pad.reshape(B, S_pad, 1)
    mask_row = mask_pad.reshape(B, 1, S_pad)
    x_pad = jnp.pad(x.astype(jnp.bfloat16), ((0, 0), (0, S_pad - S), (0, 0)))
    cos = params["cos"][:S_pad]
    sin = params["sin"][:S_pad]

    grid = (B, S_pad // TQ, heads)
    out = pl.pallas_call(
        global_pointer_kernel,
        out_shape=jax.ShapeDtypeStruct((B, heads, S_pad, S_pad), out_dtype),
        grid=grid,
        in_specs=[
            pl.BlockSpec((1, S_pad, hidden), lambda b, q, h: (b, 0, 0)),   # x (resident per batch)
            pl.BlockSpec((hidden, heads * d), lambda b, q, h: (0, 0)),     # Wq (all heads, resident)
            pl.BlockSpec((hidden, heads * d), lambda b, q, h: (0, 0)),     # Wk
            pl.BlockSpec((1, heads * d), lambda b, q, h: (0, 0)),          # bq
            pl.BlockSpec((1, heads * d), lambda b, q, h: (0, 0)),          # bk
            pl.BlockSpec((S_pad, d), lambda b, q, h: (0, 0)),              # cos table
            pl.BlockSpec((S_pad, d), lambda b, q, h: (0, 0)),              # sin table (signed)
            pl.BlockSpec((1, S_pad, 1), lambda b, q, h: (b, 0, 0)),        # mask (col form)
            pl.BlockSpec((1, 1, S_pad), lambda b, q, h: (b, 0, 0)),        # mask (row form)
        ],
        out_specs=pl.BlockSpec((1, 1, TQ, S_pad), lambda b, q, h: (b, h, q, 0)),
        scratch_shapes=[
            pltpu.VMEM((heads, TQ, d), jnp.bfloat16),      # q (current q-tile, all heads)
            pltpu.VMEM((heads, S_pad, d), jnp.bfloat16),   # k (full sequence, all heads)
            pltpu.VMEM((TQ, S_pad), jnp.float32),          # additive mask/tril bias
        ],
        compiler_params=pltpu.CompilerParams(
            # q-tile / heads axes must stay "arbitrary": k_scr is carried across
            # q-tiles and q_scr / bias_scr across heads (batch axis is parallel).
            # TODO(synk): for v7x megacore with B < 2, recompute k per q-tile and mark
            # the q-tile axis "parallel" instead.
            dimension_semantics=("parallel", "arbitrary", "arbitrary"),
            vmem_limit_bytes=_vmem_limit_bytes()),
    )(x_pad, params["wq"], params["wk"], params["bq"], params["bk"],
      cos, sin, mask_col, mask_row)

    if S_pad != S:
        out = out[:, :, :S, :S]
    return out


# ----------------------------------------------------------------------------
# Pure-JAX reference (mirrors the PyTorch module exactly, incl. tile-repeat).
# ----------------------------------------------------------------------------
def global_pointer_reference(x, w, b, mask, *, heads, head_size):
    B, S, hidden = x.shape
    d = head_size
    proj = x @ w + b[None, None, :]                           # (B, S, heads*2d)
    proj = proj.reshape(B, S, heads, 2 * d)
    qw, kw = proj[..., :d], proj[..., d:]

    pos_ids = jnp.arange(S, dtype=jnp.float32)
    idx = jnp.arange(d // 2, dtype=jnp.float32)
    freqs = jnp.power(10000.0, -2.0 * idx / d)
    ang = pos_ids[:, None] * freqs[None, :]
    cos_pos = jnp.concatenate([jnp.cos(ang), jnp.cos(ang)], -1)[None, :, None, :]
    sin_pos = jnp.concatenate([jnp.sin(ang), jnp.sin(ang)], -1)[None, :, None, :]

    def rope(t):
        t2 = jnp.stack([-t[..., 1::2], t[..., ::2]], axis=-1).reshape(t.shape)
        return t * cos_pos + t2 * sin_pos

    qw = rope(qw)
    kw = rope(kw)
    logits = jnp.einsum('bmhd,bnhd->bhmn', qw, kw)

    m = mask.astype(jnp.float32)
    logits = logits * m[:, None, :, None] + (-1e12) * (1 - m[:, None, :, None])
    logits = logits * m[:, None, None, :] + (-1e12) * (1 - m[:, None, None, :])
    tril = jnp.tril(jnp.ones((S, S), jnp.float32), k=-1)
    logits = logits - tril[None, None] * 1e12
    return logits / math.sqrt(d)


if __name__ == "__main__":
    heads, head_size, hidden = 4, 16, 32

    key = jax.random.PRNGKey(0)
    kx, kw_, kb, kx2 = jax.random.split(key, 4)
    W = jax.random.normal(kw_, (hidden, heads * head_size * 2), dtype=jnp.float32) * 0.05
    b = jax.random.normal(kb, (heads * head_size * 2,), dtype=jnp.float32) * 0.01

    # One-time prep (de-interleave, bf16 cast, RoPE tables) -- off the hot path.
    params = prepare_global_pointer_params(W, b, heads=heads, head_size=head_size,
                                           max_seq_len=256)

    # Case 1: small sequence (single 128-lane tile), f32 logits output.
    B, S = 2, 8
    x = jax.random.normal(kx, (B, S, hidden), dtype=jnp.float32)
    lengths = jnp.array([[S], [5]], dtype=jnp.int32)
    mask = (jnp.arange(S, dtype=jnp.int32)[None, :] < lengths).astype(jnp.float32)

    out = jax.block_until_ready(global_pointer(x, mask, params))
    ref = global_pointer_reference(x, W, b, mask, heads=heads, head_size=head_size)
    np.testing.assert_allclose(np.asarray(out), np.asarray(ref), rtol=2e-2, atol=2e-2)

    # Case 2: multi-tile sequence (S_pad = 256, S not a multiple of 128) with bf16
    # logits output (halves the HBM writeback of the S^2 tensor).
    B2, S2 = 2, 200
    x2 = jax.random.normal(kx2, (B2, S2, hidden), dtype=jnp.float32)
    lengths2 = jnp.array([[S2], [77]], dtype=jnp.int32)
    mask2 = (jnp.arange(S2, dtype=jnp.int32)[None, :] < lengths2).astype(jnp.float32)

    out2 = jax.block_until_ready(
        global_pointer(x2, mask2, params, out_dtype=jnp.bfloat16))
    ref2 = global_pointer_reference(x2, W, b, mask2, heads=heads, head_size=head_size)
    np.testing.assert_allclose(np.asarray(out2.astype(jnp.float32)), np.asarray(ref2),
                               rtol=3e-2, atol=3e-2)

    print("KERNEL_OK")
</pallas_src>

<mosaic_0001>
module attributes {stable_mosaic.version = 11 : i64} {
  func.func @global_pointer_kernel(%arg0: i32, %arg1: i32, %arg2: i32, %arg3: memref<1x128x32xbf16, #tpu.memory_space<vmem>>, %arg4: memref<32x64xbf16, #tpu.memory_space<vmem>>, %arg5: memref<32x64xbf16, #tpu.memory_space<vmem>>, %arg6: memref<1x64xf32, #tpu.memory_space<vmem>>, %arg7: memref<1x64xf32, #tpu.memory_space<vmem>>, %arg8: memref<128x16xf32, #tpu.memory_space<vmem>>, %arg9: memref<128x16xf32, #tpu.memory_space<vmem>>, %arg10: memref<1x128x1xf32, #tpu.memory_space<vmem>>, %arg11: memref<1x1x128xf32, #tpu.memory_space<vmem>>, %arg12: memref<1x1x128x128xf32, #tpu.memory_space<vmem>>, %arg13: memref<4x128x16xbf16, #tpu.memory_space<vmem>>, %arg14: memref<4x128x16xbf16, #tpu.memory_space<vmem>>, %arg15: memref<128x128xf32, #tpu.memory_space<vmem>>) attributes {dimension_semantics = [#tpu.dimension_semantics<parallel>, #tpu.dimension_semantics<arbitrary>, #tpu.dimension_semantics<arbitrary>], iteration_bounds = array<i64: 2, 1, 4>, scalar_prefetch = 0 : i64, scratch_operands = 3 : i64, tpu.core_type = #tpu.core_type<tc>, window_params = [{transform_indices = @transform_0, window_bounds = array<i64: 1, 128, 32>}, {pipeline_mode = #tpu.pipeline_mode<synchronous>, transform_indices = @transform_1, window_bounds = array<i64: 32, 64>}, {pipeline_mode = #tpu.pipeline_mode<synchronous>, transform_indices = @transform_2, window_bounds = array<i64: 32, 64>}, {pipeline_mode = #tpu.pipeline_mode<synchronous>, transform_indices = @transform_3, window_bounds = array<i64: 1, 64>}, {pipeline_mode = #tpu.pipeline_mode<synchronous>, transform_indices = @transform_4, window_bounds = array<i64: 1, 64>}, {pipeline_mode = #tpu.pipeline_mode<synchronous>, transform_indices = @transform_5, window_bounds = array<i64: 128, 16>}, {pipeline_mode = #tpu.pipeline_mode<synchronous>, transform_indices = @transform_6, window_bounds = array<i64: 128, 16>}, {transform_indices = @transform_7, window_bounds = array<i64: 1, 128, 1>}, {transform_indices = @transform_8, window_bounds = array<i64: 1, 1, 128>}, {transform_indices = @transform_9, window_bounds = array<i64: 1, 1, 128, 128>}]} {
    %c128_i32 = arith.constant 128 : i32
    %0 = arith.muli %arg1, %c128_i32 : i32
    %1 = tpu.assume_multiple %0, 128 : i32
    %c0_i32 = arith.constant 0 : i32
    %2 = arith.cmpi eq, %arg2, %c0_i32 : i32
    %3 = arith.extui %2 : i1 to i32
    %cst = arith.constant -2.500000e+11 : f32
    %c0_i32_0 = arith.constant 0 : i32
    %4 = arith.cmpi ne, %3, %c0_i32_0 : i32
    scf.if %4 {
      %c0_11 = arith.constant 0 : index
      %17 = arith.index_cast %1 : i32 to index
      %c0_12 = arith.constant 0 : index
      %18 = vector.load %arg10[%c0_11, %17, %c0_12] : memref<1x128x1xf32, #tpu.memory_space<vmem>>, vector<1x128x1xf32>
      %19 = vector.shape_cast %18 : vector<1x128x1xf32> to vector<128x1xf32>
      %c0_13 = arith.constant 0 : index
      %c0_14 = arith.constant 0 : index
      %c0_15 = arith.constant 0 : index
      %20 = vector.load %arg11[%c0_13, %c0_14, %c0_15] : memref<1x1x128xf32, #tpu.memory_space<vmem>>, vector<1x1x128xf32>
      %21 = vector.shape_cast %20 : vector<1x1x128xf32> to vector<1x128xf32>
      %22 = tpu.iota {dimensions = array<i32: 0>} : vector<128x128xi32>
      %23 = vector.broadcast %1 : i32 to vector<128x128xi32>
      %24 = arith.addi %22, %23 : vector<128x128xi32>
      %25 = tpu.iota {dimensions = array<i32: 1>} : vector<128x128xi32>
      %26 = vector.broadcast %19 : vector<128x1xf32> to vector<128x128xf32>
      %27 = vector.broadcast %21 : vector<1x128xf32> to vector<128x128xf32>
      %28 = arith.mulf %26, %27 : vector<128x128xf32>
      %cst_16 = arith.constant 1.000000e+00 : f32
      %29 = vector.broadcast %cst_16 : f32 to vector<128x128xf32>
      %30 = arith.subf %29, %28 : vector<128x128xf32>
      %31 = vector.broadcast %cst : f32 to vector<128x128xf32>
      %32 = arith.mulf %31, %30 : vector<128x128xf32>
      %33 = arith.cmpi sgt, %24, %25 : vector<128x128xi32>
      %cst_17 = arith.constant 0.000000e+00 : f32
      %34 = vector.broadcast %cst : f32 to vector<128x128xf32>
      %35 = vector.broadcast %cst_17 : f32 to vector<128x128xf32>
      %36 = arith.select %33, %34, %35 : vector<128x128xi1>, vector<128x128xf32>
      %37 = arith.addf %32, %36 : vector<128x128xf32>
      %c0_18 = arith.constant 0 : index
      %c0_19 = arith.constant 0 : index
      %38 = vector.load %arg15[%c0_18, %c0_19] : memref<128x128xf32, #tpu.memory_space<vmem>>, vector<128x128xf32>
      tpu.vector_store %arg15[%c0_18, %c0_19], %37 {strides = array<i32>} : memref<128x128xf32, #tpu.memory_space<vmem>>, vector<128x128xf32>,
      %c0_20 = arith.constant 0 : index
      %39 = arith.index_cast %1 : i32 to index
      %c0_21 = arith.constant 0 : index
      %40 = vector.load %arg3[%c0_20, %39, %c0_21] : memref<1x128x32xbf16, #tpu.memory_space<vmem>>, vector<1x128x32xbf16>
      %41 = vector.shape_cast %40 : vector<1x128x32xbf16> to vector<128x32xbf16>
      %c0_22 = arith.constant 0 : index
      %c0_23 = arith.constant 0 : index
      %42 = vector.load %arg4[%c0_22, %c0_23] : memref<32x64xbf16, #tpu.memory_space<vmem>>, vector<32x64xbf16>
      %cst_24 = arith.constant dense<0.000000e+00> : vector<128x64xf32>
      %43 = tpu.matmul %41, %42, %cst_24 {dimension_numbers = #tpu.dot_dimension_numbers<[1], [0], [0], [1], [0, 0, 1, 1], [], []>} : vector<128x32xbf16>, vector<32x64xbf16>, vector<128x64xf32> -> vector<128x64xf32>
      %c0_25 = arith.constant 0 : index
      %c0_26 = arith.constant 0 : index
      %44 = vector.load %arg6[%c0_25, %c0_26] : memref<1x64xf32, #tpu.memory_space<vmem>>, vector<1x64xf32>
      %45 = vector.broadcast %44 : vector<1x64xf32> to vector<128x64xf32>
      %46 = arith.addf %43, %45 : vector<128x64xf32>
      %47 = arith.index_cast %1 : i32 to index
      %c0_27 = arith.constant 0 : index
      %48 = vector.load %arg8[%47, %c0_27] : memref<128x16xf32, #tpu.memory_space<vmem>>, vector<128x16xf32>
      %49 = arith.index_cast %1 : i32 to index
      %c0_28 = arith.constant 0 : index
      %50 = vector.load %arg9[%49, %c0_28] : memref<128x16xf32, #tpu.memory_space<vmem>>, vector<128x16xf32>
      %cst_29 = arith.constant 2.500000e-01 : f32
      %51 = vector.broadcast %cst_29 : f32 to vector<128x1xf32>
      %52 = arith.mulf %19, %51 : vector<128x1xf32>
      %53 = vector.extract_strided_slice %46 {offsets = [0, 0], sizes = [128, 16], strides = [1, 1]} : vector<128x64xf32> to vector<128x16xf32>
      %54 = vector.extract_strided_slice %53 {offsets = [0, 8], sizes = [128, 8], strides = [1, 1]} : vector<128x16xf32> to vector<128x8xf32>
      %55 = vector.extract_strided_slice %53 {offsets = [0, 0], sizes = [128, 8], strides = [1, 1]} : vector<128x16xf32> to vector<128x8xf32>
      %56 = tpu.concatenate %54, %55 in 1 : vector<128x8xf32>, vector<128x8xf32> -> vector<128x16xf32>
      %57 = arith.mulf %53, %48 : vector<128x16xf32>
      %58 = arith.mulf %56, %50 : vector<128x16xf32>
      %59 = arith.addf %57, %58 : vector<128x16xf32>
      %60 = vector.broadcast %52 : vector<128x1xf32> to vector<128x16xf32>
      %61 = arith.mulf %59, %60 : vector<128x16xf32>
      %62 = arith.truncf %61 : vector<128x16xf32> to vector<128x16xbf16>
      %c0_30 = arith.constant 0 : index
      %c0_31 = arith.constant 0 : index
      %c0_32 = arith.constant 0 : index
      %63 = vector.load %arg13[%c0_30, %c0_31, %c0_32] : memref<4x128x16xbf16, #tpu.memory_space<vmem>>, vector<1x128x16xbf16>
      %64 = vector.shape_cast %63 : vector<1x128x16xbf16> to vector<128x16xbf16>
      %65 = vector.shape_cast %62 : vector<128x16xbf16> to vector<1x128x16xbf16>
      tpu.vector_store %arg13[%c0_30, %c0_31, %c0_32], %65 {strides = array<i32>} : memref<4x128x16xbf16, #tpu.memory_space<vmem>>, vector<1x128x16xbf16>,
      %66 = vector.extract_strided_slice %46 {offsets = [0, 16], sizes = [128, 16], strides = [1, 1]} : vector<128x64xf32> to vector<128x16xf32>
      %67 = vector.extract_strided_slice %66 {offsets = [0, 8], sizes = [128, 8], strides = [1, 1]} : vector<128x16xf32> to vector<128x8xf32>
      %68 = vector.extract_strided_slice %66 {offsets = [0, 0], sizes = [128, 8], strides = [1, 1]} : vector<128x16xf32> to vector<128x8xf32>
      %69 = tpu.concatenate %67, %68 in 1 : vector<128x8xf32>, vector<128x8xf32> -> vector<128x16xf32>
      %70 = arith.mulf %66, %48 : vector<128x16xf32>
      %71 = arith.mulf %69, %50 : vector<128x16xf32>
      %72 = arith.addf %70, %71 : vector<128x16xf32>
      %73 = vector.broadcast %52 : vector<128x1xf32> to vector<128x16xf32>
      %74 = arith.mulf %72, %73 : vector<128x16xf32>
      %75 = arith.truncf %74 : vector<128x16xf32> to vector<128x16xbf16>
      %c1 = arith.constant 1 : index
      %c0_33 = arith.constant 0 : index
      %c0_34 = arith.constant 0 : index
      %76 = vector.load %arg13[%c1, %c0_33, %c0_34] : memref<4x128x16xbf16, #tpu.memory_space<vmem>>, vector<1x128x16xbf16>
      %77 = vector.shape_cast %76 : vector<1x128x16xbf16> to vector<128x16xbf16>
      %78 = vector.shape_cast %75 : vector<128x16xbf16> to vector<1x128x16xbf16>
      tpu.vector_store %arg13[%c1, %c0_33, %c0_34], %78 {strides = array<i32>} : memref<4x128x16xbf16, #tpu.memory_space<vmem>>, vector<1x128x16xbf16>,
      %79 = vector.extract_strided_slice %46 {offsets = [0, 32], sizes = [128, 16], strides = [1, 1]} : vector<128x64xf32> to vector<128x16xf32>
      %80 = vector.extract_strided_slice %79 {offsets = [0, 8], sizes = [128, 8], strides = [1, 1]} : vector<128x16xf32> to vector<128x8xf32>
      %81 = vector.extract_strided_slice %79 {offsets = [0, 0], sizes = [128, 8], strides = [1, 1]} : vector<128x16xf32> to vector<128x8xf32>
      %82 = tpu.concatenate %80, %81 in 1 : vector<128x8xf32>, vector<128x8xf32> -> vector<128x16xf32>
      %83 = arith.mulf %79, %48 : vector<128x16xf32>
      %84 = arith.mulf %82, %50 : vector<128x16xf32>
      %85 = arith.addf %83, %84 : vector<128x16xf32>
      %86 = vector.broadcast %52 : vector<128x1xf32> to vector<128x16xf32>
      %87 = arith.mulf %85, %86 : vector<128x16xf32>
      %88 = arith.truncf %87 : vector<128x16xf32> to vector<128x16xbf16>
      %c2 = arith.constant 2 : index
      %c0_35 = arith.constant 0 : index
      %c0_36 = arith.constant 0 : index
      %89 = vector.load %arg13[%c2, %c0_35, %c0_36] : memref<4x128x16xbf16, #tpu.memory_space<vmem>>, vector<1x128x16xbf16>
      %90 = vector.shape_cast %89 : vector<1x128x16xbf16> to vector<128x16xbf16>
      %91 = vector.shape_cast %88 : vector<128x16xbf16> to vector<1x128x16xbf16>
      tpu.vector_store %arg13[%c2, %c0_35, %c0_36], %91 {strides = array<i32>} : memref<4x128x16xbf16, #tpu.memory_space<vmem>>, vector<1x128x16xbf16>,
      %92 = vector.extract_strided_slice %46 {offsets = [0, 48], sizes = [128, 16], strides = [1, 1]} : vector<128x64xf32> to vector<128x16xf32>
      %93 = vector.extract_strided_slice %92 {offsets = [0, 8], sizes = [128, 8], strides = [1, 1]} : vector<128x16xf32> to vector<128x8xf32>
      %94 = vector.extract_strided_slice %92 {offsets = [0, 0], sizes = [128, 8], strides = [1, 1]} : vector<128x16xf32> to vector<128x8xf32>
      %95 = tpu.concatenate %93, %94 in 1 : vector<128x8xf32>, vector<128x8xf32> -> vector<128x16xf32>
      %96 = arith.mulf %92, %48 : vector<128x16xf32>
      %97 = arith.mulf %95, %50 : vector<128x16xf32>
      %98 = arith.addf %96, %97 : vector<128x16xf32>
      %99 = vector.broadcast %52 : vector<128x1xf32> to vector<128x16xf32>
      %100 = arith.mulf %98, %99 : vector<128x16xf32>
      %101 = arith.truncf %100 : vector<128x16xf32> to vector<128x16xbf16>
      %c3 = arith.constant 3 : index
      %c0_37 = arith.constant 0 : index
      %c0_38 = arith.constant 0 : index
      %102 = vector.load %arg13[%c3, %c0_37, %c0_38] : memref<4x128x16xbf16, #tpu.memory_space<vmem>>, vector<1x128x16xbf16>
      %103 = vector.shape_cast %102 : vector<1x128x16xbf16> to vector<128x16xbf16>
      %104 = vector.shape_cast %101 : vector<128x16xbf16> to vector<1x128x16xbf16>
      tpu.vector_store %arg13[%c3, %c0_37, %c0_38], %104 {strides = array<i32>} : memref<4x128x16xbf16, #tpu.memory_space<vmem>>, vector<1x128x16xbf16>,
      %c0_i32_39 = arith.constant 0 : i32
      %105 = arith.cmpi eq, %arg1, %c0_i32_39 : i32
      %106 = arith.extui %105 : i1 to i32
      %c0_i32_40 = arith.constant 0 : i32
      %107 = arith.cmpi ne, %106, %c0_i32_40 : i32
      scf.if %107 {
        %c0_41 = arith.constant 0 : index
        %c0_42 = arith.constant 0 : index
        %c0_43 = arith.constant 0 : index
        %108 = vector.load %arg3[%c0_41, %c0_42, %c0_43] : memref<1x128x32xbf16, #tpu.memory_space<vmem>>, vector<1x128x32xbf16>
        %109 = vector.shape_cast %108 : vector<1x128x32xbf16> to vector<128x32xbf16>
        %c0_44 = arith.constant 0 : index
        %c0_45 = arith.constant 0 : index
        %110 = vector.load %arg5[%c0_44, %c0_45] : memref<32x64xbf16, #tpu.memory_space<vmem>>, vector<32x64xbf16>
        %cst_46 = arith.constant dense<0.000000e+00> : vector<128x64xf32>
        %111 = tpu.matmul %109, %110, %cst_46 {dimension_numbers = #tpu.dot_dimension_numbers<[1], [0], [0], [1], [0, 0, 1, 1], [], []>} : vector<128x32xbf16>, vector<32x64xbf16>, vector<128x64xf32> -> vector<128x64xf32>
        %c0_47 = arith.constant 0 : index
        %c0_48 = arith.constant 0 : index
        %112 = vector.load %arg7[%c0_47, %c0_48] : memref<1x64xf32, #tpu.memory_space<vmem>>, vector<1x64xf32>
        %113 = vector.broadcast %112 : vector<1x64xf32> to vector<128x64xf32>
        %114 = arith.addf %111, %113 : vector<128x64xf32>
        %c0_49 = arith.constant 0 : index
        %c0_50 = arith.constant 0 : index
        %c0_51 = arith.constant 0 : index
        %115 = vector.load %arg10[%c0_49, %c0_50, %c0_51] : memref<1x128x1xf32, #tpu.memory_space<vmem>>, vector<1x128x1xf32>
        %116 = vector.shape_cast %115 : vector<1x128x1xf32> to vector<128x1xf32>
        %c0_52 = arith.constant 0 : index
        %c0_53 = arith.constant 0 : index
        %117 = vector.load %arg8[%c0_52, %c0_53] : memref<128x16xf32, #tpu.memory_space<vmem>>, vector<128x16xf32>
        %c0_54 = arith.constant 0 : index
        %c0_55 = arith.constant 0 : index
        %118 = vector.load %arg9[%c0_54, %c0_55] : memref<128x16xf32, #tpu.memory_space<vmem>>, vector<128x16xf32>
        %119 = vector.extract_strided_slice %114 {offsets = [0, 0], sizes = [128, 16], strides = [1, 1]} : vector<128x64xf32> to vector<128x16xf32>
        %120 = vector.extract_strided_slice %119 {offsets = [0, 8], sizes = [128, 8], strides = [1, 1]} : vector<128x16xf32> to vector<128x8xf32>
        %121 = vector.extract_strided_slice %119 {offsets = [0, 0], sizes = [128, 8], strides = [1, 1]} : vector<128x16xf32> to vector<128x8xf32>
        %122 = tpu.concatenate %120, %121 in 1 : vector<128x8xf32>, vector<128x8xf32> -> vector<128x16xf32>
        %123 = arith.mulf %119, %117 : vector<128x16xf32>
        %124 = arith.mulf %122, %118 : vector<128x16xf32>
        %125 = arith.addf %123, %124 : vector<128x16xf32>
        %126 = vector.broadcast %116 : vector<128x1xf32> to vector<128x16xf32>
        %127 = arith.mulf %125, %126 : vector<128x16xf32>
        %128 = arith.truncf %127 : vector<128x16xf32> to vector<128x16xbf16>
        %c0_56 = arith.constant 0 : index
        %c0_57 = arith.constant 0 : index
        %c0_58 = arith.constant 0 : index
        %129 = vector.load %arg14[%c0_56, %c0_57, %c0_58] : memref<4x128x16xbf16, #tpu.memory_space<vmem>>, vector<1x128x16xbf16>
        %130 = vector.shape_cast %129 : vector<1x128x16xbf16> to vector<128x16xbf16>
        %131 = vector.shape_cast %128 : vector<128x16xbf16> to vector<1x128x16xbf16>
        tpu.vector_store %arg14[%c0_56, %c0_57, %c0_58], %131 {strides = array<i32>} : memref<4x128x16xbf16, #tpu.memory_space<vmem>>, vector<1x128x16xbf16>,
        %132 = vector.extract_strided_slice %114 {offsets = [0, 16], sizes = [128, 16], strides = [1, 1]} : vector<128x64xf32> to vector<128x16xf32>
        %133 = vector.extract_strided_slice %132 {offsets = [0, 8], sizes = [128, 8], strides = [1, 1]} : vector<128x16xf32> to vector<128x8xf32>
        %134 = vector.extract_strided_slice %132 {offsets = [0, 0], sizes = [128, 8], strides = [1, 1]} : vector<128x16xf32> to vector<128x8xf32>
        %135 = tpu.concatenate %133, %134 in 1 : vector<128x8xf32>, vector<128x8xf32> -> vector<128x16xf32>
        %136 = arith.mulf %132, %117 : vector<128x16xf32>
        %137 = arith.mulf %135, %118 : vector<128x16xf32>
        %138 = arith.addf %136, %137 : vector<128x16xf32>
        %139 = vector.broadcast %116 : vector<128x1xf32> to vector<128x16xf32>
        %140 = arith.mulf %138, %139 : vector<128x16xf32>
        %141 = arith.truncf %140 : vector<128x16xf32> to vector<128x16xbf16>
        %c1_59 = arith.constant 1 : index
        %c0_60 = arith.constant 0 : index
        %c0_61 = arith.constant 0 : index
        %142 = vector.load %arg14[%c1_59, %c0_60, %c0_61] : memref<4x128x16xbf16, #tpu.memory_space<vmem>>, vector<1x128x16xbf16>
        %143 = vector.shape_cast %142 : vector<1x128x16xbf16> to vector<128x16xbf16>
        %144 = vector.shape_cast %141 : vector<128x16xbf16> to vector<1x128x16xbf16>
        tpu.vector_store %arg14[%c1_59, %c0_60, %c0_61], %144 {strides = array<i32>} : memref<4x128x16xbf16, #tpu.memory_space<vmem>>, vector<1x128x16xbf16>,
        %145 = vector.extract_strided_slice %114 {offsets = [0, 32], sizes = [128, 16], strides = [1, 1]} : vector<128x64xf32> to vector<128x16xf32>
        %146 = vector.extract_strided_slice %145 {offsets = [0, 8], sizes = [128, 8], strides = [1, 1]} : vector<128x16xf32> to vector<128x8xf32>
        %147 = vector.extract_strided_slice %145 {offsets = [0, 0], sizes = [128, 8], strides = [1, 1]} : vector<128x16xf32> to vector<128x8xf32>
        %148 = tpu.concatenate %146, %147 in 1 : vector<128x8xf32>, vector<128x8xf32> -> vector<128x16xf32>
        %149 = arith.mulf %145, %117 : vector<128x16xf32>
        %150 = arith.mulf %148, %118 : vector<128x16xf32>
        %151 = arith.addf %149, %150 : vector<128x16xf32>
        %152 = vector.broadcast %116 : vector<128x1xf32> to vector<128x16xf32>
        %153 = arith.mulf %151, %152 : vector<128x16xf32>
        %154 = arith.truncf %153 : vector<128x16xf32> to vector<128x16xbf16>
        %c2_62 = arith.constant 2 : index
        %c0_63 = arith.constant 0 : index
        %c0_64 = arith.constant 0 : index
        %155 = vector.load %arg14[%c2_62, %c0_63, %c0_64] : memref<4x128x16xbf16, #tpu.memory_space<vmem>>, vector<1x128x16xbf16>
        %156 = vector.shape_cast %155 : vector<1x128x16xbf16> to vector<128x16xbf16>
        %157 = vector.shape_cast %154 : vector<128x16xbf16> to vector<1x128x16xbf16>
        tpu.vector_store %arg14[%c2_62, %c0_63, %c0_64], %157 {strides = array<i32>} : memref<4x128x16xbf16, #tpu.memory_space<vmem>>, vector<1x128x16xbf16>,
        %158 = vector.extract_strided_slice %114 {offsets = [0, 48], sizes = [128, 16], strides = [1, 1]} : vector<128x64xf32> to vector<128x16xf32>
        %159 = vector.extract_strided_slice %158 {offsets = [0, 8], sizes = [128, 8], strides = [1, 1]} : vector<128x16xf32> to vector<128x8xf32>
        %160 = vector.extract_strided_slice %158 {offsets = [0, 0], sizes = [128, 8], strides = [1, 1]} : vector<128x16xf32> to vector<128x8xf32>
        %161 = tpu.concatenate %159, %160 in 1 : vector<128x8xf32>, vector<128x8xf32> -> vector<128x16xf32>
        %162 = arith.mulf %158, %117 : vector<128x16xf32>
        %163 = arith.mulf %161, %118 : vector<128x16xf32>
        %164 = arith.addf %162, %163 : vector<128x16xf32>
        %165 = vector.broadcast %116 : vector<128x1xf32> to vector<128x16xf32>
        %166 = arith.mulf %164, %165 : vector<128x16xf32>
        %167 = arith.truncf %166 : vector<128x16xf32> to vector<128x16xbf16>
        %c3_65 = arith.constant 3 : index
        %c0_66 = arith.constant 0 : index
        %c0_67 = arith.constant 0 : index
        %168 = vector.load %arg14[%c3_65, %c0_66, %c0_67] : memref<4x128x16xbf16, #tpu.memory_space<vmem>>, vector<1x128x16xbf16>
        %169 = vector.shape_cast %168 : vector<1x128x16xbf16> to vector<128x16xbf16>
        %170 = vector.shape_cast %167 : vector<128x16xbf16> to vector<1x128x16xbf16>
        tpu.vector_store %arg14[%c3_65, %c0_66, %c0_67], %170 {strides = array<i32>} : memref<4x128x16xbf16, #tpu.memory_space<vmem>>, vector<1x128x16xbf16>,
      } else {
      }
    } else {
    }
    %5 = arith.index_cast %arg2 : i32 to index
    %c0 = arith.constant 0 : index
    %c0_1 = arith.constant 0 : index
    %6 = vector.load %arg13[%5, %c0, %c0_1] : memref<4x128x16xbf16, #tpu.memory_space<vmem>>, vector<1x128x16xbf16>
    %7 = vector.shape_cast %6 : vector<1x128x16xbf16> to vector<128x16xbf16>
    %8 = arith.index_cast %arg2 : i32 to index
    %c0_2 = arith.constant 0 : index
    %c0_3 = arith.constant 0 : index
    %9 = vector.load %arg14[%8, %c0_2, %c0_3] : memref<4x128x16xbf16, #tpu.memory_space<vmem>>, vector<1x128x16xbf16>
    %10 = vector.shape_cast %9 : vector<1x128x16xbf16> to vector<128x16xbf16>
    %cst_4 = arith.constant dense<0.000000e+00> : vector<128x128xf32>
    %11 = tpu.matmul %7, %10, %cst_4 {dimension_numbers = #tpu.dot_dimension_numbers<[1], [1], [0], [0], [0, 0, 1, 0], [], []>} : vector<128x16xbf16>, vector<128x16xbf16>, vector<128x128xf32> -> vector<128x128xf32>
    %c0_5 = arith.constant 0 : index
    %c0_6 = arith.constant 0 : index
    %12 = vector.load %arg15[%c0_5, %c0_6] : memref<128x128xf32, #tpu.memory_space<vmem>>, vector<128x128xf32>
    %13 = arith.addf %11, %12 : vector<128x128xf32>
    %c0_7 = arith.constant 0 : index
    %c0_8 = arith.constant 0 : index
    %c0_9 = arith.constant 0 : index
    %c0_10 = arith.constant 0 : index
    %14 = vector.load %arg12[%c0_7, %c0_8, %c0_9, %c0_10] : memref<1x1x128x128xf32, #tpu.memory_space<vmem>>, vector<1x1x128x128xf32>
    %15 = vector.shape_cast %14 : vector<1x1x128x128xf32> to vector<128x128xf32>
    %16 = vector.shape_cast %13 : vector<128x128xf32> to vector<1x1x128x128xf32>
    tpu.vector_store %arg12[%c0_7, %c0_8, %c0_9, %c0_10], %16 {strides = array<i32>} : memref<1x1x128x128xf32, #tpu.memory_space<vmem>>, vector<1x1x128x128xf32>,
    return
  }
  func.func @transform_0(%arg0: i32, %arg1: i32, %arg2: i32) -> (i32, i32, i32) {
    %c0_i32 = arith.constant 0 : i32
    %c0_i32_0 = arith.constant 0 : i32
    %c0_i32_1 = arith.constant 0 : i32
    return %arg0, %c0_i32, %c0_i32_0 : i32, i32, i32
  }
  func.func @transform_1(%arg0: i32, %arg1: i32, %arg2: i32) -> (i32, i32) {
    %c0_i32 = arith.constant 0 : i32
    %c0_i32_0 = arith.constant 0 : i32
    %c0_i32_1 = arith.constant 0 : i32
    return %c0_i32, %c0_i32_0 : i32, i32
  }
  func.func @transform_2(%arg0: i32, %arg1: i32, %arg2: i32) -> (i32, i32) {
    %c0_i32 = arith.constant 0 : i32
    %c0_i32_0 = arith.constant 0 : i32
    %c0_i32_1 = arith.constant 0 : i32
    return %c0_i32, %c0_i32_0 : i32, i32
  }
  func.func @transform_3(%arg0: i32, %arg1: i32, %arg2: i32) -> (i32, i32) {
    %c0_i32 = arith.constant 0 : i32
    %c0_i32_0 = arith.constant 0 : i32
    %c0_i32_1 = arith.constant 0 : i32
    return %c0_i32, %c0_i32_0 : i32, i32
  }
  func.func @transform_4(%arg0: i32, %arg1: i32, %arg2: i32) -> (i32, i32) {
    %c0_i32 = arith.constant 0 : i32
    %c0_i32_0 = arith.constant 0 : i32
    %c0_i32_1 = arith.constant 0 : i32
    return %c0_i32, %c0_i32_0 : i32, i32
  }
  func.func @transform_5(%arg0: i32, %arg1: i32, %arg2: i32) -> (i32, i32) {
    %c0_i32 = arith.constant 0 : i32
    %c0_i32_0 = arith.constant 0 : i32
    %c0_i32_1 = arith.constant 0 : i32
    return %c0_i32, %c0_i32_0 : i32, i32
  }
  func.func @transform_6(%arg0: i32, %arg1: i32, %arg2: i32) -> (i32, i32) {
    %c0_i32 = arith.constant 0 : i32
    %c0_i32_0 = arith.constant 0 : i32
    %c0_i32_1 = arith.constant 0 : i32
    return %c0_i32, %c0_i32_0 : i32, i32
  }
  func.func @transform_7(%arg0: i32, %arg1: i32, %arg2: i32) -> (i32, i32, i32) {
    %c0_i32 = arith.constant 0 : i32
    %c0_i32_0 = arith.constant 0 : i32
    %c0_i32_1 = arith.constant 0 : i32
    return %arg0, %c0_i32, %c0_i32_0 : i32, i32, i32
  }
  func.func @transform_8(%arg0: i32, %arg1: i32, %arg2: i32) -> (i32, i32, i32) {
    %c0_i32 = arith.constant 0 : i32
    %c0_i32_0 = arith.constant 0 : i32
    %c0_i32_1 = arith.constant 0 : i32
    return %arg0, %c0_i32, %c0_i32_0 : i32, i32, i32
  }
  func.func @transform_9(%arg0: i32, %arg1: i32, %arg2: i32) -> (i32, i32, i32, i32) {
    %c0_i32 = arith.constant 0 : i32
    %c0_i32_0 = arith.constant 0 : i32
    return %arg0, %arg2, %arg1, %c0_i32 : i32, i32, i32, i32
  }
}

</mosaic_0001>

<bundles_post_ra>
// kernel: tpu_custom_call.1
= control target key start
LH: loop header
LB: loop body
LE: loop exit
PB: predicated region body
PF: predicated region fallthrough
CT: control target
= control target key end

     0   :  { %14 = vsyncpa [#allocation6], 0  ;;  %s8151_s0 = inlined_call_operand.vmem [shape: bf16[2,128,32], index: 0, kind: input, shape index: {}]   ;;  %s8152_s1 = inlined_call_operand.vmem [shape: bf16[32,64], index: 1, kind: input, shape index: {}]   ;;  %s8153_s2 = inlined_call_operand.vmem [shape: bf16[32,64], index: 2, kind: input, shape index: {}]   ;;  %s8154_s3 = inlined_call_operand.vmem [shape: f32[1,64], index: 3, kind: input, shape index: {}]   ;;  %s8155_s4 = inlined_call_operand.vmem [shape: f32[1,64], index: 4, kind: input, shape index: {}]   ;;  %s8156_s5 = inlined_call_operand.vmem [shape: f32[128,16], index: 5, kind: input, shape index: {}]   ;;  %s8157_s6 = inlined_call_operand.vmem [shape: f32[128,16], index: 6, kind: input, shape index: {}]   ;;  %s8158_s7 = inlined_call_operand.vmem [shape: f32[2,128,1], index: 7, kind: input, shape index: {}]   ;;  %s8159_s8 = inlined_call_operand.vmem [shape: f32[2,1,128], index: 8, kind: input, shape index: {}]   ;;  %s8160_s9 = inlined_call_operand.hbm [shape: f32[2,4,128,128], index: 9, kind: output, shape index: {}]  }
   0x1   :  { %16 = vsyncpa [#allocation6 + $0x1], 0  ;;  %s5243_s30 = smov 0   ;;  %s5245_s10 = smov 0  }
   0x2   :  { %s5247_s11 = smov 0   ;;  %s5249_s12 = smov 0  }
   0x3   :  { %s5251_s13 = smov 0   ;;  %s5253_s14 = smov 0  }
   0x4   :  { %s5255_s15 = smov 0   ;;  %s5257_s16 = smov 0  }
   0x5 LB: > { %8319 = sst [smem:[#allocation8_spill]] %s5155_s11  ;;  %s4437_s17 = sadd.s32 4294967295, %s5175_s16   ;;  %s5175_s16 = sphi %s5257_s16, %s22_s16   ;;  %s5171_s15 = sphi %s5255_s15, %s8591_s15   ;;  %s5167_s14 = sphi %s5253_s14, %s8590_s14   ;;  %s5163_s13 = sphi %s5251_s13, %s8589_s13   ;;  %s5159_s12 = sphi %s5249_s12, %s8588_s12   ;;  %s5155_s11 = sphi %s5247_s11, %s8587_s11   ;;  %s5151_s10 = sphi %s5245_s10, %s8593_s10   ;;  %s5147_s30 = sphi %s5243_s30, %s8592_s30  }
   0x6   : > { %8320 = sst [smem:[#allocation9_spill]] %s5167_s14  ;;  %s4438_s18 = sadd.s32 4294967294, %s5175_s16  }
   0x7   : > { %8321 = sst [smem:[#allocation10_spill]] %s5171_s15  ;;  %s34_s19 = sadd.s32 1, %s5167_s14 }
   0x8   : > { %p35_p0 = scmp.ge.s32.totalorder %s34_s19, 4  ;;  %s41_s20 = sadd.s32 1, %s5171_s15 }
   0x9   : > { %p266_p1 = scmp.ne.s32.totalorder %s5155_s11, %s5151_s10  ;;  %p267_p2 = scmp.eq.s32.totalorder %s4437_s17, 7 }
   0xa   : > { %s8595_s19 = smov (%p35_p0, %s34_s19), 0  ;;  %s8597_s20 = smov (!%p35_p0, %s41_s20), %s5171_s15 }
   0xb   : > { %8322 = sst [smem:[#allocation11_spill]] %s8595_s19  ;;  %s250_s21 = ssub.s32 %s5167_s14, %s8595_s19 }
   0xc   : > { %p5294_p3 = por %p267_p2, %p266_p1  ;;  %p43_p4 = scmp.ge.s32.totalorder %s8597_s20, 2 }
   0xd   : > { %p272_p5 = scmp.ne.s32.totalorder %s5151_s10, %s5147_s30  ;;  %p273_p6 = scmp.eq.s32.totalorder %s4438_s18, 7 }
   0xe   : > { %p4441_p7 = scmp.ge.s32.totalorder %s5175_s16, 1  ;;  %s8599_s20 = smov (%p43_p4, %s8597_s20), 0 }
   0xf   : > { %8324 = sst [smem:[#allocation12_spill]] %s8599_s20  ;;  %p5303_p8 = por %p273_p6, %p272_p5 }
  0x10   : > { %p331_p9 = scmp.lt.s32.totalorder %s5175_s16, 9  ;;  %s249_s24 = ssub.s32 %s5171_s15, %s8599_s20 }
  0x11   : > { %s256_s25 = sadd.s32 1, %s5155_s11  ;;  %s251_s26 = sor.u32 %s250_s21, %s249_s24 }
  0x12   : > { %p332_p10 = pnand %p4441_p7, %p331_p9  ;;  %p254_p11 = scmp.eq.s32.totalorder %s251_s26, 0 }
  0x13   : > { %s8165_s28 = sand.u32 (!%p332_p10), 1, %s5151_s10   ;;  %p375_p12 = scmp.lt.s32.totalorder (!%p332_p10), %s5163_s13, 1 }
  0x14   : > { %s5312_s27 = scalar_select %p254_p11, %s5155_s11, %s256_s25  }
  0x15   : > { %335 = sbr.rel (%p332_p10) target bundleno = 1948 (0x79c), region = 56  ;;  %s4442_s29 = sshll.u32 (!%p332_p10), %s8165_s28, 7 }
  0x16   : > { %8326 = sst [smem:[#allocation13_spill]] %s5312_s27  ;;  %s5337_s11 = scalar_lea.vmem (!%p332_p10), [#allocation5], %s4442_s29 }
  0x17   : > { %p4447_p13 = scmp.ne.s32.totalorder (!%p332_p10), %s5159_s12, 0 }
  0x1a   : > { %s5319_s17 = scalar_select %p375_p12, %s5163_s13, 1 }
  0x1b   : > { %394 = sbr.rel (%p4447_p13) target bundleno = 1654 (0x676), region = 60 }
  0x1c   : > { %s4648_s18 = sshll.u32 %s5319_s17, 6  ;;  %s4649_s21 = sshll.u32 %s5319_s17, 7 }
  0x1d   : > { %s5326_s25 = scalar_lea.vmem %s8151_s0, %s4648_s18  ;;  %s5331_s15 = scalar_lea.vmem %s8158_s7, %s4649_s21 }
  0x1e   : > { %s387_s28 = scalar_lea.vmem %s8159_s8, %s5319_s17 }
  0x20   : > { %v398_v0 = vld [vmem:[%s5331_s15 + $0x10] sm:$0xff]  ;;  %v396_v1 = vld [vmem:[%s5331_s15] sm:$0xff]  ;;  %v5177_v2 = vmov 0   ;;  %v5008_v3 = vld [vmem:[%s8152_s1 + $0x8] sm:$0xff]   ;;  %vm730_vm0 = vcmask 261120   ;;  %s5178_s26 = smov 16   ;;  %v413_v59 = vlaneseq }
  0x21   : > { %5007 = vset.pattern.permute.xlu1 %v5177_v2  ;;  %5006 = vset.pattern.permute.xlu0 %v5177_v2  ;;  %v399_v4 = vld [vmem:[%s5331_s15 + $0x18] sm:$0xff]  ;;  %v397_v5 = vld [vmem:[%s5331_s15 + $0x8] sm:$0xff]  ;;  %v5009_v6 = vld [vmem:[%s8152_s1] sm:$0xff]   ;;  %v886_v26 = vmul.f32 0.25, %v396_v1  ;;  %v888_v29 = vmul.f32 0.25, %v398_v0  ;;  %s8205_s29 = smov 32  }
  0x22   : > { %461 = vperm.xlu1 %5007, %v398_v0   ;;  %451 = vperm.xlu0 %5006, %v396_v1   ;;  %v5010_v7 = vld [vmem:[%s5326_s25] sm:$0xff]   ;;  %v401_v8 = vld [vmem:[%s5331_s15 + $0x28] sm:$0xff]  ;;  %v5012_v11 = vld [vmem:[%s5326_s25 + $0x10] sm:$0xff]   ;;  %v887_v27 = vmul.f32 0.25, %v397_v5  ;;  %v889_v30 = vmul.f32 0.25, %v399_v4  ;;  %v5502_v60 = vshrl.u32 %v413_v59, 7 }
  0x23   : > { %4816 = vmatprep.subr.bf16.mxu0 %v5008_v3  ;;  %4820 = vmatprep.mubr.msk.bf16.mxu0 %vm730_vm0, %v5010_v7  ;;  %v400_v9 = vld [vmem:[%s5331_s15 + $0x20] sm:$0xff]  ;;  %v5011_v10 = vld [vmem:[%s5326_s25 + $0x8] sm:$0xff]   ;;  %v403_v12 = vld [vmem:[%s5331_s15 + $0x38] sm:$0xff]  ;;  %v891_v31 = vmul.f32 0.25, %v401_v8  ;;  %v5505_v62 = vand.u32 127, %v413_v59  ;;  %s5181_s24 = smov 120  }
  0x24   : > { %4817 = vmatpush3.bf16.msra.mxu0 %v5008_v3  ;;  %v402_v13 = vld [vmem:[%s5331_s15 + $0x30] sm:$0xff]  ;;  %v405_v14 = vld [vmem:[%s5331_s15 + $0x48] sm:$0xff]  ;;  %v404_v15 = vld [vmem:[%s5331_s15 + $0x40] sm:$0xff]  ;;  %v890_v32 = vmul.f32 0.25, %v400_v9  ;;  %v893_v33 = vmul.f32 0.25, %v403_v12  ;;  %v416_v61 = vadd.s32 16, %v5502_v60 }
  0x25   : > { %4818 = vmatprep.subr.bf16.mxu0 %v5009_v6  ;;  %v5013_v16 = vld [vmem:[%s5326_s25 + $0x18] sm:$0xff]   ;;  %v5014_v17 = vld [vmem:[%s5326_s25 + $0x20] sm:$0xff]   ;;  %v406_v19 = vld [vmem:[%s5331_s15 + $0x50] sm:$0xff]  ;;  %v892_v34 = vmul.f32 0.25, %v402_v13  ;;  %v895_v35 = vmul.f32 0.25, %v405_v14  ;;  %v894_v36 = vmul.f32 0.25, %v404_v15  ;;  %vm583_vm2 = vcmp.gt.s32.totalorder %v5502_v60, %v5505_v62 }
  0x26   : > { %466 = vperm.xlu1 %5007, %v399_v4   ;;  %456 = vperm.xlu0 %5006, %v397_v5   ;;  %v407_v18 = vld [vmem:[%s5331_s15 + $0x58] sm:$0xff]  ;;  %v409_v20 = vld [vmem:[%s5331_s15 + $0x68] sm:$0xff]  ;;  %v408_v21 = vld [vmem:[%s5331_s15 + $0x60] sm:$0xff]  ;;  %v896_v38 = vmul.f32 0.25, %v406_v19  ;;  %v417_v0 = vadd.s32 24, %v5502_v60  ;;  %v415_v3 = vadd.s32 8, %v5502_v60  ;;  %vm585_vm1 = vcmp.gt.s32.totalorder %v416_v61, %v5505_v62 }
  0x27   : > { %v5015_v22 = vld [vmem:[%s5326_s25 + $0x28] sm:$0xff]   ;;  %v5016_v23 = vld [vmem:[%s5326_s25 + $0x30] sm:$0xff]   ;;  %v411_v24 = vld [vmem:[%s5331_s15 + $0x78] sm:$0xff]  ;;  %v897_v37 = vmul.f32 0.25, %v407_v18  ;;  %v899_v39 = vmul.f32 0.25, %v409_v20  ;;  %v898_v40 = vmul.f32 0.25, %v408_v21 }
  0x28   : > { %4819 = vmatpush3.bf16.msra.mxu0 %v5009_v6  ;;  %v410_v25 = vld [vmem:[%s5331_s15 + $0x70] sm:$0xff]  ;;  %v5017_v28 = vld [vmem:[%s5326_s25 + $0x38] sm:$0xff]   ;;  %v901_v41 = vmul.f32 0.25, %v411_v24  ;;  %v5381_v43 = vld [vmem:[%s8156_s5 + $0x8] sm:$0xff]  ;;  %v419_v6 = vadd.s32 40, %v5502_v60  ;;  %vm586_vm3 = vcmp.gt.s32.totalorder %v417_v0, %v5505_v62  ;;  %vm584_vm4 = vcmp.gt.s32.totalorder %v415_v3, %v5505_v62  ;;  %s5182_s19 = smov 8  }
  0x29   : > { %v900_v42 = vmul.f32 0.25, %v410_v25  ;;  %v5386_v44 = vld [vmem:[%s8156_s5] sm:$0xff]  ;;  %v5395_v45 = vld [vmem:[%s8156_s5 + $0x18] sm:$0xff]  ;;  %v5400_v46 = vld [vmem:[%s8156_s5 + $0x10] sm:$0xff]  ;;  %v425_v3 = vadd.s32 88, %v5502_v60  ;;  %s5183_s20 = smov 104  }
  0x2a   : > { %476 = vperm.xlu1 %5007, %v401_v8   ;;  %471 = vperm.xlu0 %5006, %v400_v9   ;;  %v5409_v47 = vld [vmem:[%s8156_s5 + $0x28] sm:$0xff]  ;;  %v5414_v48 = vld [vmem:[%s8156_s5 + $0x20] sm:$0xff]  ;;  %v5423_v49 = vld [vmem:[%s8156_s5 + $0x38] sm:$0xff]  ;;  %v5180_v9 = vmov 0.0   ;;  %vm588_vm5 = vcmp.gt.s32.totalorder %v419_v6, %v5505_v62  ;;  %s5184_s14 = smov 88   ;;  %s5186_s27 = smov 48  }
  0x2b   : > { %4821 = vmatmul.mubr.msk.bf16.vlgmr.msra.gmra.mxu0 %vm730_vm0, %v5011_v10  ;;  %v5428_v50 = vld [vmem:[%s8156_s5 + $0x30] sm:$0xff]  ;;  %v5437_v51 = vld [vmem:[%s8156_s5 + $0x48] sm:$0xff]  ;;  %v5442_v52 = vld [vmem:[%s8156_s5 + $0x40] sm:$0xff]  ;;  %v601_v10 = vsel %vm585_vm1, -2.5e+11, %v5180_v9  ;;  %vm594_vm11 = vcmp.gt.s32.totalorder %v425_v3, %v5505_v62 }
  0x2c   : > { %4824 = vmatprep.mubr.msk.bf16.mxu0 %vm730_vm0, %v5012_v11  ;;  %v5451_v53 = vld [vmem:[%s8156_s5 + $0x58] sm:$0xff]  ;;  %v5456_v54 = vld [vmem:[%s8156_s5 + $0x50] sm:$0xff]  ;;  %v5465_v55 = vld [vmem:[%s8156_s5 + $0x68] sm:$0xff]  ;;  %v599_v11 = vsel %vm583_vm2, -2.5e+11, %v5180_v9  ;;  %vm1014_vm2 = vcmask 64512  }
  0x2d   : > { %v5470_v56 = vld [vmem:[%s8156_s5 + $0x60] sm:$0xff]  ;;  %v5479_v57 = vld [vmem:[%s8156_s5 + $0x78] sm:$0xff]  ;;  %v5484_v58 = vld [vmem:[%s8156_s5 + $0x70] sm:$0xff] }
  0x2e   : > { %486 = vperm.xlu1 %5007, %v403_v12   ;;  %481 = vperm.xlu0 %5006, %v402_v13   ;;  %v5512_v63 = vld [vmem:[%s387_s28] ss:$0 sm:$0xff]  ;;  %s8203_s28 = smov 72  }
  0x32   : > { %496 = vperm.xlu1 %5007, %v405_v14   ;;  %491 = vperm.xlu0 %5006, %v404_v15   ;;  %v418_v14 = vadd.s32 32, %v5502_v60 }
  0x33   : > { %4825 = vmatmul.mubr.msk.bf16.gmra.mxu0 %vm730_vm0, %v5013_v16 }
  0x34   : > { %4828 = vmatprep.mubr.msk.bf16.mxu0 %vm730_vm0, %v5014_v17  ;;  %vm587_vm6 = vcmp.gt.s32.totalorder %v418_v14, %v5505_v62 }
  0x36   : > { %506 = vperm.xlu1 %5007, %v407_v18   ;;  %501 = vperm.xlu0 %5006, %v406_v19   ;;  %v421_v19 = vadd.s32 56, %v5502_v60 }
  0x38   : > { %vm590_vm7 = vcmp.gt.s32.totalorder %v421_v19, %v5505_v62 }
  0x3a   : > { %516 = vperm.xlu1 %5007, %v409_v20   ;;  %511 = vperm.xlu0 %5006, %v408_v21  }
  0x3b   : > { %4829 = vmatmul.mubr.msk.bf16.gmra.mxu0 %vm730_vm0, %v5015_v22 }
  0x3c   : > { %4832 = vmatprep.mubr.msk.bf16.mxu0 %vm730_vm0, %v5016_v23 }
  0x3e   : > { %526 = vperm.xlu1 %5007, %v411_v24   ;;  %521 = vperm.xlu0 %5006, %v410_v25   ;;  %v602_v24 = vsel %vm586_vm3, -2.5e+11, %v5180_v9  ;;  %v600_v25 = vsel %vm584_vm4, -2.5e+11, %v5180_v9  ;;  %vm1239_vm3 = vcmask 125952  }
  0x42   : > { %1086 = vperm.xlu1 %5007, %v887_v27   ;;  %1081 = vperm.xlu0 %5006, %v886_v26  }
  0x43   : > { %4833 = vmatmul.mubr.msk.bf16.gmra.mxu0 %vm730_vm0, %v5017_v28  ;;  %v420_v28 = vadd.s32 48, %v5502_v60 }
  0x45   : > { %vm589_vm8 = vcmp.gt.s32.totalorder %v420_v28, %v5505_v62 }
  0x46   : > { %1096 = vperm.xlu1 %5007, %v889_v30   ;;  %1091 = vperm.xlu0 %5006, %v888_v29  }
  0x4a   : > { %1106 = vperm.xlu1 %5007, %v891_v31   ;;  %1101 = vperm.xlu0 %5006, %v890_v32  }
  0x4e   : > { %1116 = vperm.xlu1 %5007, %v893_v33   ;;  %1111 = vperm.xlu0 %5006, %v892_v34   ;;  %v604_v33 = vsel %vm588_vm5, -2.5e+11, %v5180_v9 }
  0x52   : > { %1126 = vperm.xlu1 %5007, %v895_v35   ;;  %1121 = vperm.xlu0 %5006, %v894_v36  }
  0x56   : > { %1136 = vperm.xlu1 %5007, %v897_v37   ;;  %1131 = vperm.xlu0 %5006, %v896_v38   ;;  %v603_v38 = vsel %vm587_vm6, -2.5e+11, %v5180_v9 }
  0x5a   : > { %1146 = vperm.xlu1 %5007, %v899_v39   ;;  %1141 = vperm.xlu0 %5006, %v898_v40  }
  0x5e   : > { %1156 = vperm.xlu1 %5007, %v901_v41   ;;  %1151 = vperm.xlu0 %5006, %v900_v42   ;;  %v423_v41 = vadd.s32 72, %v5502_v60  ;;  %v422_v42 = vadd.s32 64, %v5502_v60 }
  0x60   : > { %vm592_vm9 = vcmp.gt.s32.totalorder %v423_v41, %v5505_v62  ;;  %vm591_vm10 = vcmp.gt.s32.totalorder %v422_v42, %v5505_v62 }
  0x62   : > { %1338 = vrot.lane.b32.xlu1 %v5381_v43, %s5178_s26  ;;  %1336 = vrot.lane.b32.xlu0 %v5386_v44, %s5178_s26 }
  0x66   : > { %1342 = vrot.lane.b32.xlu1 %v5395_v45, %s5178_s26  ;;  %1340 = vrot.lane.b32.xlu0 %v5400_v46, %s5178_s26 }
  0x6a   : > { %1346 = vrot.lane.b32.xlu1 %v5409_v47, %s5178_s26  ;;  %1344 = vrot.lane.b32.xlu0 %v5414_v48, %s5178_s26 }
  0x6e   : > { %1350 = vrot.lane.b32.xlu1 %v5423_v49, %s5178_s26  ;;  %1348 = vrot.lane.b32.xlu0 %v5428_v50, %s5178_s26 }
  0x72   : > { %1354 = vrot.lane.b32.xlu1 %v5437_v51, %s5178_s26  ;;  %1352 = vrot.lane.b32.xlu0 %v5442_v52, %s5178_s26 }
  0x76   : > { %1358 = vrot.lane.b32.xlu1 %v5451_v53, %s5178_s26  ;;  %1356 = vrot.lane.b32.xlu0 %v5456_v54, %s5178_s26 }
  0x7a   : > { %1362 = vrot.lane.b32.xlu1 %v5465_v55, %s5178_s26  ;;  %1360 = vrot.lane.b32.xlu0 %v5470_v56, %s5178_s26 }
  0x7e   : > { %1366 = vrot.lane.b32.xlu1 %v5479_v57, %s5178_s26  ;;  %1364 = vrot.lane.b32.xlu0 %v5484_v58, %s5178_s26 }
  0x82   : > { %1691 = vrot.lane.b32.xlu1 %v5381_v43, %s8205_s29  ;;  %1689 = vrot.lane.b32.xlu0 %v5386_v44, %s8205_s29 }
  0x86   : > { %1695 = vrot.lane.b32.xlu1 %v5395_v45, %s8205_s29  ;;  %1693 = vrot.lane.b32.xlu0 %v5400_v46, %s8205_s29 }
  0x8a   : > { %1699 = vrot.lane.b32.xlu1 %v5409_v47, %s8205_s29  ;;  %1697 = vrot.lane.b32.xlu0 %v5414_v48, %s8205_s29 }
  0x9d   : > { %v462_v1 = vpop.permute.xlu1 %461  ;;  %v452_v2 = vpop.permute.xlu0 %451 }
  0x9e   : > { %v537_v4 = vmul.f32 %v5512_v63, %v462_v1  ;;  %v535_v5 = vmul.f32 %v5512_v63, %v452_v2  ;;  %v606_v2 = vsel %vm590_vm7, -2.5e+11, %v5180_v9 }
  0xa0   : > { %v553_v7 = vsub.f32 1.0, %v537_v4  ;;  %v551_v8 = vsub.f32 1.0, %v535_v5 }
  0xa1   : > { %v467_v12 = vpop.permute.xlu1 %466  ;;  %v457_v13 = vpop.permute.xlu0 %456 }
  0xa2   : > { %v569_v15 = vmul.f32 -2.5e+11, %v553_v7  ;;  %v567_v16 = vmul.f32 -2.5e+11, %v551_v8  ;;  %v538_v17 = vmul.f32 %v5512_v63, %v467_v12  ;;  %v536_v18 = vmul.f32 %v5512_v63, %v457_v13 }
  0xa3   : > { %v605_v8 = vsel %vm589_vm8, -2.5e+11, %v5180_v9  ;;  %v424_v12 = vadd.s32 80, %v5502_v60 }
  0xa4   : > { %v617_v20 = vadd.f32 %v601_v10, %v569_v15  ;;  %v615_v21 = vadd.f32 %v599_v11, %v567_v16  ;;  %v554_v22 = vsub.f32 1.0, %v538_v17  ;;  %v552_v23 = vsub.f32 1.0, %v536_v18 }
  0xa5   : > { %v477_v26 = vpop.permute.xlu1 %476  ;;  %v472_v27 = vpop.permute.xlu0 %471  ;;  %v427_v17 = vadd.s32 104, %v5502_v60  ;;  %vm593_vm12 = vcmp.gt.s32.totalorder %v424_v12, %v5505_v62 }
  0xa6   : > { %633 = vst [vmem:[#allocation4 + $0x58] sm:$0xff] %v617_v20  ;;  %631 = vst [vmem:[#allocation4 + $0x30] sm:$0xff] %v615_v21  ;;  %v570_v29 = vmul.f32 -2.5e+11, %v554_v22  ;;  %v568_v30 = vmul.f32 -2.5e+11, %v552_v23  ;;  %v540_v31 = vmul.f32 %v5512_v63, %v477_v26  ;;  %v539_v32 = vmul.f32 %v5512_v63, %v472_v27 }
  0xa7   : > { %v608_v22 = vsel %vm592_vm9, -2.5e+11, %v5180_v9  ;;  %v607_v23 = vsel %vm591_vm10, -2.5e+11, %v5180_v9  ;;  %v426_v26 = vadd.s32 96, %v5502_v60  ;;  %vm596_vm13 = vcmp.gt.s32.totalorder %v427_v17, %v5505_v62 }
  0xa8   : > { %v618_v34 = vadd.f32 %v602_v24, %v570_v29  ;;  %v616_v35 = vadd.f32 %v600_v25, %v568_v30  ;;  %v556_v36 = vsub.f32 1.0, %v540_v31  ;;  %v555_v37 = vsub.f32 1.0, %v539_v32 }
  0xa9   : > { %v487_v39 = vpop.permute.xlu1 %486  ;;  %v482_v40 = vpop.permute.xlu0 %481  ;;  %v610_v31 = vsel %vm594_vm11, -2.5e+11, %v5180_v9  ;;  %vm595_vm14 = vcmp.gt.s32.totalorder %v426_v26, %v5505_v62 }
  0xaa   : > { %634 = vst [vmem:[#allocation4 + $0x18] sm:$0xff] %v618_v34  ;;  %632 = vst [vmem:[#allocation4] sm:$0xff] %v616_v35  ;;  %v572_v59 = vmul.f32 -2.5e+11, %v556_v36  ;;  %v571_v61 = vmul.f32 -2.5e+11, %v555_v37  ;;  %v542_v0 = vmul.f32 %v5512_v63, %v487_v39  ;;  %v541_v1 = vmul.f32 %v5512_v63, %v482_v40 }
  0xab   : > { %v609_v36 = vsel %vm593_vm12, -2.5e+11, %v5180_v9  ;;  %v429_v39 = vadd.s32 120, %v5502_v60  ;;  %v428_v40 = vadd.s32 112, %v5502_v60 }
  0xac   : > { %v620_v4 = vadd.f32 %v604_v33, %v572_v59  ;;  %v619_v5 = vadd.f32 %v603_v38, %v571_v61  ;;  %v558_v6 = vsub.f32 1.0, %v542_v0  ;;  %v557_v7 = vsub.f32 1.0, %v541_v1 }
  0xad   : > { %v497_v10 = vpop.permute.xlu1 %496  ;;  %v492_v11 = vpop.permute.xlu0 %491  ;;  %vm598_vm15 = vcmp.gt.s32.totalorder %v429_v39, %v5505_v62  ;;  %vm597_vm1 = vcmp.gt.s32.totalorder %v428_v40, %v5505_v62 }
  0xae   : > { %636 = vst [vmem:[#allocation4 + $0x68] sm:$0xff] %v620_v4  ;;  %635 = vst [vmem:[#allocation4 + $0x50] sm:$0xff] %v619_v5  ;;  %v574_v13 = vmul.f32 -2.5e+11, %v558_v6  ;;  %v573_v14 = vmul.f32 -2.5e+11, %v557_v7  ;;  %v544_v15 = vmul.f32 %v5512_v63, %v497_v10  ;;  %v543_v16 = vmul.f32 %v5512_v63, %v492_v11 }
  0xaf   : > { %v612_v4 = vsel %vm596_vm13, -2.5e+11, %v5180_v9  ;;  %v611_v5 = vsel %vm595_vm14, -2.5e+11, %v5180_v9  ;;  %v613_v17 = vsel %vm597_vm1, -2.5e+11, %v5180_v9 }
  0xb0   : > { %v622_v18 = vadd.f32 %v606_v2, %v574_v13  ;;  %v621_v19 = vadd.f32 %v605_v8, %v573_v14  ;;  %v560_v20 = vsub.f32 1.0, %v544_v15  ;;  %v559_v21 = vsub.f32 1.0, %v543_v16 }
  0xb1   : > { %v507_v24 = vpop.permute.xlu1 %506  ;;  %v502_v25 = vpop.permute.xlu0 %501  ;;  %v614_v16 = vsel %vm598_vm15, -2.5e+11, %v5180_v9 }
  0xb2   : > { %638 = vst [vmem:[#allocation4 + $0x48] sm:$0xff] %v622_v18  ;;  %637 = vst [vmem:[#allocation4 + $0x8] sm:$0xff] %v621_v19  ;;  %v576_v27 = vmul.f32 -2.5e+11, %v560_v20  ;;  %v575_v28 = vmul.f32 -2.5e+11, %v559_v21  ;;  %v546_v29 = vmul.f32 %v5512_v63, %v507_v24  ;;  %v545_v30 = vmul.f32 %v5512_v63, %v502_v25 }
  0xb4   : > { %v624_v32 = vadd.f32 %v608_v22, %v576_v27  ;;  %v623_v33 = vadd.f32 %v607_v23, %v575_v28  ;;  %v562_v34 = vsub.f32 1.0, %v546_v29  ;;  %v561_v35 = vsub.f32 1.0, %v545_v30 }
  0xb5   : > { %v517_v37 = vpop.permute.xlu1 %516  ;;  %v512_v38 = vpop.permute.xlu0 %511 }
  0xb6   : > { %640 = vst [vmem:[#allocation4 + $0x20] sm:$0xff] %v624_v32  ;;  %639 = vst [vmem:[#allocation4 + $0x40] sm:$0xff] %v623_v33  ;;  %v578_v41 = vmul.f32 -2.5e+11, %v562_v34  ;;  %v577_v42 = vmul.f32 -2.5e+11, %v561_v35  ;;  %v548_v59 = vmul.f32 %v5512_v63, %v517_v37  ;;  %v547_v61 = vmul.f32 %v5512_v63, %v512_v38 }
  0xb8   : > { %v626_v0 = vadd.f32 %v610_v31, %v578_v41  ;;  %v625_v1 = vadd.f32 %v609_v36, %v577_v42  ;;  %v564_v2 = vsub.f32 1.0, %v548_v59  ;;  %v563_v3 = vsub.f32 1.0, %v547_v61 }
  0xb9   : > { %v527_v60 = vpop.permute.xlu1 %526  ;;  %v522_v6 = vpop.permute.xlu0 %521 }
  0xba   : > { %642 = vst [vmem:[#allocation4 + $0x38] sm:$0xff] %v626_v0  ;;  %641 = vst [vmem:[#allocation4 + $0x10] sm:$0xff] %v625_v1  ;;  %v580_v7 = vmul.f32 -2.5e+11, %v564_v2  ;;  %v579_v8 = vmul.f32 -2.5e+11, %v563_v3  ;;  %v550_v10 = vmul.f32 %v5512_v63, %v527_v60  ;;  %v549_v11 = vmul.f32 %v5512_v63, %v522_v6 }
  0xbb   : > { %v5596_v63 = vld [vmem:[%s8154_s3] ss:$0 sm:$0xff] }
  0xbc   : > { %v628_v12 = vadd.f32 %v612_v4, %v580_v7  ;;  %v627_v13 = vadd.f32 %v611_v5, %v579_v8  ;;  %v566_v14 = vsub.f32 1.0, %v550_v10  ;;  %v565_v15 = vsub.f32 1.0, %v549_v11 }
  0xbd   : > { %v5606_v25 = vpop.permute.xlu0 %1081  ;;  %v5612_v26 = vpop.permute.xlu1 %1086 }
  0xbe   : > { %644 = vst [vmem:[#allocation4 + $0x70] sm:$0xff] %v628_v12  ;;  %643 = vst [vmem:[#allocation4 + $0x60] sm:$0xff] %v627_v13  ;;  %v582_v62 = vmul.f32 -2.5e+11, %v566_v14  ;;  %v581_v18 = vmul.f32 -2.5e+11, %v565_v15 }
  0xbf   : > { %8327 = vst [vmem:[#allocation14_spill] sm:$0xff] %v5606_v25  ;;  %8328 = vst [vmem:[#allocation15_spill] sm:$0xff] %v5612_v26 }
  0xc0   : > { %v630_v19 = vadd.f32 %v614_v16, %v582_v62  ;;  %v629_v20 = vadd.f32 %v613_v17, %v581_v18 }
  0xc1   : > { %v5618_v27 = vpop.permute.xlu0 %1091  ;;  %v5624_v28 = vpop.permute.xlu1 %1096 }
  0xc2   : > { %646 = vst [vmem:[#allocation4 + $0x28] sm:$0xff] %v630_v19  ;;  %645 = vst [vmem:[#allocation4 + $0x78] sm:$0xff] %v629_v20 }
  0xc3   : > { %8329 = vst [vmem:[#allocation16_spill] sm:$0xff] %v5618_v27  ;;  %8330 = vst [vmem:[#allocation17_spill] sm:$0xff] %v5624_v28 }
  0xc5   : > { %v5629_v31 = vpop.permute.xlu0 %1101  ;;  %v5638_v33 = vpop.permute.xlu1 %1106 }
  0xc6   : > { %8332 = vst [vmem:[#allocation19_spill] sm:$0xff] %v5629_v31  ;;  %8334 = vst [vmem:[#allocation21_spill] sm:$0xff] %v5638_v33 }
  0xc9   : > { %v5644_v34 = vpop.permute.xlu0 %1111  ;;  %v5650_v36 = vpop.permute.xlu1 %1116 }
  0xca   : > { %8335 = vst [vmem:[#allocation22_spill] sm:$0xff] %v5644_v34  ;;  %8336 = vst [vmem:[#allocation23_spill] sm:$0xff] %v5650_v36 }
  0xcd   : > { %v5652_v37 = vpop.permute.xlu0 %1121  ;;  %v5661_v40 = vpop.permute.xlu1 %1126 }
  0xd1   : > { %v5667_v42 = vpop.permute.xlu0 %1131  ;;  %v5676_v61 = vpop.permute.xlu1 %1136 }
  0xd5   : > { %v5678_v0 = vpop.permute.xlu0 %1141  ;;  %v5684_v1 = vpop.permute.xlu1 %1146 }
  0xd6   : > { %8339 = vst [vmem:[#allocation26_spill] sm:$0xff] %v5684_v1 }
  0xd9   : > { %v5690_v2 = vpop.permute.xlu0 %1151  ;;  %v5699_v5 = vpop.permute.xlu1 %1156 }
  0xdd   : > { %v5704_v6 = vpop.permute.xlu0 %1336  ;;  %v5710_v7 = vpop.permute.xlu1 %1338 }
  0xde   : > { %8342 = vst [vmem:[#allocation29_spill] sm:$0xff] %v5704_v6  ;;  %8343 = vst [vmem:[#allocation30_spill] sm:$0xff] %v5710_v7 }
  0xe1   : > { %v5716_v10 = vpop.permute.xlu0 %1340  ;;  %v5725_v13 = vpop.permute.xlu1 %1342 }
  0xe2   : > { %8344 = vst [vmem:[#allocation31_spill] sm:$0xff] %v5716_v10  ;;  %8346 = vst [vmem:[#allocation33_spill] sm:$0xff] %v5725_v13 }
  0xe5   : > { %v5727_v14 = vpop.permute.xlu0 %1344  ;;  %v5736_v17 = vpop.permute.xlu1 %1346 }
  0xe6   : > { %8347 = vst [vmem:[#allocation34_spill] sm:$0xff] %v5727_v14  ;;  %8348 = vst [vmem:[#allocation35_spill] sm:$0xff] %v5736_v17 }
  0xe9   : > { %v5742_v62 = vpop.permute.xlu0 %1348  ;;  %v5748_v18 = vpop.permute.xlu1 %1350 }
  0xea   : > { %8349 = vst [vmem:[#allocation36_spill] sm:$0xff] %v5742_v62  ;;  %8350 = vst [vmem:[#allocation37_spill] sm:$0xff] %v5748_v18 }
  0xeb   : > { %v4822_v21 = vpop.f32.mrf.mxu0 }
  0xec   : > { %v5599_v22 = vadd.f32 %v4822_v21, %v5596_v63 }
  0xed   : > { %v789_v23 = vpop.f32.mrf.mxu0  ;;  %v5750_v19 = vpop.permute.xlu0 %1352 }
  0xee   : > { %922 = vrot.lane.b32.xlu0 %v5599_v22, %s5181_s24  ;;  %v5627_v29 = vadd.f32 %v5596_v63, %v789_v23  ;;  %8351 = vst [vmem:[#allocation38_spill] sm:$0xff] %v5750_v19  ;;  %v5759_v23 = vpop.permute.xlu1 %1354  ;;  %v1033_v62 = vmul.f32 %v5400_v46, %v5599_v22 }
  0xef   : > { %v4823_v9 = vpop.f32.mrf.mxu0  ;;  %8352 = vst [vmem:[#allocation39_spill] sm:$0xff] %v5759_v23 }
  0xf0   : > { %v5604_v24 = vadd.f32 %v4823_v9, %v5596_v63  ;;  %8331 = vst [vmem:[#allocation18_spill] sm:$0xff] %v5627_v29 }
  0xf1   : > { %v792_v30 = vpop.f32.mrf.mxu0  ;;  %v5765_v9 = vpop.permute.xlu0 %1356 }
  0xf2   : > { %924 = vrot.lane.b32.xlu1 %v5604_v24, %s5181_s24  ;;  %970 = vrot.lane.b32.xlu0 %v5599_v22, %s5182_s19  ;;  %v5636_v32 = vadd.f32 %v5596_v63, %v792_v30  ;;  %8353 = vst [vmem:[#allocation40_spill] sm:$0xff] %v5765_v9 }
  0xf3   : > { %v4826_v35 = vpop.f32.mrf.mxu0 }
  0xf4   : > { %8333 = vst [vmem:[#allocation20_spill] sm:$0xff] %v5636_v32  ;;  %v5655_v38 = vadd.f32 %v4826_v35, %v5596_v63  ;;  %v5774_v35 = vpop.permute.xlu1 %1358 }
  0xf5   : > { %v805_v39 = vpop.f32.mrf.mxu0  ;;  %8354 = vst [vmem:[#allocation41_spill] sm:$0xff] %v5774_v35 }
  0xf6   : > { %972 = vrot.lane.b32.xlu1 %v5604_v24, %s5182_s19  ;;  %1260 = vrot.lane.b32.xlu0 %v5599_v22, %s5183_s20  ;;  %8337 = vst [vmem:[#allocation24_spill] sm:$0xff] %v5655_v38  ;;  %v5693_v3 = vadd.f32 %v5596_v63, %v805_v39  ;;  %v5776_v39 = vpop.permute.xlu0 %1360 }
  0xf7   : > { %v4827_v41 = vpop.f32.mrf.mxu0  ;;  %8355 = vst [vmem:[#allocation42_spill] sm:$0xff] %v5776_v39 }
  0xf8   : > { %v5670_v59 = vadd.f32 %v4827_v41, %v5596_v63  ;;  %8340 = vst [vmem:[#allocation27_spill] sm:$0xff] %v5693_v3 }
  0xf9   : > { %v808_v4 = vpop.f32.mrf.mxu0 }
  0xfa   : > { %1262 = vrot.lane.b32.xlu1 %v5604_v24, %s5183_s20  ;;  %1629 = vrot.lane.b32.xlu0 %v5599_v22, %s5184_s14  ;;  %8338 = vst [vmem:[#allocation25_spill] sm:$0xff] %v5670_v59  ;;  %v5702_v60 = vadd.f32 %v5596_v63, %v808_v4  ;;  %v5782_v4 = vpop.permute.xlu1 %1362 }
  0xfb   : > { %v4830_v8 = vpop.f32.mrf.mxu0  ;;  %8356 = vst [vmem:[#allocation43_spill] sm:$0xff] %v5782_v4 }
  0xfc   : > { %8341 = vst [vmem:[#allocation28_spill] sm:$0xff] %v5702_v60  ;;  %v5719_v11 = vadd.f32 %v4830_v8, %v5596_v63 }
  0xfd   : > { %v821_v12 = vpop.f32.mrf.mxu0 }
  0xfe   : > { %1631 = vrot.lane.b32.xlu1 %v5604_v24, %s5184_s14  ;;  %918 = vrot.lane.b32.xlu0 %v5627_v29, %s5181_s24  ;;  %8345 = vst [vmem:[#allocation32_spill] sm:$0xff] %v5719_v11  ;;  %v5757_v20 = vadd.f32 %v5596_v63, %v821_v12  ;;  %v5791_v12 = vpop.permute.xlu0 %1364 }
  0xff   : > { %v4831_v15 = vpop.f32.mrf.mxu0  ;;  %8358 = vst [vmem:[#allocation45_spill] sm:$0xff] %v5791_v12 }
 0x100   : > { %v5734_v16 = vadd.f32 %v4831_v15, %v5596_v63 }
 0x101   : > { %v824_v21 = vpop.f32.mrf.mxu0 }
 0x102   : > { %920 = vrot.lane.b32.xlu1 %v5636_v32, %s5181_s24  ;;  %966 = vrot.lane.b32.xlu0 %v5627_v29, %s5182_s19  ;;  %v5768_v30 = vadd.f32 %v5596_v63, %v824_v21  ;;  %v5797_v21 = vpop.permute.xlu1 %1366  ;;  %v5799_v4 = vpop.permute.xlu0 %1689 }
 0x103   : > { %v4834_v41 = vpop.f32.mrf.mxu0  ;;  %8359 = vst [vmem:[#allocation46_spill] sm:$0xff] %v5797_v21  ;;  %8360 = vst [vmem:[#allocation47_spill] sm:$0xff] %v5799_v4 }
 0x104   : > { %v5785_v8 = vadd.f32 %v4834_v41, %v5596_v63 }
 0x105   : > { %v837_v15 = vpop.f32.mrf.mxu0 }
 0x106   : > { %968 = vrot.lane.b32.xlu1 %v5636_v32, %s5182_s19  ;;  %1256 = vrot.lane.b32.xlu0 %v5627_v29, %s5183_s20  ;;  %8357 = vst [vmem:[#allocation44_spill] sm:$0xff] %v5785_v8  ;;  %v5808_v12 = vpop.permute.xlu1 %1691  ;;  %v5814_v21 = vpop.permute.xlu0 %1693  ;;  %v5825_v19 = vadd.f32 %v5596_v63, %v837_v15  ;;  %v5842_v15 = vld [vmem:[%s8157_s6 + $0x10] sm:$0xff] }
 0x107   : > { %v4835_v41 = vpop.f32.mrf.mxu0  ;;  %8361 = vst [vmem:[#allocation48_spill] sm:$0xff] %v5808_v12  ;;  %8362 = vst [vmem:[#allocation49_spill] sm:$0xff] %v5814_v21 }
 0x108   : > { %v5806_v39 = vadd.f32 %v4835_v41, %v5596_v63 }
 0x109   : > { %v840_v17 = vpop.f32.mrf.mxu0 }
 0x10a   : > { %1258 = vrot.lane.b32.xlu1 %v5636_v32, %s5183_s20  ;;  %1625 = vrot.lane.b32.xlu0 %v5627_v29, %s5184_s14  ;;  %v5820_v23 = vpop.permute.xlu1 %1695  ;;  %v5822_v41 = vpop.permute.xlu0 %1697 }
 0x10b   : > { %8363 = vst [vmem:[#allocation50_spill] sm:$0xff] %v5820_v23  ;;  %8364 = vst [vmem:[#allocation51_spill] sm:$0xff] %v5822_v41  ;;  %v5845_v41 = vadd.f32 %v5596_v63, %v840_v17  ;;  %v5861_v63 = vld [vmem:[%s8157_s6 + $0x18] sm:$0xff] }
 0x10d   : > { %8366 = vst [vmem:[#allocation53_spill] sm:$0xff] %v5845_v41 }
 0x10e   : > { %1627 = vrot.lane.b32.xlu1 %v5636_v32, %s5184_s14  ;;  %930 = vrot.lane.b32.xlu0 %v5655_v38, %s5181_s24  ;;  %v5831_v35 = vpop.permute.xlu1 %1699 }
 0x10f   : > { %8365 = vst [vmem:[#allocation52_spill] sm:$0xff] %v5831_v35 }
 0x112   : > { %932 = vrot.lane.b32.xlu1 %v5670_v59, %s5181_s24  ;;  %978 = vrot.lane.b32.xlu0 %v5655_v38, %s5182_s19 }
 0x116   : > { %980 = vrot.lane.b32.xlu1 %v5670_v59, %s5182_s19  ;;  %1268 = vrot.lane.b32.xlu0 %v5655_v38, %s5183_s20 }
 0x11a   : > { %1270 = vrot.lane.b32.xlu1 %v5670_v59, %s5183_s20  ;;  %1637 = vrot.lane.b32.xlu0 %v5655_v38, %s5184_s14 }
 0x11e   : > { %1639 = vrot.lane.b32.xlu1 %v5670_v59, %s5184_s14  ;;  %926 = vrot.lane.b32.xlu0 %v5693_v3, %s5181_s24 }
 0x122   : > { %928 = vrot.lane.b32.xlu1 %v5702_v60, %s5181_s24  ;;  %974 = vrot.lane.b32.xlu0 %v5693_v3, %s5182_s19 }
 0x126   : > { %976 = vrot.lane.b32.xlu1 %v5702_v60, %s5182_s19  ;;  %1264 = vrot.lane.b32.xlu0 %v5693_v3, %s5183_s20 }
 0x12a   : > { %1266 = vrot.lane.b32.xlu1 %v5702_v60, %s5183_s20  ;;  %1633 = vrot.lane.b32.xlu0 %v5693_v3, %s5184_s14 }
 0x12e   : > { %1635 = vrot.lane.b32.xlu1 %v5702_v60, %s5184_s14  ;;  %938 = vrot.lane.b32.xlu0 %v5719_v11, %s5181_s24 }
 0x132   : > { %940 = vrot.lane.b32.xlu1 %v5734_v16, %s5181_s24  ;;  %986 = vrot.lane.b32.xlu0 %v5719_v11, %s5182_s19 }
 0x136   : > { %988 = vrot.lane.b32.xlu1 %v5734_v16, %s5182_s19  ;;  %1276 = vrot.lane.b32.xlu0 %v5719_v11, %s5183_s20 }
 0x13a   : > { %1278 = vrot.lane.b32.xlu1 %v5734_v16, %s5183_s20  ;;  %1645 = vrot.lane.b32.xlu0 %v5719_v11, %s5184_s14 }
 0x13e   : > { %1647 = vrot.lane.b32.xlu1 %v5734_v16, %s5184_s14  ;;  %934 = vrot.lane.b32.xlu0 %v5757_v20, %s5181_s24 }
 0x142   : > { %936 = vrot.lane.b32.xlu1 %v5768_v30, %s5181_s24  ;;  %982 = vrot.lane.b32.xlu0 %v5757_v20, %s5182_s19 }
 0x146   : > { %984 = vrot.lane.b32.xlu1 %v5768_v30, %s5182_s19  ;;  %1272 = vrot.lane.b32.xlu0 %v5757_v20, %s5183_s20 }
 0x14a   : > { %1274 = vrot.lane.b32.xlu1 %v5768_v30, %s5183_s20  ;;  %1641 = vrot.lane.b32.xlu0 %v5757_v20, %s5184_s14 }
 0x14e   : > { %1643 = vrot.lane.b32.xlu1 %v5768_v30, %s5184_s14  ;;  %946 = vrot.lane.b32.xlu0 %v5785_v8, %s5181_s24 }
 0x152   : > { %1703 = vrot.lane.b32.xlu1 %v5423_v49, %s8205_s29  ;;  %994 = vrot.lane.b32.xlu0 %v5785_v8, %s5182_s19 }
 0x156   : > { %948 = vrot.lane.b32.xlu1 %v5806_v39, %s5181_s24  ;;  %1284 = vrot.lane.b32.xlu0 %v5785_v8, %s5183_s20 }
 0x15a   : > { %996 = vrot.lane.b32.xlu1 %v5806_v39, %s5182_s19  ;;  %1653 = vrot.lane.b32.xlu0 %v5785_v8, %s5184_s14 }
 0x15e   : > { %1286 = vrot.lane.b32.xlu1 %v5806_v39, %s5183_s20  ;;  %942 = vrot.lane.b32.xlu0 %v5825_v19, %s5181_s24 }
 0x160   : > { %v5833_v9 = vpop.permute.xlu0 %922 }
 0x162   : > { %1655 = vrot.lane.b32.xlu1 %v5806_v39, %s5184_s14  ;;  %990 = vrot.lane.b32.xlu0 %v5825_v19, %s5182_s19 }
 0x164   : > { %v5847_v14 = vpop.permute.xlu1 %924  ;;  %v971_v35 = vpop.permute.xlu0 %970 }
 0x165   : > { %v1017_v18 = vsel %vm1014_vm2, %v5833_v9, %v971_v35  ;;  %v1034_v35 = vmul.f32 %v5395_v45, %v5604_v24 }
 0x166   : > { %v1049_v12 = vmul.f32 %v1017_v18, %v5842_v15  ;;  %944 = vrot.lane.b32.xlu1 %v5845_v41, %s5181_s24  ;;  %1280 = vrot.lane.b32.xlu0 %v5825_v19, %s5183_s20 }
 0x168   : > { %v1065_v17 = vadd.f32 %v1049_v12, %v1033_v62  ;;  %v973_v7 = vpop.permute.xlu1 %972  ;;  %v5863_v4 = vpop.permute.xlu0 %1260 }
 0x169   : > { %v1018_v46 = vsel %vm1014_vm2, %v5847_v14, %v973_v7 }
 0x16a   : > { %v1161_v18 = vmul.f32 %v5618_v27, %v1065_v17  ;;  %v1050_v6 = vmul.f32 %v1018_v46, %v5861_v63  ;;  %992 = vrot.lane.b32.xlu1 %v5845_v41, %s5182_s19  ;;  %1649 = vrot.lane.b32.xlu0 %v5825_v19, %s5184_s14 }
 0x16c   : > { %v4652_v62 = vpack.c.bf16 %v1161_v18, %v1161_v18  ;;  %v1066_v12 = vadd.f32 %v1050_v6, %v1034_v35  ;;  %v5875_v23 = vpop.permute.xlu1 %1262  ;;  %v5877_v13 = vpop.permute.xlu0 %1629  ;;  %v5897_v6 = vld [vmem:[%s8157_s6] sm:$0xff] }
 0x16e   : > { %1242 = vst.msk [vmem:[#allocation2 + $0x8] sm:$0xf] %vm1239_vm3, %v4652_v62  ;;  %v1162_v7 = vmul.f32 %v5624_v28, %v1066_v12  ;;  %1282 = vrot.lane.b32.xlu1 %v5845_v41, %s5183_s20  ;;  %1701 = vrot.lane.b32.xlu0 %v5428_v50, %s8205_s29  ;;  %v1031_v12 = vmul.f32 %v5386_v44, %v5627_v29 }
 0x170   : > { %v4653_v45 = vpack.c.bf16 %v1162_v7, %v1162_v7  ;;  %v5885_v17 = vpop.permute.xlu1 %1631  ;;  %v5887_v46 = vpop.permute.xlu0 %918 }
 0x172   : > { %1243 = vst.msk [vmem:[#allocation2 + $0xc] sm:$0xf] %vm1239_vm3, %v4653_v45  ;;  %1651 = vrot.lane.b32.xlu1 %v5845_v41, %s5184_s14  ;;  %1705 = vrot.lane.b32.xlu0 %v5442_v52, %s8205_s29  ;;  %v5913_v52 = vld [vmem:[%s8157_s6 + $0x8] sm:$0xff] }
 0x174   : > { %v5899_v18 = vpop.permute.xlu1 %920  ;;  %v967_v35 = vpop.permute.xlu0 %966 }
 0x175   : > { %v1015_v62 = vsel %vm1014_vm2, %v5887_v46, %v967_v35 }
 0x176   : > { %v1047_v7 = vmul.f32 %v1015_v62, %v5897_v6  ;;  %1707 = vrot.lane.b32.xlu1 %v5437_v51, %s8205_s29  ;;  %1709 = vrot.lane.b32.xlu0 %v5456_v54, %s8205_s29  ;;  %v1032_v51 = vmul.f32 %v5381_v43, %v5636_v32 }
 0x178   : > { %v1063_v45 = vadd.f32 %v1047_v7, %v1031_v12  ;;  %v969_v28 = vpop.permute.xlu1 %968  ;;  %v5915_v27 = vpop.permute.xlu0 %1256 }
 0x179   : > { %v1016_v44 = vsel %vm1014_vm2, %v5899_v18, %v969_v28 }
 0x17a   : > { %v1159_v35 = vmul.f32 %v5606_v25, %v1063_v45  ;;  %v1048_v62 = vmul.f32 %v1016_v44, %v5913_v52  ;;  %1711 = vrot.lane.b32.xlu1 %v5451_v53, %s8205_s29  ;;  %1713 = vrot.lane.b32.xlu0 %v5470_v56, %s8205_s29 }
 0x17c   : > { %v4650_v12 = vpack.c.bf16 %v1159_v35, %v1159_v35  ;;  %v1064_v7 = vadd.f32 %v1048_v62, %v1032_v51  ;;  %v5927_v21 = vpop.permute.xlu1 %1258  ;;  %v5929_v10 = vpop.permute.xlu0 %1625  ;;  %v1037_v51 = vmul.f32 %v5428_v50, %v5655_v38  ;;  %v5965_v62 = vld [vmem:[%s8157_s6 + $0x38] sm:$0xff] }
 0x17e   : > { %1240 = vst.msk [vmem:[#allocation2] sm:$0xf] %vm1239_vm3, %v4650_v12  ;;  %v1160_v28 = vmul.f32 %v5612_v26, %v1064_v7  ;;  %1715 = vrot.lane.b32.xlu1 %v5465_v55, %s8205_s29  ;;  %1717 = vrot.lane.b32.xlu0 %v5484_v58, %s8205_s29  ;;  %v5949_v55 = vld [vmem:[%s8157_s6 + $0x30] sm:$0xff] }
 0x180   : > { %v4651_v43 = vpack.c.bf16 %v1160_v28, %v1160_v28  ;;  %v5937_v45 = vpop.permute.xlu1 %1627  ;;  %v5939_v56 = vpop.permute.xlu0 %930 }
 0x182   : > { %1241 = vst.msk [vmem:[#allocation2 + $0x4] sm:$0xf] %vm1239_vm3, %v4651_v43  ;;  %1719 = vrot.lane.b32.xlu1 %v5479_v57, %s8205_s29  ;;  %1978 = vrot.lane.b32.xlu0 %v5627_v29, %s8203_s28  ;;  %v5018_v43 = vld [vmem:[%s8153_s2 + $0x8] sm:$0xff]  }
 0x183   : > { %4836 = vmatprep.subr.bf16.mxu1 %v5018_v43 }
 0x184   : > { %v5951_v58 = vpop.permute.xlu1 %932  ;;  %v979_v44 = vpop.permute.xlu0 %978  ;;  %4837 = vmatpush3.bf16.msra.mxu1 %v5018_v43  ;;  %v5020_v43 = vld [vmem:[%s5326_s25] sm:$0xff]  }
 0x185   : > { %v1021_v35 = vsel %vm1014_vm2, %v5939_v56, %v979_v44  ;;  %4840 = vmatprep.mubr.msk.bf16.mxu1 %vm730_vm0, %v5020_v43  ;;  %v6027_v43 = vld [vmem:[%s8157_s6 + $0x28] sm:$0xff] }
 0x186   : > { %v1053_v57 = vmul.f32 %v1021_v35, %v5949_v55  ;;  %1980 = vrot.lane.b32.xlu1 %v5636_v32, %s8203_s28  ;;  %1982 = vrot.lane.b32.xlu0 %v5599_v22, %s8203_s28  ;;  %v1038_v35 = vmul.f32 %v5423_v49, %v5670_v59  ;;  %v5019_v49 = vld [vmem:[%s8153_s2] sm:$0xff]  }
 0x187   : > { %4838 = vmatprep.subr.bf16.mxu1 %v5019_v49 }
 0x188   : > { %v1069_v12 = vadd.f32 %v1053_v57, %v1037_v51  ;;  %v981_v7 = vpop.permute.xlu1 %980  ;;  %v5967_v28 = vpop.permute.xlu0 %1268  ;;  %4839 = vmatpush3.bf16.msra.mxu1 %v5019_v49 }
 0x189   : > { %v1022_v50 = vsel %vm1014_vm2, %v5951_v58, %v981_v7 }
 0x18a   : > { %v1165_v44 = vmul.f32 %v5644_v34, %v1069_v12  ;;  %v1054_v26 = vmul.f32 %v1022_v50, %v5965_v62  ;;  %1984 = vrot.lane.b32.xlu1 %v5604_v24, %s8203_s28  ;;  %1986 = vrot.lane.b32.xlu0 %v5693_v3, %s8203_s28 }
 0x18c   : > { %v4656_v51 = vpack.c.bf16 %v1165_v44, %v1165_v44  ;;  %v1070_v57 = vadd.f32 %v1054_v26, %v1038_v35  ;;  %v5982_v7 = vpop.permute.xlu1 %1270  ;;  %v5984_v32 = vpop.permute.xlu0 %1637  ;;  %v5021_v35 = vld [vmem:[%s5326_s25 + $0x8] sm:$0xff]  }
 0x18d   : > { %4841 = vmatmul.mubr.msk.bf16.vlgmr.msra.gmra.mxu1 %vm730_vm0, %v5021_v35 }
 0x18e   : > { %1246 = vst.msk [vmem:[#allocation2 + $0x18] sm:$0xf] %vm1239_vm3, %v4656_v51  ;;  %v1166_v12 = vmul.f32 %v5650_v36, %v1070_v57  ;;  %1988 = vrot.lane.b32.xlu1 %v5702_v60, %s8203_s28  ;;  %1990 = vrot.lane.b32.xlu0 %v5655_v38, %s8203_s28  ;;  %v6009_v51 = vld [vmem:[%s8157_s6 + $0x20] sm:$0xff]  ;;  %v1036_v38 = vmul.f32 %v5409_v47, %v5702_v60 }
 0x18f   : > { %v1306_v47 = vsel %vm1014_vm2, %v5863_v4, %v5833_v9  ;;  %v1307_v9 = vsel %vm1014_vm2, %v5875_v23, %v5847_v14 }
 0x190   : > { %v4657_v26 = vpack.c.bf16 %v1166_v12, %v1166_v12  ;;  %v5995_v50 = vpop.permute.xlu1 %1639  ;;  %v5997_v44 = vpop.permute.xlu0 %926  ;;  %v1403_v14 = vmul.f32 %v1307_v9, %v5861_v63  ;;  %v1041_v9 = vmul.f32 %v5456_v54, %v5719_v11  ;;  %v5026_v54 = vld [vmem:[%s5326_s25 + $0x30] sm:$0xff]  }
 0x192   : > { %1247 = vst.msk [vmem:[#allocation2 + $0x1c] sm:$0xf] %vm1239_vm3, %v4657_v26  ;;  %1992 = vrot.lane.b32.xlu1 %v5670_v59, %s8203_s28  ;;  %1994 = vrot.lane.b32.xlu0 %v5757_v20, %s8203_s28  ;;  %v1035_v26 = vmul.f32 %v5414_v48, %v5693_v3 }
 0x194   : > { %v6012_v57 = vpop.permute.xlu1 %928  ;;  %v975_v49 = vpop.permute.xlu0 %974 }
 0x195   : > { %v1019_v12 = vsel %vm1014_vm2, %v5997_v44, %v975_v49  ;;  %v5022_v49 = vld [vmem:[%s5326_s25 + $0x10] sm:$0xff]  }
 0x196   : > { %v1051_v36 = vmul.f32 %v1019_v12, %v6009_v51  ;;  %1996 = vrot.lane.b32.xlu1 %v5768_v30, %s8203_s28  ;;  %1998 = vrot.lane.b32.xlu0 %v5719_v11, %s8203_s28  ;;  %v5023_v12 = vld [vmem:[%s5326_s25 + $0x18] sm:$0xff]  }
 0x197   : > { %4844 = vmatprep.mubr.msk.bf16.mxu1 %vm730_vm0, %v5022_v49  ;;  %v5027_v11 = vld [vmem:[%s5326_s25 + $0x38] sm:$0xff]  }
 0x198   : > { %v1067_v35 = vadd.f32 %v1051_v36, %v1035_v26  ;;  %v977_v59 = vpop.permute.xlu1 %976  ;;  %v6029_v34 = vpop.permute.xlu0 %1264  ;;  %4845 = vmatmul.mubr.msk.bf16.gmra.mxu1 %vm730_vm0, %v5023_v12  ;;  %v5024_v12 = vld [vmem:[%s5326_s25 + $0x20] sm:$0xff]  }
 0x199   : > { %v1020_v48 = vsel %vm1014_vm2, %v6012_v57, %v977_v59  ;;  %4848 = vmatprep.mubr.msk.bf16.mxu1 %vm730_vm0, %v5024_v12 }
 0x19a   : > { %v1163_v3 = vmul.f32 %v5629_v31, %v1067_v35  ;;  %v1052_v25 = vmul.f32 %v1020_v48, %v6027_v43  ;;  %2000 = vrot.lane.b32.xlu1 %v5734_v16, %s8203_s28  ;;  %2002 = vrot.lane.b32.xlu0 %v5825_v19, %s8203_s28 }
 0x19c   : > { %v4654_v36 = vpack.c.bf16 %v1163_v3, %v1163_v3  ;;  %v1068_v26 = vadd.f32 %v1052_v25, %v1036_v38  ;;  %v6044_v59 = vpop.permute.xlu1 %1266  ;;  %v6046_v35 = vpop.permute.xlu0 %1633  ;;  %v1402_v25 = vmul.f32 %v1306_v47, %v5842_v15  ;;  %v6078_v47 = vld [vmem:[%s8157_s6 + $0x50] sm:$0xff] }
 0x19e   : > { %1244 = vst.msk [vmem:[#allocation2 + $0x10] sm:$0xf] %vm1239_vm3, %v4654_v36  ;;  %v1164_v48 = vmul.f32 %v5638_v33, %v1068_v26  ;;  %2004 = vrot.lane.b32.xlu1 %v5845_v41, %s8203_s28  ;;  %2006 = vrot.lane.b32.xlu0 %v5785_v8, %s8203_s28  ;;  %v1675_v36 = vsel %vm1014_vm2, %v5877_v13, %v5863_v4  ;;  %v5025_v26 = vld [vmem:[%s5326_s25 + $0x28] sm:$0xff]   ;;  %s5189_s25 = smov 80  }
 0x19f   : > { %v1304_v33 = vsel %vm1014_vm2, %v5915_v27, %v5887_v46 }
 0x1a0   : > { %v4655_v38 = vpack.c.bf16 %v1164_v48, %v1164_v48  ;;  %v6059_v3 = vpop.permute.xlu1 %1635  ;;  %v6061_v49 = vpop.permute.xlu0 %938  ;;  %v1755_v48 = vmul.f32 %v1675_v36, %v5842_v15  ;;  %4849 = vmatmul.mubr.msk.bf16.gmra.mxu1 %vm730_vm0, %v5025_v26  ;;  %v1400_v26 = vmul.f32 %v1304_v33, %v5897_v6  ;;  %v1042_v33 = vmul.f32 %v5451_v53, %v5734_v16 }
 0x1a1   : > { %4852 = vmatprep.mubr.msk.bf16.mxu1 %vm730_vm0, %v5026_v54  ;;  %v1674_v53 = vsel %vm1014_vm2, %v5937_v45, %v5927_v21 }
 0x1a2   : > { %1245 = vst.msk [vmem:[#allocation2 + $0x14] sm:$0xf] %vm1239_vm3, %v4655_v38  ;;  %2008 = vrot.lane.b32.xlu1 %v5806_v39, %s8203_s28  ;;  %1436 = vrot.lane.b32.xlu0 %v1402_v25, %s5178_s26  ;;  %v1676_v25 = vsel %vm1014_vm2, %v5885_v17, %v5875_v23  ;;  %v6102_v23 = vld [vmem:[%s8157_s6 + $0x58] sm:$0xff]  ;;  %v1754_v54 = vmul.f32 %v1674_v53, %v5913_v52  ;;  %s5188_s28 = smov 96  }
 0x1a3   : > { %v1756_v46 = vmul.f32 %v1676_v25, %v5861_v63 }
 0x1a4   : > { %v6083_v4 = vpop.permute.xlu1 %940  ;;  %v987_v38 = vpop.permute.xlu0 %986 }
 0x1a5   : > { %v1025_v12 = vsel %vm1014_vm2, %v6061_v49, %v987_v38 }
 0x1a6   : > { %v1057_v36 = vmul.f32 %v1025_v12, %v6078_v47  ;;  %1438 = vrot.lane.b32.xlu1 %v1403_v14, %s5178_s26  ;;  %1789 = vrot.lane.b32.xlu0 %v1755_v48, %s8205_s29  ;;  %v1305_v14 = vsel %vm1014_vm2, %v5927_v21, %v5899_v18  ;;  %v1673_v48 = vsel %vm1014_vm2, %v5929_v10, %v5915_v27 }
 0x1a7   : > { %v1401_v18 = vmul.f32 %v1305_v14, %v5913_v52  ;;  %v1753_v27 = vmul.f32 %v1673_v48, %v5897_v6 }
 0x1a8   : > { %v1073_v60 = vadd.f32 %v1057_v36, %v1041_v9  ;;  %v989_v38 = vpop.permute.xlu1 %988  ;;  %v6106_v31 = vpop.permute.xlu0 %1276  ;;  %4853 = vmatmul.mubr.msk.bf16.gmra.mxu1 %vm730_vm0, %v5027_v11 }
 0x1a9   : > { %v1026_v12 = vsel %vm1014_vm2, %v6083_v4, %v989_v38 }
 0x1aa   : > { %v1169_v25 = vmul.f32 %v5667_v42, %v1073_v60  ;;  %v1058_v9 = vmul.f32 %v1026_v12, %v6102_v23  ;;  %1791 = vrot.lane.b32.xlu1 %v1756_v46, %s8205_s29  ;;  %1432 = vrot.lane.b32.xlu0 %v1400_v26, %s5178_s26  ;;  %v1310_v46 = vsel %vm1014_vm2, %v5967_v28, %v5939_v56 }
 0x1ab   : > { %v1406_v11 = vmul.f32 %v1310_v46, %v5949_v55  ;;  %v1311_v56 = vsel %vm1014_vm2, %v5982_v7, %v5951_v58  ;;  %v1679_v12 = vsel %vm1014_vm2, %v5984_v32, %v5967_v28  ;;  %v1680_v28 = vsel %vm1014_vm2, %v5995_v50, %v5982_v7  ;;  %v6187_v7 = vld [vmem:[%s8157_s6 + $0x48] sm:$0xff] }
 0x1ac   : > { %v4660_v36 = vpack.c.bf16 %v1169_v25, %v1169_v25  ;;  %v1074_v38 = vadd.f32 %v1058_v9, %v1042_v33  ;;  %v6127_v29 = vpop.permute.xlu1 %1278  ;;  %v6129_v60 = vpop.permute.xlu0 %1645  ;;  %v6160_v25 = vld [vmem:[%s8157_s6 + $0x40] sm:$0xff]  ;;  %v1407_v33 = vmul.f32 %v1311_v56, %v5965_v62  ;;  %v1759_v9 = vmul.f32 %v1679_v12, %v5949_v55 }
 0x1ad   : > { %v1309_v56 = vsel %vm1014_vm2, %v6044_v59, %v6012_v57  ;;  %v1677_v12 = vsel %vm1014_vm2, %v6046_v35, %v6029_v34 }
 0x1ae   : > { %1250 = vst.msk [vmem:[#allocation2 + $0x28] sm:$0xf] %vm1239_vm3, %v4660_v36  ;;  %v1170_v26 = vmul.f32 %v5676_v61, %v1074_v38  ;;  %1434 = vrot.lane.b32.xlu1 %v1401_v18, %s5178_s26  ;;  %1785 = vrot.lane.b32.xlu0 %v1753_v27, %s8205_s29  ;;  %v1308_v27 = vsel %vm1014_vm2, %v6029_v34, %v5997_v44  ;;  %v6177_v38 = vld [vmem:[%s8156_s5 + $0x40] sm:$0xff] }
 0x1af   : > { %v1039_v53 = vmul.f32 %v6177_v38, %v5757_v20  ;;  %v1760_v44 = vmul.f32 %v1680_v28, %v5965_v62  ;;  %v1405_v34 = vmul.f32 %v1309_v56, %v6027_v43  ;;  %v1757_v57 = vmul.f32 %v1677_v12, %v6009_v51 }
 0x1b0   : > { %v4661_v14 = vpack.c.bf16 %v1170_v26, %v1170_v26  ;;  %v6144_v48 = vpop.permute.xlu1 %1647  ;;  %v6146_v21 = vpop.permute.xlu0 %934  ;;  %v1404_v26 = vmul.f32 %v1308_v27, %v6009_v51 }
 0x1b2   : > { %1251 = vst.msk [vmem:[#allocation2 + $0x2c] sm:$0xf] %vm1239_vm3, %v4661_v14  ;;  %1787 = vrot.lane.b32.xlu1 %v1754_v54, %s8205_s29  ;;  %1444 = vrot.lane.b32.xlu0 %v1406_v11, %s5178_s26 }
 0x1b4   : > { %v6164_v58 = vpop.permute.xlu1 %936  ;;  %v983_v18 = vpop.permute.xlu0 %982 }
 0x1b5   : > { %v1023_v36 = vsel %vm1014_vm2, %v6146_v21, %v983_v18  ;;  %v6203_v18 = vld [vmem:[%s8156_s5 + $0x48] sm:$0xff] }
 0x1b6   : > { %v1055_v46 = vmul.f32 %v1023_v36, %v6160_v25  ;;  %1446 = vrot.lane.b32.xlu1 %v1407_v33, %s5178_s26  ;;  %1797 = vrot.lane.b32.xlu0 %v1759_v9, %s8205_s29  ;;  %v1040_v28 = vmul.f32 %v6203_v18, %v5768_v30 }
 0x1b8   : > { %v1071_v54 = vadd.f32 %v1055_v46, %v1039_v53  ;;  %v985_v11 = vpop.permute.xlu1 %984  ;;  %v1273_v14 = vpop.permute.xlu0 %1272 }
 0x1b9   : > { %v1024_v33 = vsel %vm1014_vm2, %v6164_v58, %v985_v11  ;;  %v1678_v11 = vsel %vm1014_vm2, %v6059_v3, %v6044_v59 }
 0x1ba   : > { %v1167_v9 = vmul.f32 %v5652_v37, %v1071_v54  ;;  %v1056_v27 = vmul.f32 %v1024_v33, %v6187_v7  ;;  %1799 = vrot.lane.b32.xlu1 %v1760_v44, %s8205_s29  ;;  %1440 = vrot.lane.b32.xlu0 %v1404_v26, %s5178_s26  ;;  %v1314_v33 = vsel %vm1014_vm2, %v6106_v31, %v6061_v49 }
 0x1bb   : > { %v1758_v26 = vmul.f32 %v1678_v11, %v6027_v43  ;;  %v1410_v56 = vmul.f32 %v1314_v33, %v6078_v47  ;;  %v1315_v49 = vsel %vm1014_vm2, %v6127_v29, %v6083_v4  ;;  %v6255_v33 = vld [vmem:[%s8156_s5 + $0x70] sm:$0xff] }
 0x1bc   : > { %v4658_v36 = vpack.c.bf16 %v1167_v9, %v1167_v9  ;;  %v1072_v53 = vadd.f32 %v1056_v27, %v1040_v28  ;;  %v1275_v46 = vpop.permute.xlu1 %1274  ;;  %v6212_v54 = vpop.permute.xlu0 %1641  ;;  %v1683_v28 = vsel %vm1014_vm2, %v6129_v60, %v6106_v31  ;;  %v6240_v27 = vld [vmem:[%s8157_s6 + $0x70] sm:$0xff]  ;;  %v1684_v31 = vsel %vm1014_vm2, %v6144_v48, %v6127_v29 }
 0x1bd   : > { %8367 = vst [vmem:[#allocation54_spill] sm:$0xff] %v6240_v27  ;;  %v1764_v29 = vmul.f32 %v1684_v31, %v6102_v23 }
 0x1be   : > { %1248 = vst.msk [vmem:[#allocation2 + $0x20] sm:$0xf] %vm1239_vm3, %v4658_v36  ;;  %v1168_v44 = vmul.f32 %v5661_v40, %v1072_v53  ;;  %1442 = vrot.lane.b32.xlu1 %v1405_v34, %s5178_s26  ;;  %1793 = vrot.lane.b32.xlu0 %v1757_v57, %s8205_s29  ;;  %v1411_v34 = vmul.f32 %v1315_v49, %v6102_v23 }
 0x1bf   : > { %v1763_v57 = vmul.f32 %v1683_v28, %v6078_v47  ;;  %v1312_v53 = vsel %vm1014_vm2, %v1273_v14, %v6146_v21  ;;  %v1313_v28 = vsel %vm1014_vm2, %v1275_v46, %v6164_v58 }
 0x1c0   : > { %v4659_v12 = vpack.c.bf16 %v1168_v44, %v1168_v44  ;;  %v6226_v9 = vpop.permute.xlu1 %1643  ;;  %v947_v59 = vpop.permute.xlu0 %946  ;;  %v1045_v44 = vmul.f32 %v6255_v33, %v5785_v8  ;;  %v1408_v21 = vmul.f32 %v1312_v53, %v6160_v25 }
 0x1c2   : > { %1249 = vst.msk [vmem:[#allocation2 + $0x24] sm:$0xf] %vm1239_vm3, %v4659_v12  ;;  %1795 = vrot.lane.b32.xlu1 %v1758_v26, %s8205_s29  ;;  %1452 = vrot.lane.b32.xlu0 %v1410_v56, %s5178_s26 }
 0x1c4   : > { %v6244_v4 = vpop.permute.xlu1 %1703  ;;  %v995_v36 = vpop.permute.xlu0 %994 }
 0x1c5   : > { %v1029_v11 = vsel %vm1014_vm2, %v947_v59, %v995_v36  ;;  %v1681_v36 = vsel %vm1014_vm2, %v6212_v54, %v1273_v14  ;;  %v1682_v14 = vsel %vm1014_vm2, %v6226_v9, %v1275_v46 }
 0x1c6   : > { %v1061_v26 = vmul.f32 %v1029_v11, %v6240_v27  ;;  %1454 = vrot.lane.b32.xlu1 %v1411_v34, %s5178_s26  ;;  %1805 = vrot.lane.b32.xlu0 %v1763_v57, %s8205_s29  ;;  %v6274_v34 = vld [vmem:[%s8157_s6 + $0x78] sm:$0xff]  ;;  %v1409_v57 = vmul.f32 %v1313_v28, %v6187_v7  ;;  %v1761_v31 = vmul.f32 %v1681_v36, %v6160_v25 }
 0x1c7   : > { %8368 = vst [vmem:[#allocation55_spill] sm:$0xff] %v6274_v34  ;;  %v1762_v46 = vmul.f32 %v1682_v14, %v6187_v7 }
 0x1c8   : > { %v1077_v56 = vadd.f32 %v1061_v26, %v1045_v44  ;;  %v949_v12 = vpop.permute.xlu1 %948  ;;  %v1285_v49 = vpop.permute.xlu0 %1284 }
 0x1c9   : > { %v1318_v44 = vsel %vm1014_vm2, %v1285_v49, %v947_v59 }
 0x1ca   : > { %v1173_v8 = vmul.f32 %v5690_v2, %v1077_v56  ;;  %1807 = vrot.lane.b32.xlu1 %v1764_v29, %s8205_s29  ;;  %1448 = vrot.lane.b32.xlu0 %v1408_v21, %s5178_s26  ;;  %v6288_v29 = vld [vmem:[%s8156_s5 + $0x78] sm:$0xff]  ;;  %v1414_v59 = vmul.f32 %v1318_v44, %v6240_v27 }
 0x1cc   : > { %v4664_v53 = vpack.c.bf16 %v1173_v8, %v1173_v8  ;;  %v997_v58 = vpop.permute.xlu1 %996  ;;  %v6278_v11 = vpop.permute.xlu0 %1653  ;;  %v1046_v8 = vmul.f32 %v6288_v29, %v5806_v39 }
 0x1cd   : > { %8369 = vst [vmem:[#allocation56_spill] sm:$0xff] %v6278_v11  ;;  %v1030_v26 = vsel %vm1014_vm2, %v949_v12, %v997_v58 }
 0x1ce   : > { %1254 = vst.msk [vmem:[#allocation2 + $0x38] sm:$0xf] %vm1239_vm3, %v4664_v53  ;;  %v1062_v21 = vmul.f32 %v1030_v26, %v6274_v34  ;;  %1450 = vrot.lane.b32.xlu1 %v1409_v57, %s5178_s26  ;;  %1801 = vrot.lane.b32.xlu0 %v1761_v31, %s8205_s29  ;;  %v1687_v53 = vsel %vm1014_vm2, %v6278_v11, %v1285_v49  ;;  %v6305_v57 = vld [vmem:[%s8157_s6 + $0x60] sm:$0xff] }
 0x1cf   : > { %8370 = vst [vmem:[#allocation57_spill] sm:$0xff] %v6305_v57  ;;  %v1767_v14 = vmul.f32 %v1687_v53, %v6240_v27 }
 0x1d0   : > { %v1078_v56 = vadd.f32 %v1062_v21, %v1046_v8  ;;  %v1287_v28 = vpop.permute.xlu1 %1286  ;;  %v943_v36 = vpop.permute.xlu0 %942  ;;  %v6316_v21 = vld [vmem:[%s8156_s5 + $0x60] sm:$0xff] }
 0x1d1   : > { %v1319_v8 = vsel %vm1014_vm2, %v1287_v28, %v949_v12 }
 0x1d2   : > { %v1174_v58 = vmul.f32 %v5699_v5, %v1078_v56  ;;  %1803 = vrot.lane.b32.xlu1 %v1762_v46, %s8205_s29  ;;  %1460 = vrot.lane.b32.xlu0 %v1414_v59, %s5178_s26  ;;  %v1043_v46 = vmul.f32 %v6316_v21, %v5825_v19  ;;  %v5033_v56 = vld [vmem:[%s8156_s5 + $0x8] sm:$0xff]  ;;  %v1415_v12 = vmul.f32 %v1319_v8, %v6274_v34 }
 0x1d4   : > { %v4665_v31 = vpack.c.bf16 %v1174_v58, %v1174_v58  ;;  %v6308_v44 = vpop.permute.xlu1 %1655  ;;  %v991_v26 = vpop.permute.xlu0 %990 }
 0x1d5   : > { %8371 = vst [vmem:[#allocation58_spill] sm:$0xff] %v6308_v44  ;;  %v1027_v49 = vsel %vm1014_vm2, %v943_v36, %v991_v26  ;;  %v1688_v26 = vsel %vm1014_vm2, %v6308_v44, %v1287_v28 }
 0x1d6   : > { %1255 = vst.msk [vmem:[#allocation2 + $0x3c] sm:$0xf] %vm1239_vm3, %v4665_v31  ;;  %v1059_v59 = vmul.f32 %v1027_v49, %v6305_v57  ;;  %2044 = vrot.lane.b32.xlu1 %v5033_v56, %s5186_s27  ;;  %1813 = vrot.lane.b32.xlu0 %v1767_v14, %s8205_s29  ;;  %v6336_v14 = vld [vmem:[%s8157_s6 + $0x68] sm:$0xff]  ;;  %v1768_v8 = vmul.f32 %v1688_v26, %v6274_v34 }
 0x1d7   : > { %v5034_v56 = vld [vmem:[%s8156_s5 + $0x68] sm:$0xff] }
 0x1d8   : > { %v1075_v53 = vadd.f32 %v1059_v59, %v1043_v46  ;;  %v945_v58 = vpop.permute.xlu1 %944  ;;  %v1281_v31 = vpop.permute.xlu0 %1280 }
 0x1d9   : > { %v1316_v27 = vsel %vm1014_vm2, %v1281_v31, %v943_v36 }
 0x1da   : > { %v1171_v49 = vmul.f32 %v5678_v0, %v1075_v53  ;;  %v1412_v11 = vmul.f32 %v1316_v27, %v6305_v57  ;;  %1462 = vrot.lane.b32.xlu1 %v1415_v12, %s5178_s26  ;;  %v1044_v12 = vmul.f32 %v5034_v56, %v5845_v41 }
 0x1dc   : > { %v4662_v46 = vpack.c.bf16 %v1171_v49, %v1171_v49  ;;  %v993_v59 = vpop.permute.xlu1 %992  ;;  %1456 = vrot.lane.b32.xlu0 %v1412_v11, %s5178_s26  ;;  %v6340_v28 = vpop.permute.xlu0 %1649 }
 0x1dd   : > { %8372 = vst [vmem:[#allocation59_spill] sm:$0xff] %v6340_v28  ;;  %v1028_v36 = vsel %vm1014_vm2, %v945_v58, %v993_v59  ;;  %v1685_v27 = vsel %vm1014_vm2, %v6340_v28, %v1281_v31 }
 0x1de   : > { %1252 = vst.msk [vmem:[#allocation2 + $0x30] sm:$0xf] %vm1239_vm3, %v4662_v46  ;;  %v1060_v53 = vmul.f32 %v1028_v36, %v6336_v14  ;;  %v1765_v26 = vmul.f32 %v1685_v27, %v6305_v57  ;;  %1815 = vrot.lane.b32.xlu1 %v1768_v8, %s8205_s29  ;;  %v5035_v8 = vld [vmem:[%s8156_s5] sm:$0xff] }
 0x1e0   : > { %v1076_v11 = vadd.f32 %v1060_v53, %v1044_v12  ;;  %v1283_v49 = vpop.permute.xlu1 %1282  ;;  %1809 = vrot.lane.b32.xlu0 %v1765_v26, %s8205_s29  ;;  %v6354_v59 = vpop.permute.xlu0 %1701  ;;  %v5036_v53 = vld [vmem:[%s8156_s5 + $0x10] sm:$0xff] }
 0x1e1   : > { %v1317_v31 = vsel %vm1014_vm2, %v1283_v49, %v945_v58 }
 0x1e2   : > { %v1172_v46 = vmul.f32 %v5684_v1, %v1076_v11  ;;  %v1413_v34 = vmul.f32 %v1317_v31, %v6336_v14  ;;  %v5037_v11 = vld [vmem:[%s8156_s5 + $0x18] sm:$0xff] }
 0x1e4   : > { %v4663_v44 = vpack.c.bf16 %v1172_v46, %v1172_v46  ;;  %1458 = vrot.lane.b32.xlu1 %v1413_v34, %s5178_s26  ;;  %v6360_v36 = vpop.permute.xlu1 %1651  ;;  %2042 = vrot.lane.b32.xlu0 %v5035_v8, %s5186_s27  ;;  %v6366_v27 = vpop.permute.xlu0 %1705  ;;  %v5039_v46 = vld [vmem:[%s8156_s5 + $0x28] sm:$0xff] }
 0x1e5   : > { %v1686_v58 = vsel %vm1014_vm2, %v6360_v36, %v1283_v49  ;;  %v5038_v49 = vld [vmem:[%s8156_s5 + $0x20] sm:$0xff] }
 0x1e6   : > { %1253 = vst.msk [vmem:[#allocation2 + $0x34] sm:$0xf] %vm1239_vm3, %v4663_v44  ;;  %v1766_v12 = vmul.f32 %v1686_v58, %v6336_v14  ;;  %v5040_v58 = vld [vmem:[%s8156_s5 + $0x30] sm:$0xff] }
 0x1e8   : > { %1811 = vrot.lane.b32.xlu1 %v1766_v12, %s8205_s29  ;;  %v6373_v34 = vpop.permute.xlu1 %1707  ;;  %2046 = vrot.lane.b32.xlu0 %v5036_v53, %s5186_s27  ;;  %v6379_v26 = vpop.permute.xlu0 %1709  ;;  %v5041_v53 = vld [vmem:[%s8156_s5 + $0x38] sm:$0xff]  ;;  %s5187_s29 = smov 112  }
 0x1ec   : > { %2048 = vrot.lane.b32.xlu1 %v5037_v11, %s5186_s27  ;;  %v6385_v44 = vpop.permute.xlu1 %1711  ;;  %2050 = vrot.lane.b32.xlu0 %v5038_v49, %s5186_s27  ;;  %v6391_v31 = vpop.permute.xlu0 %1713 }
 0x1f0   : > { %2052 = vrot.lane.b32.xlu1 %v5039_v46, %s5186_s27  ;;  %v6397_v8 = vpop.permute.xlu1 %1715  ;;  %2054 = vrot.lane.b32.xlu0 %v5040_v58, %s5186_s27  ;;  %v6403_v12 = vpop.permute.xlu0 %1717  ;;  %v5042_v58 = vld [vmem:[%s8156_s5 + $0x50] sm:$0xff] }
 0x1f1   : > { %8373 = vst [vmem:[#allocation60_spill] sm:$0xff] %v6397_v8 }
 0x1f4   : > { %2056 = vrot.lane.b32.xlu1 %v5041_v53, %s5186_s27  ;;  %v6409_v11 = vpop.permute.xlu1 %1719  ;;  %2058 = vrot.lane.b32.xlu0 %v6177_v38, %s5186_s27  ;;  %v1979_v49 = vpop.permute.xlu0 %1978  ;;  %v5043_v53 = vld [vmem:[%s8156_s5 + $0x58] sm:$0xff] }
 0x1f8   : > { %2060 = vrot.lane.b32.xlu1 %v6203_v18, %s5186_s27  ;;  %v1981_v46 = vpop.permute.xlu1 %1980  ;;  %2062 = vrot.lane.b32.xlu0 %v5042_v58, %s5186_s27  ;;  %v1983_v57 = vpop.permute.xlu0 %1982  ;;  %v2026_v18 = vsel %vm1014_vm2, %v1979_v49, %v5929_v10 }
 0x1f9   : > { %v2106_v28 = vmul.f32 %v2026_v18, %v5897_v6  ;;  %v2028_v41 = vsel %vm1014_vm2, %v1983_v57, %v5877_v13 }
 0x1fc   : > { %2064 = vrot.lane.b32.xlu1 %v5043_v53, %s5186_s27  ;;  %v1985_v1 = vpop.permute.xlu1 %1984  ;;  %2066 = vrot.lane.b32.xlu0 %v6316_v21, %s5186_s27  ;;  %v1987_v38 = vpop.permute.xlu0 %1986  ;;  %v2027_v53 = vsel %vm1014_vm2, %v1981_v46, %v5937_v45 }
 0x1fd   : > { %v2029_v6 = vsel %vm1014_vm2, %v1985_v1, %v5885_v17  ;;  %v2030_v45 = vsel %vm1014_vm2, %v1987_v38, %v6046_v35 }
 0x1fe   : > { %v2109_v57 = vmul.f32 %v2029_v6, %v5861_v63 }
 0x200   : > { %2068 = vrot.lane.b32.xlu1 %v5034_v56, %s5186_s27  ;;  %v1989_v8 = vpop.permute.xlu1 %1988  ;;  %2070 = vrot.lane.b32.xlu0 %v6255_v33, %s5186_s27  ;;  %v1991_v58 = vpop.permute.xlu0 %1990  ;;  %v2107_v56 = vmul.f32 %v2027_v53, %v5913_v52  ;;  %v2108_v33 = vmul.f32 %v2028_v41, %v5842_v15  ;;  %v8376_v53 = vld [vmem:[#allocation16_spill] sm:$0xff] }
 0x201   : > { %v2031_v52 = vsel %vm1014_vm2, %v1989_v8, %v6059_v3  ;;  %v2032_v41 = vsel %vm1014_vm2, %v1991_v58, %v5984_v32 }
 0x202   : > { %v2111_v17 = vmul.f32 %v2031_v52, %v6027_v43  ;;  %v2112_v35 = vmul.f32 %v2032_v41, %v5949_v55  ;;  %v8380_v41 = vld [vmem:[#allocation18_spill] sm:$0xff] }
 0x204   : > { %2072 = vrot.lane.b32.xlu1 %v6288_v29, %s5186_s27  ;;  %v1993_v21 = vpop.permute.xlu1 %1992  ;;  %2138 = vrot.lane.b32.xlu0 %v2106_v28, %s5186_s27  ;;  %v1995_v10 = vpop.permute.xlu0 %1994  ;;  %v2110_v28 = vmul.f32 %v2030_v45, %v6009_v51 }
 0x205   : > { %v2033_v63 = vsel %vm1014_vm2, %v1993_v21, %v5995_v50  ;;  %v2034_v51 = vsel %vm1014_vm2, %v1995_v10, %v6212_v54  ;;  %v8374_v54 = vld [vmem:[#allocation31_spill] sm:$0xff]  ;;  %v8377_v10 = vld [vmem:[#allocation33_spill] sm:$0xff] }
 0x206   : > { %v2113_v8 = vmul.f32 %v2033_v63, %v5965_v62  ;;  %v2114_v43 = vmul.f32 %v2034_v51, %v6160_v25  ;;  %v1386_v49 = vmul.f32 %v8374_v54, %v5599_v22 }
 0x208   : > { %2140 = vrot.lane.b32.xlu1 %v2107_v56, %s5186_s27  ;;  %v1997_v13 = vpop.permute.xlu1 %1996  ;;  %2142 = vrot.lane.b32.xlu0 %v2108_v33, %s5186_s27  ;;  %v1999_v29 = vpop.permute.xlu0 %1998  ;;  %v1387_v56 = vmul.f32 %v8377_v10, %v5604_v24 }
 0x209   : > { %v2035_v55 = vsel %vm1014_vm2, %v1997_v13, %v6226_v9  ;;  %v2036_v50 = vsel %vm1014_vm2, %v1999_v29, %v6129_v60  ;;  %v8375_v9 = vld [vmem:[#allocation49_spill] sm:$0xff]  ;;  %v8378_v29 = vld [vmem:[#allocation50_spill] sm:$0xff] }
 0x20a   : > { %v2115_v62 = vmul.f32 %v2035_v55, %v6187_v7  ;;  %v2116_v25 = vmul.f32 %v2036_v50, %v6078_v47  ;;  %v1739_v58 = vmul.f32 %v8375_v9, %v5599_v22  ;;  %v8382_v55 = vld [vmem:[#allocation47_spill] sm:$0xff] }
 0x20b   : > { %v1737_v50 = vmul.f32 %v8382_v55, %v8380_v41  ;;  %v8391_v55 = vld [vmem:[#allocation25_spill] sm:$0xff] }
 0x20c   : > { %2144 = vrot.lane.b32.xlu1 %v2109_v57, %s5186_s27  ;;  %v2001_v1 = vpop.permute.xlu1 %2000  ;;  %2146 = vrot.lane.b32.xlu0 %v2110_v28, %s5186_s27  ;;  %v6454_v15 = vpop.permute.xlu0 %2002  ;;  %v1740_v57 = vmul.f32 %v8378_v29, %v5604_v24  ;;  %v8389_v29 = vld [vmem:[#allocation36_spill] sm:$0xff] }
 0x20d   : > { %v2037_v60 = vsel %vm1014_vm2, %v2001_v1, %v6144_v48  ;;  %v8379_v48 = vld [vmem:[#allocation17_spill] sm:$0xff] }
 0x20e   : > { %v2117_v13 = vmul.f32 %v2037_v60, %v6102_v23  ;;  %v8381_v1 = vld [vmem:[#allocation29_spill] sm:$0xff] }
 0x210   : > { %2148 = vrot.lane.b32.xlu1 %v2111_v17, %s5186_s27  ;;  %v6463_v32 = vpop.permute.xlu1 %2004  ;;  %2150 = vrot.lane.b32.xlu0 %v2112_v35, %s5186_s27  ;;  %v6466_v3 = vpop.permute.xlu0 %2006  ;;  %v1384_v17 = vmul.f32 %v8381_v1, %v8380_v41 }
 0x214   : > { %2152 = vrot.lane.b32.xlu1 %v2113_v8, %s5186_s27  ;;  %v6477_v46 = vpop.permute.xlu1 %2008  ;;  %2154 = vrot.lane.b32.xlu0 %v2114_v43, %s5186_s27  ;;  %v1437_v38 = vpop.permute.xlu0 %1436 }
 0x215   : > { %v1482_v18 = vadd.f32 %v1437_v38, %v1386_v49  ;;  %v8383_v49 = vld [vmem:[#allocation14_spill] sm:$0xff] }
 0x217   : > { %v1498_v21 = vmul.f32 %v1482_v18, %v8376_v53  ;;  %v8384_v18 = vld [vmem:[#allocation20_spill] sm:$0xff] }
 0x218   : > { %2156 = vrot.lane.b32.xlu1 %v2115_v62, %s5186_s27  ;;  %v1439_v33 = vpop.permute.xlu1 %1438  ;;  %2158 = vrot.lane.b32.xlu0 %v2116_v25, %s5186_s27  ;;  %v1790_v6 = vpop.permute.xlu0 %1789  ;;  %v8385_v62 = vld [vmem:[#allocation30_spill] sm:$0xff] }
 0x219   : > { %v4668_v7 = vpack.c.bf16 %v1498_v21, %v1498_v21  ;;  %v1483_v45 = vadd.f32 %v1439_v33, %v1387_v56  ;;  %v1835_v47 = vadd.f32 %v1790_v6, %v1739_v58  ;;  %v1385_v25 = vmul.f32 %v8385_v62, %v8384_v18  ;;  %v8386_v33 = vld [vmem:[#allocation48_spill] sm:$0xff] }
 0x21a   : > { %v1738_v6 = vmul.f32 %v8386_v33, %v8384_v18  ;;  %v8394_v33 = vld [vmem:[#allocation27_spill] sm:$0xff] }
 0x21b   : > { %v1499_v28 = vmul.f32 %v1483_v45, %v8379_v48  ;;  %v1851_v52 = vmul.f32 %v1835_v47, %v8376_v53 }
 0x21c   : > { %2160 = vrot.lane.b32.xlu1 %v2117_v13, %s5186_s27  ;;  %v1792_v35 = vpop.permute.xlu1 %1791  ;;  %1564 = vrot.lane.b32.xlu0 %v4668_v7, %s5187_s29  ;;  %v1433_v63 = vpop.permute.xlu0 %1432  ;;  %v8387_v7 = vld [vmem:[#allocation15_spill] sm:$0xff]  ;;  %v8388_v13 = vld [vmem:[#allocation24_spill] sm:$0xff] }
 0x21d   : > { %v4669_v51 = vpack.c.bf16 %v1499_v28, %v1499_v28  ;;  %v4684_v8 = vpack.c.bf16 %v1851_v52, %v1851_v52  ;;  %v1836_v23 = vadd.f32 %v1792_v35, %v1740_v57  ;;  %v1480_v43 = vadd.f32 %v1433_v63, %v1384_v17 }
 0x21e   : > { %v1390_v57 = vmul.f32 %v8389_v29, %v8388_v13 }
 0x21f   : > { %v1852_v54 = vmul.f32 %v1836_v23, %v8379_v48  ;;  %v1496_v38 = vmul.f32 %v1480_v43, %v8383_v49  ;;  %v8390_v23 = vld [vmem:[#allocation22_spill] sm:$0xff] }
 0x220   : > { %1566 = vrot.lane.b32.xlu1 %v4669_v51, %s5187_s29  ;;  %v1435_v9 = vpop.permute.xlu1 %1434  ;;  %1917 = vrot.lane.b32.xlu0 %v4684_v8, %s5188_s28  ;;  %v1786_v58 = vpop.permute.xlu0 %1785  ;;  %v1743_v51 = vmul.f32 %v6354_v59, %v8388_v13  ;;  %v1744_v59 = vmul.f32 %v6244_v4, %v8391_v55 }
 0x221   : > { %v4685_v60 = vpack.c.bf16 %v1852_v54, %v1852_v54  ;;  %v4666_v21 = vpack.c.bf16 %v1496_v38, %v1496_v38  ;;  %v1481_v10 = vadd.f32 %v1435_v9, %v1385_v25  ;;  %v1833_v56 = vadd.f32 %v1786_v58, %v1737_v50  ;;  %v8392_v50 = vld [vmem:[#allocation37_spill] sm:$0xff] }
 0x222   : > { %v1391_v54 = vmul.f32 %v8392_v50, %v8391_v55 }
 0x223   : > { %v1497_v45 = vmul.f32 %v1481_v10, %v8387_v7  ;;  %v1849_v47 = vmul.f32 %v1833_v56, %v8383_v49 }
 0x224   : > { %1919 = vrot.lane.b32.xlu1 %v4685_v60, %s5188_s28  ;;  %v1788_v28 = vpop.permute.xlu1 %1787  ;;  %1560 = vrot.lane.b32.xlu0 %v4666_v21, %s5187_s29  ;;  %v1445_v52 = vpop.permute.xlu0 %1444  ;;  %v8393_v21 = vld [vmem:[#allocation23_spill] sm:$0xff] }
 0x225   : > { %v4667_v1 = vpack.c.bf16 %v1497_v45, %v1497_v45  ;;  %v4682_v17 = vpack.c.bf16 %v1849_v47, %v1849_v47  ;;  %v1834_v35 = vadd.f32 %v1788_v28, %v1738_v6  ;;  %v1486_v63 = vadd.f32 %v1445_v52, %v1390_v57  ;;  %v8395_v6 = vld [vmem:[#allocation34_spill] sm:$0xff] }
 0x226   : > { %v1388_v45 = vmul.f32 %v8395_v6, %v8394_v33 }
 0x227   : > { %v1850_v8 = vmul.f32 %v1834_v35, %v8387_v7  ;;  %v1502_v43 = vmul.f32 %v1486_v63, %v8390_v23  ;;  %v8397_v63 = vld [vmem:[#allocation19_spill] sm:$0xff] }
 0x228   : > { %1562 = vrot.lane.b32.xlu1 %v4667_v1, %s5187_s29  ;;  %v1447_v38 = vpop.permute.xlu1 %1446  ;;  %1913 = vrot.lane.b32.xlu0 %v4682_v17, %s5188_s28  ;;  %v1798_v62 = vpop.permute.xlu0 %1797  ;;  %v8396_v17 = vld [vmem:[#allocation51_spill] sm:$0xff] }
 0x229   : > { %v4683_v25 = vpack.c.bf16 %v1850_v8, %v1850_v8  ;;  %v4672_v9 = vpack.c.bf16 %v1502_v43, %v1502_v43  ;;  %v1487_v58 = vadd.f32 %v1447_v38, %v1391_v54  ;;  %v1839_v60 = vadd.f32 %v1798_v62, %v1743_v51  ;;  %v8398_v8 = vld [vmem:[#allocation28_spill] sm:$0xff]  ;;  %v8399_v43 = vld [vmem:[#allocation35_spill] sm:$0xff] }
 0x22a   : > { %v1741_v4 = vmul.f32 %v8396_v17, %v8394_v33  ;;  %v1389_v50 = vmul.f32 %v8399_v43, %v8398_v8 }
 0x22b   : > { %v1503_v10 = vmul.f32 %v1487_v58, %v8393_v21  ;;  %v1855_v56 = vmul.f32 %v1839_v60, %v8390_v23  ;;  %v8400_v60 = vld [vmem:[#allocation52_spill] sm:$0xff] }
 0x22c   : > { %1915 = vrot.lane.b32.xlu1 %v4683_v25, %s5188_s28  ;;  %v1800_v47 = vpop.permute.xlu1 %1799  ;;  %1572 = vrot.lane.b32.xlu0 %v4672_v9, %s5187_s29  ;;  %v1441_v29 = vpop.permute.xlu0 %1440 }
 0x22d   : > { %v4673_v57 = vpack.c.bf16 %v1503_v10, %v1503_v10  ;;  %v4688_v28 = vpack.c.bf16 %v1855_v56, %v1855_v56  ;;  %v1840_v52 = vadd.f32 %v1800_v47, %v1744_v59  ;;  %v1484_v1 = vadd.f32 %v1441_v29, %v1388_v45  ;;  %v8401_v10 = vld [vmem:[#allocation21_spill] sm:$0xff]  ;;  %v8402_v45 = vld [vmem:[#allocation32_spill] sm:$0xff] }
 0x22e   : > { %v1742_v59 = vmul.f32 %v8400_v60, %v8398_v8  ;;  %v8403_v47 = vld [vmem:[#allocation40_spill] sm:$0xff] }
 0x22f   : > { %v1856_v35 = vmul.f32 %v1840_v52, %v8393_v21  ;;  %v1500_v51 = vmul.f32 %v1484_v1, %v8397_v63  ;;  %v1394_v29 = vmul.f32 %v8403_v47, %v8402_v45 }
 0x230   : > { %1574 = vrot.lane.b32.xlu1 %v4673_v57, %s5187_s29  ;;  %v1443_v54 = vpop.permute.xlu1 %1442  ;;  %1925 = vrot.lane.b32.xlu0 %v4688_v28, %s5188_s28  ;;  %v1794_v38 = vpop.permute.xlu0 %1793 }
 0x231   : > { %v4689_v62 = vpack.c.bf16 %v1856_v35, %v1856_v35  ;;  %v4670_v25 = vpack.c.bf16 %v1500_v51, %v1500_v51  ;;  %v1485_v9 = vadd.f32 %v1443_v54, %v1389_v50  ;;  %v1837_v58 = vadd.f32 %v1794_v38, %v1741_v4  ;;  %v8404_v50 = vld [vmem:[#allocation41_spill] sm:$0xff] }
 0x232   : > { %v1747_v35 = vmul.f32 %v6379_v26, %v8402_v45  ;;  %v1395_v54 = vmul.f32 %v8404_v50, %v5734_v16  ;;  %v1748_v26 = vmul.f32 %v6385_v44, %v5734_v16  ;;  %v1745_v44 = vmul.f32 %v6366_v27, %v5757_v20 }
 0x233   : > { %v1501_v56 = vmul.f32 %v1485_v9, %v8401_v10  ;;  %v1853_v6 = vmul.f32 %v1837_v58, %v8397_v63  ;;  %v1746_v27 = vmul.f32 %v6373_v34, %v5768_v30 }
 0x234   : > { %1927 = vrot.lane.b32.xlu1 %v4689_v62, %s5188_s28  ;;  %v1796_v57 = vpop.permute.xlu1 %1795  ;;  %1568 = vrot.lane.b32.xlu0 %v4670_v25, %s5187_s29  ;;  %v1453_v28 = vpop.permute.xlu0 %1452 }
 0x235   : > { %v4671_v52 = vpack.c.bf16 %v1501_v56, %v1501_v56  ;;  %v4686_v1 = vpack.c.bf16 %v1853_v6, %v1853_v6  ;;  %v1838_v17 = vadd.f32 %v1796_v57, %v1742_v59  ;;  %v1490_v4 = vadd.f32 %v1453_v28, %v1394_v29  ;;  %v8405_v6 = vld [vmem:[#allocation38_spill] sm:$0xff] }
 0x236   : > { %v1392_v47 = vmul.f32 %v8405_v6, %v5757_v20 }
 0x237   : > { %v1854_v51 = vmul.f32 %v1838_v17, %v8401_v10  ;;  %v1506_v43 = vmul.f32 %v1490_v4, %v5667_v42 }
 0x238   : > { %1570 = vrot.lane.b32.xlu1 %v4671_v52, %s5187_s29  ;;  %v1455_v38 = vpop.permute.xlu1 %1454  ;;  %1921 = vrot.lane.b32.xlu0 %v4686_v1, %s5188_s28  ;;  %v1806_v62 = vpop.permute.xlu0 %1805 }
 0x239   : > { %v4687_v25 = vpack.c.bf16 %v1854_v51, %v1854_v51  ;;  %v4676_v9 = vpack.c.bf16 %v1506_v43, %v1506_v43  ;;  %v1491_v58 = vadd.f32 %v1455_v38, %v1395_v54  ;;  %v1843_v60 = vadd.f32 %v1806_v62, %v1747_v35  ;;  %v8406_v51 = vld [vmem:[#allocation39_spill] sm:$0xff] }
 0x23a   : > { %v1393_v43 = vmul.f32 %v8406_v51, %v5768_v30 }
 0x23b   : > { %v1507_v59 = vmul.f32 %v1491_v58, %v5676_v61  ;;  %v1859_v56 = vmul.f32 %v1843_v60, %v5667_v42 }
 0x23c   : > { %1923 = vrot.lane.b32.xlu1 %v4687_v25, %s5188_s28  ;;  %v1808_v29 = vpop.permute.xlu1 %1807  ;;  %1580 = vrot.lane.b32.xlu0 %v4676_v9, %s5187_s29  ;;  %v1449_v57 = vpop.permute.xlu0 %1448 }
 0x23d   : > { %v4677_v28 = vpack.c.bf16 %v1507_v59, %v1507_v59  ;;  %v4692_v52 = vpack.c.bf16 %v1859_v56, %v1859_v56  ;;  %v1844_v1 = vadd.f32 %v1808_v29, %v1748_v26  ;;  %v1488_v17 = vadd.f32 %v1449_v57, %v1392_v47  ;;  %v8407_v26 = vld [vmem:[#allocation44_spill] sm:$0xff]  ;;  %v8408_v59 = vld [vmem:[#allocation45_spill] sm:$0xff] }
 0x23e   : > { %v1398_v56 = vmul.f32 %v8408_v59, %v8407_v26  ;;  %v1751_v34 = vmul.f32 %v6403_v12, %v8407_v26 }
 0x23f   : > { %v1860_v4 = vmul.f32 %v1844_v1, %v5676_v61  ;;  %v1504_v35 = vmul.f32 %v1488_v17, %v5652_v37 }
 0x240   : > { %1582 = vrot.lane.b32.xlu1 %v4677_v28, %s5187_s29  ;;  %v1451_v50 = vpop.permute.xlu1 %1450  ;;  %1933 = vrot.lane.b32.xlu0 %v4692_v52, %s5188_s28  ;;  %v1802_v54 = vpop.permute.xlu0 %1801 }
 0x241   : > { %v4693_v38 = vpack.c.bf16 %v1860_v4, %v1860_v4  ;;  %v4674_v62 = vpack.c.bf16 %v1504_v35, %v1504_v35  ;;  %v1489_v25 = vadd.f32 %v1451_v50, %v1393_v43  ;;  %v1841_v9 = vadd.f32 %v1802_v54, %v1745_v44  ;;  %v8409_v54 = vld [vmem:[#allocation46_spill] sm:$0xff] }
 0x242   : > { %v2039_v50 = vsel %vm1014_vm2, %v6463_v32, %v6360_v36  ;;  %v1752_v36 = vmul.f32 %v6409_v11, %v5806_v39 }
 0x243   : > { %v1505_v58 = vmul.f32 %v1489_v25, %v5661_v40  ;;  %v1857_v60 = vmul.f32 %v1841_v9, %v5652_v37 }
 0x244   : > { %1935 = vrot.lane.b32.xlu1 %v4693_v38, %s5188_s28  ;;  %v1804_v6 = vpop.permute.xlu1 %1803  ;;  %1576 = vrot.lane.b32.xlu0 %v4674_v62, %s5187_s29  ;;  %v1461_v47 = vpop.permute.xlu0 %1460  ;;  %v1399_v38 = vmul.f32 %v8409_v54, %v5806_v39  ;;  %v8413_v54 = vld [vmem:[#allocation59_spill] sm:$0xff] }
 0x245   : > { %v4675_v29 = vpack.c.bf16 %v1505_v58, %v1505_v58  ;;  %v4690_v57 = vpack.c.bf16 %v1857_v60, %v1857_v60  ;;  %v1842_v28 = vadd.f32 %v1804_v6, %v1746_v27  ;;  %v1494_v52 = vadd.f32 %v1461_v47, %v1398_v56  ;;  %v8410_v27 = vld [vmem:[#allocation42_spill] sm:$0xff] }
 0x246   : > { %v1396_v58 = vmul.f32 %v8410_v27, %v5825_v19  ;;  %v2119_v60 = vmul.f32 %v2039_v50, %v6336_v14  ;;  %v1749_v47 = vmul.f32 %v6391_v31, %v5825_v19 }
 0x247   : > { %v1858_v1 = vmul.f32 %v1842_v28, %v5661_v40  ;;  %v1510_v17 = vmul.f32 %v1494_v52, %v5690_v2 }
 0x248   : > { %1578 = vrot.lane.b32.xlu1 %v4675_v29, %s5187_s29  ;;  %v6585_v44 = vpop.permute.xlu1 %2044  ;;  %1929 = vrot.lane.b32.xlu0 %v4690_v57, %s5188_s28  ;;  %v1814_v4 = vpop.permute.xlu0 %1813 }
 0x249   : > { %v4691_v35 = vpack.c.bf16 %v1858_v1, %v1858_v1  ;;  %v4680_v51 = vpack.c.bf16 %v1510_v17, %v1510_v17  ;;  %v1847_v43 = vadd.f32 %v1814_v4, %v1751_v34  ;;  %v8411_v4 = vld [vmem:[#allocation53_spill] sm:$0xff] }
 0x24b   : > { %v1863_v12 = vmul.f32 %v1847_v43, %v5690_v2 }
 0x24c   : > { %1931 = vrot.lane.b32.xlu1 %v4691_v35, %s5188_s28  ;;  %v1463_v62 = vpop.permute.xlu1 %1462  ;;  %1588 = vrot.lane.b32.xlu0 %v4680_v51, %s5187_s29  ;;  %v8412_v35 = vld [vmem:[#allocation43_spill] sm:$0xff] }
 0x24d   : > { %v4696_v25 = vpack.c.bf16 %v1863_v12, %v1863_v12  ;;  %v1495_v9 = vadd.f32 %v1463_v62, %v1399_v38  ;;  %v1397_v51 = vmul.f32 %v8412_v35, %v8411_v4  ;;  %v2038_v38 = vsel %vm1014_vm2, %v6454_v15, %v8413_v54  ;;  %v8414_v62 = vld [vmem:[#allocation60_spill] sm:$0xff] }
 0x24e   : > { %v1457_v59 = vpop.permute.xlu0 %1456 }
 0x24f   : > { %v1511_v32 = vmul.f32 %v1495_v9, %v5699_v5  ;;  %v1492_v56 = vadd.f32 %v1457_v59, %v1396_v58  ;;  %v8415_v9 = vld [vmem:[#allocation26_spill] sm:$0xff]  ;;  %v8416_v59 = vld [vmem:[#allocation57_spill] sm:$0xff] }
 0x250   : > { %2164 = vrot.lane.b32.xlu1 %v2119_v60, %s5186_s27  ;;  %v1816_v6 = vpop.permute.xlu1 %1815  ;;  %1941 = vrot.lane.b32.xlu0 %v4696_v25, %s5188_s28  ;;  %v1750_v25 = vmul.f32 %v8414_v62, %v8411_v4 }
 0x251   : > { %v4681_v29 = vpack.c.bf16 %v1511_v32, %v1511_v32  ;;  %v1508_v57 = vmul.f32 %v1492_v56, %v5678_v0  ;;  %v1848_v28 = vadd.f32 %v1816_v6, %v1752_v36  ;;  %v2118_v36 = vmul.f32 %v2038_v38, %v8416_v59  ;;  %v8417_v6 = vld [vmem:[#allocation56_spill] sm:$0xff] }
 0x252   : > { %v1810_v14 = vpop.permute.xlu0 %1809 }
 0x253   : > { %v4678_v52 = vpack.c.bf16 %v1508_v57, %v1508_v57  ;;  %v1864_v34 = vmul.f32 %v1848_v28, %v5699_v5  ;;  %v1845_v11 = vadd.f32 %v1810_v14, %v1749_v47  ;;  %v2040_v47 = vsel %vm1014_vm2, %v6466_v3, %v8417_v6  ;;  %v8418_v28 = vld [vmem:[#allocation54_spill] sm:$0xff] }
 0x254   : > { %1590 = vrot.lane.b32.xlu1 %v4681_v29, %s5187_s29  ;;  %v2120_v14 = vmul.f32 %v2040_v47, %v8418_v28 }
 0x255   : > { %v4697_v1 = vpack.c.bf16 %v1864_v34, %v1864_v34  ;;  %v1861_v17 = vmul.f32 %v1845_v11, %v5678_v0  ;;  %1584 = vrot.lane.b32.xlu0 %v4678_v52, %s5187_s29  ;;  %v8419_v34 = vld [vmem:[#allocation58_spill] sm:$0xff] }
 0x256   : > { %v1459_v31 = vpop.permute.xlu1 %1458  ;;  %v2043_v43 = vpop.permute.xlu0 %2042  ;;  %v2041_v11 = vsel %vm1014_vm2, %v6477_v46, %v8419_v34 }
 0x257   : > { %v4694_v50 = vpack.c.bf16 %v1861_v17, %v1861_v17  ;;  %v1493_v12 = vadd.f32 %v1459_v31, %v1397_v51  ;;  %v8420_v17 = vld [vmem:[#allocation55_spill] sm:$0xff] }
 0x258   : > { %1943 = vrot.lane.b32.xlu1 %v4697_v1, %s5188_s28  ;;  %v2121_v35 = vmul.f32 %v2041_v11, %v8420_v17 }
 0x259   : > { %v1509_v27 = vmul.f32 %v1493_v12, %v8415_v9  ;;  %1937 = vrot.lane.b32.xlu0 %v4694_v50, %s5188_s28 }
 0x25a   : > { %v1812_v58 = vpop.permute.xlu1 %1811  ;;  %v2047_v60 = vpop.permute.xlu0 %2046 }
 0x25b   : > { %v4679_v32 = vpack.c.bf16 %v1509_v27, %v1509_v27  ;;  %v1846_v56 = vadd.f32 %v1812_v58, %v1750_v25  ;;  %v2090_v25 = vmul.f32 %v2043_v43, %v8380_v41 }
 0x25d   : > { %v1862_v15 = vmul.f32 %v1846_v56, %v8415_v9  ;;  %1586 = vrot.lane.b32.xlu1 %v4679_v32, %s5187_s29  ;;  %2162 = vrot.lane.b32.xlu0 %v2118_v36, %s5186_s27  ;;  %v2091_v36 = vmul.f32 %v6585_v44, %v8384_v18  ;;  %v2092_v32 = vmul.f32 %v2047_v60, %v5599_v22 }
 0x25e   : > { %v2049_v29 = vpop.permute.xlu1 %2048  ;;  %v2051_v57 = vpop.permute.xlu0 %2050 }
 0x25f   : > { %v4695_v52 = vpack.c.bf16 %v1862_v15, %v1862_v15  ;;  %v2094_v41 = vmul.f32 %v2051_v57, %v8394_v33 }
 0x261   : > { %1939 = vrot.lane.b32.xlu1 %v4695_v52, %s5188_s28  ;;  %2166 = vrot.lane.b32.xlu0 %v2120_v14, %s5186_s27  ;;  %v2093_v52 = vmul.f32 %v2049_v29, %v5604_v24 }
 0x262   : > { %v2053_v3 = vpop.permute.xlu1 %2052  ;;  %v2055_v1 = vpop.permute.xlu0 %2054 }
 0x263   : > { %v2095_v17 = vmul.f32 %v2053_v3, %v8398_v8 }
 0x265   : > { %2168 = vrot.lane.b32.xlu1 %v2121_v35, %s5186_s27  ;;  %v2096_v35 = vmul.f32 %v2055_v1, %v8388_v13 }
 0x266   : > { %v2057_v51 = vpop.permute.xlu1 %2056  ;;  %v2059_v31 = vpop.permute.xlu0 %2058 }
 0x267   : > { %v2098_v8 = vmul.f32 %v2059_v31, %v5757_v20 }
 0x26a   : > { %v2061_v50 = vpop.permute.xlu1 %2060  ;;  %v2063_v12 = vpop.permute.xlu0 %2062 }
 0x26e   : > { %v6636_v54 = vpop.permute.xlu1 %2064  ;;  %v6638_v38 = vpop.permute.xlu0 %2066 }
 0x272   : > { %v6640_v62 = vpop.permute.xlu1 %2068  ;;  %v6642_v46 = vpop.permute.xlu0 %2070 }
 0x276   : > { %v6645_v27 = vpop.permute.xlu1 %2072  ;;  %v2139_v58 = vpop.permute.xlu0 %2138 }
 0x277   : > { %v2186_v59 = vadd.f32 %v2139_v58, %v2090_v25 }
 0x279   : > { %v2202_v56 = vmul.f32 %v2186_v59, %v8383_v49  ;;  %v2097_v59 = vmul.f32 %v2057_v51, %v8391_v55  ;;  %v2100_v55 = vmul.f32 %v2063_v12, %v8402_v45 }
 0x27a   : > { %v2141_v6 = vpop.permute.xlu1 %2140  ;;  %v2143_v47 = vpop.permute.xlu0 %2142 }
 0x27b   : > { %v4698_v15 = vpack.c.bf16 %v2202_v56, %v2202_v56  ;;  %v2187_v28 = vadd.f32 %v2141_v6, %v2091_v36  ;;  %v2188_v14 = vadd.f32 %v2143_v47, %v2092_v32  ;;  %v2099_v6 = vmul.f32 %v2061_v50, %v5768_v30 }
 0x27d   : > { %v2203_v43 = vmul.f32 %v2187_v28, %v8387_v7  ;;  %v2204_v34 = vmul.f32 %v2188_v14, %v8376_v53  ;;  %2266 = vrot.lane.b32.xlu0 %v4698_v15, %s5189_s25  ;;  %v2101_v14 = vmul.f32 %v6636_v54, %v5734_v16 }
 0x27e   : > { %v2145_v18 = vpop.permute.xlu1 %2144  ;;  %v2147_v22 = vpop.permute.xlu0 %2146 }
 0x27f   : > { %v4699_v44 = vpack.c.bf16 %v2203_v43, %v2203_v43  ;;  %v4700_v49 = vpack.c.bf16 %v2204_v34, %v2204_v34  ;;  %v2189_v60 = vadd.f32 %v2145_v18, %v2093_v52  ;;  %v2190_v11 = vadd.f32 %v2147_v22, %v2094_v41 }
 0x281   : > { %v2205_v24 = vmul.f32 %v2189_v60, %v8379_v48  ;;  %v2206_v33 = vmul.f32 %v2190_v11, %v8397_v63  ;;  %2268 = vrot.lane.b32.xlu1 %v4699_v44, %s5189_s25  ;;  %2270 = vrot.lane.b32.xlu0 %v4700_v49, %s5189_s25 }
 0x282   : > { %v2149_v53 = vpop.permute.xlu1 %2148  ;;  %v2151_v7 = vpop.permute.xlu0 %2150 }
 0x283   : > { %v4701_v29 = vpack.c.bf16 %v2205_v24, %v2205_v24  ;;  %v4702_v57 = vpack.c.bf16 %v2206_v33, %v2206_v33  ;;  %v2191_v25 = vadd.f32 %v2149_v53, %v2095_v17  ;;  %v2192_v58 = vadd.f32 %v2151_v7, %v2096_v35 }
 0x285   : > { %v2207_v13 = vmul.f32 %v2191_v25, %v8401_v10  ;;  %v2208_v48 = vmul.f32 %v2192_v58, %v8390_v23  ;;  %2272 = vrot.lane.b32.xlu1 %v4701_v29, %s5189_s25  ;;  %2274 = vrot.lane.b32.xlu0 %v4702_v57, %s5189_s25  ;;  %v4842_v25 = vpop.f32.mrf.mxu1 }
 0x286   : > { %v2153_v63 = vpop.permute.xlu1 %2152  ;;  %v2155_v3 = vpop.permute.xlu0 %2154 }
 0x287   : > { %v4703_v1 = vpack.c.bf16 %v2207_v13, %v2207_v13  ;;  %v4704_v36 = vpack.c.bf16 %v2208_v48, %v2208_v48  ;;  %v2193_v32 = vadd.f32 %v2153_v63, %v2097_v59  ;;  %v2194_v56 = vadd.f32 %v2155_v3, %v2098_v8  ;;  %v2472_v8 = vpop.f32.mrf.mxu1 }
 0x288   : > { %v2103_v63 = vmul.f32 %v6640_v62, %v8411_v4 }
 0x289   : > { %v2209_v20 = vmul.f32 %v2193_v32, %v8393_v21  ;;  %v2210_v10 = vmul.f32 %v2194_v56, %v5652_v37  ;;  %2276 = vrot.lane.b32.xlu1 %v4703_v1, %s5189_s25  ;;  %2278 = vrot.lane.b32.xlu0 %v4704_v36, %s5189_s25  ;;  %v4843_v3 = vpop.f32.mrf.mxu1 }
 0x28a   : > { %v2157_v23 = vpop.permute.xlu1 %2156  ;;  %v2159_v51 = vpop.permute.xlu0 %2158 }
 0x28b   : > { %v4705_v31 = vpack.c.bf16 %v2209_v20, %v2209_v20  ;;  %v4706_v47 = vpack.c.bf16 %v2210_v10, %v2210_v10  ;;  %v2195_v15 = vadd.f32 %v2157_v23, %v2099_v6  ;;  %v2196_v28 = vadd.f32 %v2159_v51, %v2100_v55  ;;  %v2475_v6 = vpop.f32.mrf.mxu1 }
 0x28d   : > { %v2211_v30 = vmul.f32 %v2195_v15, %v5661_v40  ;;  %v2212_v45 = vmul.f32 %v2196_v28, %v5667_v42  ;;  %2280 = vrot.lane.b32.xlu1 %v4705_v31, %s5189_s25  ;;  %2282 = vrot.lane.b32.xlu0 %v4706_v47, %s5189_s25  ;;  %v4846_v23 = vpop.f32.mrf.mxu1 }
 0x28e   : > { %v2161_v37 = vpop.permute.xlu1 %2160  ;;  %v1565_v21 = vpop.permute.xlu0 %1564 }
 0x28f   : > { %v4707_v50 = vpack.c.bf16 %v2211_v30, %v2211_v30  ;;  %v4708_v12 = vpack.c.bf16 %v2212_v45, %v2212_v45  ;;  %v2197_v52 = vadd.f32 %v2161_v37, %v2101_v14  ;;  %1611 = vst.msk [vmem:[#allocation2 + $0x48] sm:$0xf] %vm1239_vm3, %v1565_v21  ;;  %v2488_v51 = vpop.f32.mrf.mxu1  ;;  %v2104_v14 = vmul.f32 %v6642_v46, %v8407_v26 }
 0x291   : > { %v2213_v41 = vmul.f32 %v2197_v52, %v5676_v61  ;;  %2284 = vrot.lane.b32.xlu1 %v4707_v50, %s5189_s25  ;;  %2286 = vrot.lane.b32.xlu0 %v4708_v12, %s5189_s25  ;;  %v4847_v28 = vpop.f32.mrf.mxu1 }
 0x292   : > { %v1567_v40 = vpop.permute.xlu1 %1566  ;;  %v1918_v16 = vpop.permute.xlu0 %1917 }
 0x293   : > { %v4709_v42 = vpack.c.bf16 %v2213_v41, %v2213_v41  ;;  %1612 = vst.msk [vmem:[#allocation2 + $0x4c] sm:$0xf] %vm1239_vm3, %v1567_v40  ;;  %1964 = vst.msk [vmem:[#allocation2 + $0x88] sm:$0xf] %vm1239_vm3, %v1918_v16  ;;  %v2491_v12 = vpop.f32.mrf.mxu1 }
 0x295   : > { %2288 = vrot.lane.b32.xlu1 %v4709_v42, %s5189_s25  ;;  %v4850_v26 = vpop.f32.mrf.mxu1 }
 0x296   : > { %v1920_v54 = vpop.permute.xlu1 %1919  ;;  %v1561_v43 = vpop.permute.xlu0 %1560 }
 0x297   : > { %1965 = vst.msk [vmem:[#allocation2 + $0x8c] sm:$0xf] %vm1239_vm3, %v1920_v54  ;;  %1609 = vst.msk [vmem:[#allocation2 + $0x40] sm:$0xf] %vm1239_vm3, %v1561_v43 }
 0x29a   : > { %v1563_v61 = vpop.permute.xlu1 %1562  ;;  %v1914_v34 = vpop.permute.xlu0 %1913 }
 0x29b   : > { %1610 = vst.msk [vmem:[#allocation2 + $0x44] sm:$0xf] %vm1239_vm3, %v1563_v61  ;;  %1962 = vst.msk [vmem:[#allocation2 + $0x80] sm:$0xf] %vm1239_vm3, %v1914_v34 }
 0x29e   : > { %v1916_v18 = vpop.permute.xlu1 %1915  ;;  %v1573_v22 = vpop.permute.xlu0 %1572 }
 0x29f   : > { %1963 = vst.msk [vmem:[#allocation2 + $0x84] sm:$0xf] %vm1239_vm3, %v1916_v18  ;;  %1615 = vst.msk [vmem:[#allocation2 + $0x58] sm:$0xf] %vm1239_vm3, %v1573_v22 }
 0x2a2   : > { %v1575_v44 = vpop.permute.xlu1 %1574  ;;  %v1926_v49 = vpop.permute.xlu0 %1925 }
 0x2a3   : > { %1616 = vst.msk [vmem:[#allocation2 + $0x5c] sm:$0xf] %vm1239_vm3, %v1575_v44  ;;  %1968 = vst.msk [vmem:[#allocation2 + $0x98] sm:$0xf] %vm1239_vm3, %v1926_v49 }
 0x2a6   : > { %v1928_v60 = vpop.permute.xlu1 %1927  ;;  %v1569_v11 = vpop.permute.xlu0 %1568 }
 0x2a7   : > { %1969 = vst.msk [vmem:[#allocation2 + $0x9c] sm:$0xf] %vm1239_vm3, %v1928_v60  ;;  %1613 = vst.msk [vmem:[#allocation2 + $0x50] sm:$0xf] %vm1239_vm3, %v1569_v11 }
 0x2aa   : > { %v1571_v17 = vpop.permute.xlu1 %1570  ;;  %v1922_v35 = vpop.permute.xlu0 %1921 }
 0x2ab   : > { %1614 = vst.msk [vmem:[#allocation2 + $0x54] sm:$0xf] %vm1239_vm3, %v1571_v17  ;;  %1966 = vst.msk [vmem:[#allocation2 + $0x90] sm:$0xf] %vm1239_vm3, %v1922_v35 }
 0x2ae   : > { %v1924_v24 = vpop.permute.xlu1 %1923  ;;  %v1581_v33 = vpop.permute.xlu0 %1580 }
 0x2af   : > { %1967 = vst.msk [vmem:[#allocation2 + $0x94] sm:$0xf] %vm1239_vm3, %v1924_v24  ;;  %1619 = vst.msk [vmem:[#allocation2 + $0x68] sm:$0xf] %vm1239_vm3, %v1581_v33 }
 0x2b2   : > { %v1583_v53 = vpop.permute.xlu1 %1582  ;;  %v1934_v7 = vpop.permute.xlu0 %1933 }
 0x2b3   : > { %1620 = vst.msk [vmem:[#allocation2 + $0x6c] sm:$0xf] %vm1239_vm3, %v1583_v53  ;;  %1972 = vst.msk [vmem:[#allocation2 + $0xa8] sm:$0xf] %vm1239_vm3, %v1934_v7 }
 0x2b6   : > { %v1936_v29 = vpop.permute.xlu1 %1935  ;;  %v1577_v57 = vpop.permute.xlu0 %1576 }
 0x2b7   : > { %1973 = vst.msk [vmem:[#allocation2 + $0xac] sm:$0xf] %vm1239_vm3, %v1936_v29  ;;  %1617 = vst.msk [vmem:[#allocation2 + $0x60] sm:$0xf] %vm1239_vm3, %v1577_v57 }
 0x2ba   : > { %v1579_v58 = vpop.permute.xlu1 %1578  ;;  %v1930_v59 = vpop.permute.xlu0 %1929 }
 0x2bb   : > { %1618 = vst.msk [vmem:[#allocation2 + $0x64] sm:$0xf] %vm1239_vm3, %v1579_v58  ;;  %1970 = vst.msk [vmem:[#allocation2 + $0xa0] sm:$0xf] %vm1239_vm3, %v1930_v59 }
 0x2be   : > { %v1932_v13 = vpop.permute.xlu1 %1931  ;;  %v1589_v48 = vpop.permute.xlu0 %1588 }
 0x2bf   : > { %1971 = vst.msk [vmem:[#allocation2 + $0xa4] sm:$0xf] %vm1239_vm3, %v1932_v13  ;;  %1623 = vst.msk [vmem:[#allocation2 + $0x78] sm:$0xf] %vm1239_vm3, %v1589_v48 }
 0x2c2   : > { %v2165_v1 = vpop.permute.xlu1 %2164  ;;  %v1942_v36 = vpop.permute.xlu0 %1941 }
 0x2c3   : > { %v2199_v32 = vadd.f32 %v2165_v1, %v2103_v63  ;;  %1976 = vst.msk [vmem:[#allocation2 + $0xb8] sm:$0xf] %vm1239_vm3, %v1942_v36 }
 0x2c5   : > { %v2215_v56 = vmul.f32 %v2199_v32, %v8415_v9  ;;  %v2102_v9 = vmul.f32 %v6638_v38, %v5825_v19  ;;  %v2105_v19 = vmul.f32 %v6645_v27, %v5806_v39  ;;  %v2504_v39 = vpop.f32.mrf.mxu1 }
 0x2c6   : > { %v1591_v55 = vpop.permute.xlu1 %1590 }
 0x2c7   : > { %v4711_v20 = vpack.c.bf16 %v2215_v56, %v2215_v56  ;;  %1624 = vst.msk [vmem:[#allocation2 + $0x7c] sm:$0xf] %vm1239_vm3, %v1591_v55  ;;  %v1585_v10 = vpop.permute.xlu0 %1584  ;;  %v4851_v54 = vpop.f32.mrf.mxu1  ;;  %v2536_v55 = vld [vmem:[%s5331_s15 + $0x8] sm:$0xff] }
 0x2c8   : > { %1621 = vst.msk [vmem:[#allocation2 + $0x70] sm:$0xf] %vm1239_vm3, %v1585_v10  ;;  %v2538_v10 = vld [vmem:[%s5331_s15 + $0x18] sm:$0xff] }
 0x2c9   : > { %2292 = vrot.lane.b32.xlu1 %v4711_v20, %s5189_s25  ;;  %v2507_v61 = vpop.f32.mrf.mxu1  ;;  %v2537_v20 = vld [vmem:[%s5331_s15 + $0x10] sm:$0xff] }
 0x2ca   : > { %v1944_v4 = vpop.permute.xlu1 %1943 }
 0x2cb   : > { %1977 = vst.msk [vmem:[#allocation2 + $0xbc] sm:$0xf] %vm1239_vm3, %v1944_v4  ;;  %v1938_v62 = vpop.permute.xlu0 %1937  ;;  %v4854_v22 = vpop.f32.mrf.mxu1  ;;  %v2540_v4 = vld [vmem:[%s5331_s15 + $0x28] sm:$0xff] }
 0x2cc   : > { %1974 = vst.msk [vmem:[#allocation2 + $0xb0] sm:$0xf] %vm1239_vm3, %v1938_v62  ;;  %v2541_v62 = vld [vmem:[%s5331_s15 + $0x30] sm:$0xff] }
 0x2cd   : > { %v2520_v60 = vpop.f32.mrf.mxu1 }
 0x2cf   : > { %v1587_v31 = vpop.permute.xlu1 %1586  ;;  %v2163_v47 = vpop.permute.xlu0 %2162 }
 0x2d0   : > { %1622 = vst.msk [vmem:[#allocation2 + $0x74] sm:$0xf] %vm1239_vm3, %v1587_v31  ;;  %v2198_v15 = vadd.f32 %v2163_v47, %v2102_v9  ;;  %v4855_v24 = vpop.f32.mrf.mxu1  ;;  %v2543_v9 = vld [vmem:[%s5331_s15 + $0x40] sm:$0xff]  ;;  %v2544_v31 = vld [vmem:[%s5331_s15 + $0x48] sm:$0xff]  ;;  %v2545_v47 = vld [vmem:[%s5331_s15 + $0x50] sm:$0xff] }
 0x2d2   : > { %v2214_v30 = vmul.f32 %v2198_v15, %v5678_v0  ;;  %v4532_v0 = vld [vmem:[%s8155_s4] ss:$0 sm:$0xff]  ;;  %v2523_v57 = vpop.f32.mrf.mxu1  ;;  %v2546_v15 = vld [vmem:[%s5331_s15 + $0x58] sm:$0xff] }
 0x2d3   : > { %v1940_v45 = vpop.permute.xlu1 %1939  ;;  %v2167_v37 = vpop.permute.xlu0 %2166  ;;  %v6734_v16 = vadd.f32 %v4532_v0, %v2472_v8  ;;  %v6741_v27 = vadd.f32 %v4532_v0, %v2475_v6  ;;  %v6749_v43 = vadd.f32 %v4532_v0, %v2488_v51  ;;  %v6755_v34 = vadd.f32 %v4846_v23, %v4532_v0  ;;  %v2535_v6 = vld [vmem:[%s5331_s15] sm:$0xff]  ;;  %v2542_v51 = vld [vmem:[%s5331_s15 + $0x38] sm:$0xff] }
 0x2d4   : > { %v4710_v21 = vpack.c.bf16 %v2214_v30, %v2214_v30  ;;  %1975 = vst.msk [vmem:[#allocation2 + $0xb4] sm:$0xf] %vm1239_vm3, %v1940_v45  ;;  %v2200_v50 = vadd.f32 %v2167_v37, %v2104_v14  ;;  %v6757_v18 = vadd.f32 %v4532_v0, %v2491_v12  ;;  %v6763_v44 = vadd.f32 %v4847_v28, %v4532_v0  ;;  %v2539_v23 = vld [vmem:[%s5331_s15 + $0x20] sm:$0xff]  ;;  %v2548_v14 = vld [vmem:[%s5331_s15 + $0x68] sm:$0xff]  ;;  %v2549_v30 = vld [vmem:[%s5331_s15 + $0x70] sm:$0xff] }
 0x2d5   : > { %8421 = vst [vmem:[#allocation31_spill] sm:$0xff] %v6734_v16  ;;  %8423 = vst [vmem:[#allocation16_spill] sm:$0xff] %v6741_v27  ;;  %v6765_v49 = vadd.f32 %v4532_v0, %v2504_v39  ;;  %v6771_v17 = vadd.f32 %v4850_v26, %v4532_v0  ;;  %v6773_v35 = vadd.f32 %v4532_v0, %v2507_v61  ;;  %v2547_v28 = vld [vmem:[%s5331_s15 + $0x60] sm:$0xff]  ;;  %v2550_v37 = vld [vmem:[%s5331_s15 + $0x78] sm:$0xff] }
 0x2d6   : > { %v2216_v38 = vmul.f32 %v2200_v50, %v5690_v2  ;;  %2290 = vrot.lane.b32.xlu0 %v4710_v21, %s5189_s25  ;;  %v6739_v2 = vadd.f32 %v4842_v25, %v4532_v0  ;;  %8424 = vst [vmem:[#allocation33_spill] sm:$0xff] %v6763_v44  ;;  %v6780_v7 = vadd.f32 %v4851_v54, %v4532_v0  ;;  %v6923_v54 = vld [vmem:[%s8156_s5 + $0x8] sm:$0xff]  ;;  %v6928_v61 = vld [vmem:[%s8156_s5 + $0x10] sm:$0xff] }
 0x2d7   : > { %v2169_v52 = vpop.permute.xlu1 %2168  ;;  %8425 = vst [vmem:[#allocation50_spill] sm:$0xff] %v6771_v17  ;;  %v6782_v29 = vadd.f32 %v4532_v0, %v2520_v60  ;;  %v6790_v59 = vadd.f32 %v4854_v22, %v4532_v0  ;;  %v6792_v8 = vadd.f32 %v4532_v0, %v2523_v57  ;;  %v6800_v63 = vadd.f32 %v4855_v24, %v4532_v0  ;;  %v6946_v24 = vld [vmem:[%s8156_s5 + $0x20] sm:$0xff]  ;;  %v6959_v57 = vld [vmem:[%s8156_s5 + $0x28] sm:$0xff] }
 0x2d8   : > { %v4712_v41 = vpack.c.bf16 %v2216_v38, %v2216_v38  ;;  %v2201_v40 = vadd.f32 %v2169_v52, %v2105_v19  ;;  %8422 = vst [vmem:[#allocation49_spill] sm:$0xff] %v6739_v2  ;;  %8426 = vst [vmem:[#allocation17_spill] sm:$0xff] %v6780_v7 }
 0x2d9   : > { %8427 = vst [vmem:[#allocation18_spill] sm:$0xff] %v6782_v29  ;;  %8428 = vst [vmem:[#allocation29_spill] sm:$0xff] %v6790_v59 }
 0x2da   : > { %v2217_v46 = vmul.f32 %v2201_v40, %v5699_v5  ;;  %2294 = vrot.lane.b32.xlu0 %v4712_v41, %s5189_s25  ;;  %v6747_v5 = vadd.f32 %v4843_v3, %v4532_v0  ;;  %8429 = vst [vmem:[#allocation47_spill] sm:$0xff] %v6792_v8  ;;  %8430 = vst [vmem:[#allocation14_spill] sm:$0xff] %v6800_v63 }
 0x2db   : > { %8435 = vst [vmem:[#allocation24_spill] sm:$0xff] %v6923_v54  ;;  %8436 = vst [vmem:[#allocation36_spill] sm:$0xff] %v6928_v61 }
 0x2dc   : > { %v4713_v42 = vpack.c.bf16 %v2217_v46, %v2217_v46  ;;  %v6910_v46 = vld [vmem:[%s8156_s5] sm:$0xff]  ;;  %8438 = vst [vmem:[#allocation25_spill] sm:$0xff] %v6946_v24  ;;  %8439 = vst [vmem:[#allocation37_spill] sm:$0xff] %v6959_v57 }
 0x2dd   : > { %8434 = vst [vmem:[#allocation15_spill] sm:$0xff] %v6910_v46 }
 0x2de   : > { %2296 = vrot.lane.b32.xlu1 %v4713_v42, %s5189_s25  ;;  %2599 = vrot.lane.b32.xlu0 %v6734_v16, %s5181_s24 }
 0x2e2   : > { %2601 = vrot.lane.b32.xlu1 %v6741_v27, %s5181_s24  ;;  %2603 = vrot.lane.b32.xlu0 %v6739_v2, %s5181_s24 }
 0x2e6   : > { %2605 = vrot.lane.b32.xlu1 %v6747_v5, %s5181_s24  ;;  %2607 = vrot.lane.b32.xlu0 %v6749_v43, %s5181_s24 }
 0x2ea   : > { %2609 = vrot.lane.b32.xlu1 %v6757_v18, %s5181_s24  ;;  %2611 = vrot.lane.b32.xlu0 %v6755_v34, %s5181_s24 }
 0x2ee   : > { %2613 = vrot.lane.b32.xlu1 %v6763_v44, %s5181_s24  ;;  %2615 = vrot.lane.b32.xlu0 %v6765_v49, %s5181_s24 }
 0x2ef   : > { %v2267_v11 = vpop.permute.xlu0 %2266 }
 0x2f0   : > { %2315 = vst.msk [vmem:[#allocation2 + $0xc0] sm:$0xf] %vm1239_vm3, %v2267_v11  ;;  %v6941_v11 = vld [vmem:[%s8156_s5 + $0x18] sm:$0xff] }
 0x2f1   : > { %8437 = vst [vmem:[#allocation22_spill] sm:$0xff] %v6941_v11 }
 0x2f2   : > { %2617 = vrot.lane.b32.xlu1 %v6773_v35, %s5181_s24  ;;  %2619 = vrot.lane.b32.xlu0 %v6771_v17, %s5181_s24 }
 0x2f3   : > { %v2269_v33 = vpop.permute.xlu1 %2268  ;;  %v2271_v53 = vpop.permute.xlu0 %2270 }
 0x2f4   : > { %2316 = vst.msk [vmem:[#allocation2 + $0xc4] sm:$0xf] %vm1239_vm3, %v2269_v33  ;;  %2317 = vst.msk [vmem:[#allocation2 + $0xc8] sm:$0xf] %vm1239_vm3, %v2271_v53 }
 0x2f6   : > { %2621 = vrot.lane.b32.xlu1 %v6780_v7, %s5181_s24  ;;  %2623 = vrot.lane.b32.xlu0 %v6782_v29, %s5181_s24 }
 0x2f7   : > { %v2273_v25 = vpop.permute.xlu1 %2272  ;;  %v2275_v58 = vpop.permute.xlu0 %2274 }
 0x2f8   : > { %2318 = vst.msk [vmem:[#allocation2 + $0xcc] sm:$0xf] %vm1239_vm3, %v2273_v25  ;;  %2319 = vst.msk [vmem:[#allocation2 + $0xd0] sm:$0xf] %vm1239_vm3, %v2275_v58  ;;  %v6964_v25 = vld [vmem:[%s8156_s5 + $0x30] sm:$0xff] }
 0x2f9   : > { %8440 = vst [vmem:[#allocation23_spill] sm:$0xff] %v6964_v25 }
 0x2fa   : > { %2625 = vrot.lane.b32.xlu1 %v6792_v8, %s5181_s24  ;;  %2627 = vrot.lane.b32.xlu0 %v6790_v59, %s5181_s24 }
 0x2fb   : > { %v2277_v13 = vpop.permute.xlu1 %2276  ;;  %v2279_v48 = vpop.permute.xlu0 %2278 }
 0x2fc   : > { %2320 = vst.msk [vmem:[#allocation2 + $0xd4] sm:$0xf] %vm1239_vm3, %v2277_v13  ;;  %2321 = vst.msk [vmem:[#allocation2 + $0xd8] sm:$0xf] %vm1239_vm3, %v2279_v48  ;;  %v6977_v48 = vld [vmem:[%s8156_s5 + $0x38] sm:$0xff] }
 0x2fd   : > { %8441 = vst [vmem:[#allocation27_spill] sm:$0xff] %v6977_v48 }
 0x2fe   : > { %2629 = vrot.lane.b32.xlu1 %v6800_v63, %s5181_s24  ;;  %2647 = vrot.lane.b32.xlu0 %v6734_v16, %s5182_s19 }
 0x2ff   : > { %v2281_v3 = vpop.permute.xlu1 %2280  ;;  %v2283_v1 = vpop.permute.xlu0 %2282 }
 0x300   : > { %2322 = vst.msk [vmem:[#allocation2 + $0xdc] sm:$0xf] %vm1239_vm3, %v2281_v3  ;;  %2323 = vst.msk [vmem:[#allocation2 + $0xe0] sm:$0xf] %vm1239_vm3, %v2283_v1  ;;  %v6982_v3 = vld [vmem:[%s8156_s5 + $0x40] sm:$0xff] }
 0x301   : > { %8442 = vst [vmem:[#allocation34_spill] sm:$0xff] %v6982_v3 }
 0x302   : > { %2649 = vrot.lane.b32.xlu1 %v6741_v27, %s5182_s19  ;;  %2651 = vrot.lane.b32.xlu0 %v6739_v2, %s5182_s19 }
 0x303   : > { %v2285_v36 = vpop.permute.xlu1 %2284  ;;  %v2287_v32 = vpop.permute.xlu0 %2286 }
 0x304   : > { %2324 = vst.msk [vmem:[#allocation2 + $0xe4] sm:$0xf] %vm1239_vm3, %v2285_v36  ;;  %2325 = vst.msk [vmem:[#allocation2 + $0xe8] sm:$0xf] %vm1239_vm3, %v2287_v32  ;;  %v6993_v32 = vld [vmem:[%s8156_s5 + $0x48] sm:$0xff] }
 0x305   : > { %8444 = vst [vmem:[#allocation19_spill] sm:$0xff] %v6993_v32 }
 0x306   : > { %2653 = vrot.lane.b32.xlu1 %v6747_v5, %s5182_s19  ;;  %2655 = vrot.lane.b32.xlu0 %v6749_v43, %s5182_s19 }
 0x307   : > { %v2289_v56 = vpop.permute.xlu1 %2288 }
 0x308   : > { %2326 = vst.msk [vmem:[#allocation2 + $0xec] sm:$0xf] %vm1239_vm3, %v2289_v56  ;;  %v6998_v56 = vld [vmem:[%s8156_s5 + $0x50] sm:$0xff] }
 0x309   : > { %8445 = vst [vmem:[#allocation28_spill] sm:$0xff] %v6998_v56 }
 0x30a   : > { %2657 = vrot.lane.b32.xlu1 %v6757_v18, %s5182_s19  ;;  %2659 = vrot.lane.b32.xlu0 %v6755_v34, %s5182_s19 }
 0x30e   : > { %2661 = vrot.lane.b32.xlu1 %v6763_v44, %s5182_s19  ;;  %2663 = vrot.lane.b32.xlu0 %v6765_v49, %s5182_s19 }
 0x312   : > { %2665 = vrot.lane.b32.xlu1 %v6773_v35, %s5182_s19  ;;  %2667 = vrot.lane.b32.xlu0 %v6771_v17, %s5182_s19 }
 0x316   : > { %2669 = vrot.lane.b32.xlu1 %v6780_v7, %s5182_s19  ;;  %2671 = vrot.lane.b32.xlu0 %v6782_v29, %s5182_s19 }
 0x31a   : > { %2673 = vrot.lane.b32.xlu1 %v6792_v8, %s5182_s19  ;;  %2675 = vrot.lane.b32.xlu0 %v6790_v59, %s5182_s19 }
 0x31e   : > { %2677 = vrot.lane.b32.xlu1 %v6800_v63, %s5182_s19  ;;  %2761 = vperm.xlu0 %5006, %v2535_v6  }
 0x322   : > { %2766 = vperm.xlu1 %5007, %v2536_v55   ;;  %2771 = vperm.xlu0 %5006, %v2537_v20   ;;  %v7007_v20 = vld [vmem:[%s8156_s5 + $0x58] sm:$0xff] }
 0x323   : > { %8446 = vst [vmem:[#allocation35_spill] sm:$0xff] %v7007_v20 }
 0x326   : > { %2776 = vperm.xlu1 %5007, %v2538_v10   ;;  %2781 = vperm.xlu0 %5006, %v2539_v23   ;;  %v7012_v10 = vld [vmem:[%s8156_s5 + $0x60] sm:$0xff] }
 0x327   : > { %8447 = vst [vmem:[#allocation52_spill] sm:$0xff] %v7012_v10 }
 0x32a   : > { %2786 = vperm.xlu1 %5007, %v2540_v4   ;;  %2791 = vperm.xlu0 %5006, %v2541_v62   ;;  %v7021_v62 = vld [vmem:[%s8156_s5 + $0x68] sm:$0xff] }
 0x32b   : > { %8448 = vst [vmem:[#allocation21_spill] sm:$0xff] %v7021_v62 }
 0x32e   : > { %2796 = vperm.xlu1 %5007, %v2542_v51   ;;  %2801 = vperm.xlu0 %5006, %v2543_v9   ;;  %v7026_v51 = vld [vmem:[%s8156_s5 + $0x70] sm:$0xff] }
 0x32f   : > { %8449 = vst [vmem:[#allocation32_spill] sm:$0xff] %v7026_v51 }
 0x332   : > { %2806 = vperm.xlu1 %5007, %v2544_v31   ;;  %2811 = vperm.xlu0 %5006, %v2545_v47   ;;  %v7035_v47 = vld [vmem:[%s8156_s5 + $0x78] sm:$0xff] }
 0x333   : > { %8450 = vst [vmem:[#allocation40_spill] sm:$0xff] %v7035_v47 }
 0x336   : > { %2816 = vperm.xlu1 %5007, %v2546_v15   ;;  %2821 = vperm.xlu0 %5006, %v2547_v28  }
 0x33a   : > { %2826 = vperm.xlu1 %5007, %v2548_v14   ;;  %2831 = vperm.xlu0 %5006, %v2549_v30  }
 0x33b   : > { %v2293_v45 = vpop.permute.xlu1 %2292 }
 0x33c   : > { %2328 = vst.msk [vmem:[#allocation2 + $0xf4] sm:$0xf] %vm1239_vm3, %v2293_v45 }
 0x33e   : > { %2836 = vperm.xlu1 %5007, %v2550_v37   ;;  %2935 = vrot.lane.b32.xlu0 %v6734_v16, %s5183_s20 }
 0x342   : > { %2937 = vrot.lane.b32.xlu1 %v6741_v27, %s5183_s20  ;;  %2939 = vrot.lane.b32.xlu0 %v6739_v2, %s5183_s20 }
 0x346   : > { %2941 = vrot.lane.b32.xlu1 %v6747_v5, %s5183_s20  ;;  %2943 = vrot.lane.b32.xlu0 %v6749_v43, %s5183_s20 }
 0x348   : > { %v2291_v21 = vpop.permute.xlu0 %2290 }
 0x349   : > { %2327 = vst.msk [vmem:[#allocation2 + $0xf0] sm:$0xf] %vm1239_vm3, %v2291_v21  ;;  %v7050_v21 = vld [vmem:[%s8157_s6] sm:$0xff] }
 0x34a   : > { %2945 = vrot.lane.b32.xlu1 %v6757_v18, %s5183_s20  ;;  %2947 = vrot.lane.b32.xlu0 %v6755_v34, %s5183_s20  ;;  %8451 = vst [vmem:[#allocation41_spill] sm:$0xff] %v7050_v21 }
 0x34c   : > { %v2295_v50 = vpop.permute.xlu0 %2294 }
 0x34d   : > { %2329 = vst.msk [vmem:[#allocation2 + $0xf8] sm:$0xf] %vm1239_vm3, %v2295_v50 }
 0x34e   : > { %2949 = vrot.lane.b32.xlu1 %v6763_v44, %s5183_s20  ;;  %2951 = vrot.lane.b32.xlu0 %v6765_v49, %s5183_s20 }
 0x350   : > { %v2297_v12 = vpop.permute.xlu1 %2296  ;;  %v6880_v19 = vpop.permute.xlu0 %2599 }
 0x351   : > { %8431 = vst [vmem:[#allocation20_spill] sm:$0xff] %v6880_v19  ;;  %2330 = vst.msk [vmem:[#allocation2 + $0xfc] sm:$0xf] %vm1239_vm3, %v2297_v12 }
 0x352   : > { %2953 = vrot.lane.b32.xlu1 %v6773_v35, %s5183_s20  ;;  %2955 = vrot.lane.b32.xlu0 %v6771_v17, %s5183_s20 }
 0x354   : > { %v6887_v38 = vpop.permute.xlu1 %2601  ;;  %v6889_v52 = vpop.permute.xlu0 %2603 }
 0x355   : > { %8432 = vst [vmem:[#allocation30_spill] sm:$0xff] %v6887_v38 }
 0x356   : > { %2957 = vrot.lane.b32.xlu1 %v6780_v7, %s5183_s20  ;;  %2959 = vrot.lane.b32.xlu0 %v6782_v29, %s5183_s20 }
 0x358   : > { %v6895_v41 = vpop.permute.xlu1 %2605  ;;  %v6897_v40 = vpop.permute.xlu0 %2607 }
 0x359   : > { %8433 = vst [vmem:[#allocation48_spill] sm:$0xff] %v6895_v41 }
 0x35a   : > { %2961 = vrot.lane.b32.xlu1 %v6792_v8, %s5183_s20  ;;  %2963 = vrot.lane.b32.xlu0 %v6790_v59, %s5183_s20  ;;  %v7067_v59 = vld [vmem:[%s8157_s6 + $0x10] sm:$0xff] }
 0x35b   : > { %8453 = vst [vmem:[#allocation39_spill] sm:$0xff] %v7067_v59 }
 0x35c   : > { %v6903_v0 = vpop.permute.xlu1 %2609  ;;  %v6905_v26 = vpop.permute.xlu0 %2611 }
 0x35e   : > { %2965 = vrot.lane.b32.xlu1 %v6800_v63, %s5183_s20  ;;  %3015 = vrot.lane.b32.xlu0 %v6910_v46, %s5178_s26  ;;  %v7060_v63 = vld [vmem:[%s8157_s6 + $0x8] sm:$0xff] }
 0x35f   : > { %8452 = vst [vmem:[#allocation38_spill] sm:$0xff] %v7060_v63 }
 0x360   : > { %v6916_v42 = vpop.permute.xlu1 %2613  ;;  %v6918_v39 = vpop.permute.xlu0 %2615 }
 0x362   : > { %3017 = vrot.lane.b32.xlu1 %v6923_v54, %s5178_s26  ;;  %3019 = vrot.lane.b32.xlu0 %v6928_v61, %s5178_s26 }
 0x364   : > { %v6934_v22 = vpop.permute.xlu1 %2617  ;;  %v6936_v60 = vpop.permute.xlu0 %2619 }
 0x366   : > { %3021 = vrot.lane.b32.xlu1 %v6941_v11, %s5178_s26  ;;  %3023 = vrot.lane.b32.xlu0 %v6946_v24, %s5178_s26 }
 0x368   : > { %v6952_v33 = vpop.permute.xlu1 %2621  ;;  %v6954_v53 = vpop.permute.xlu0 %2623 }
 0x36a   : > { %3025 = vrot.lane.b32.xlu1 %v6959_v57, %s5178_s26  ;;  %3027 = vrot.lane.b32.xlu0 %v6964_v25, %s5178_s26 }
 0x36c   : > { %v6970_v58 = vpop.permute.xlu1 %2625  ;;  %v6972_v13 = vpop.permute.xlu0 %2627 }
 0x36e   : > { %3029 = vrot.lane.b32.xlu1 %v6977_v48, %s5178_s26  ;;  %3031 = vrot.lane.b32.xlu0 %v6982_v3, %s5178_s26 }
 0x370   : > { %v6988_v1 = vpop.permute.xlu1 %2629  ;;  %v2648_v36 = vpop.permute.xlu0 %2647 }
 0x371   : > { %8443 = vst [vmem:[#allocation51_spill] sm:$0xff] %v6988_v1  ;;  %v2695_v50 = vsel %vm1014_vm2, %v6880_v19, %v2648_v36 }
 0x372   : > { %3033 = vrot.lane.b32.xlu1 %v6993_v32, %s5178_s26  ;;  %3035 = vrot.lane.b32.xlu0 %v6998_v56, %s5178_s26 }
 0x374   : > { %v2650_v6 = vpop.permute.xlu1 %2649  ;;  %v2652_v55 = vpop.permute.xlu0 %2651 }
 0x375   : > { %v2697_v36 = vsel %vm1014_vm2, %v6889_v52, %v2652_v55  ;;  %v7087_v55 = vld [vmem:[%s8157_s6 + $0x20] sm:$0xff] }
 0x376   : > { %3037 = vrot.lane.b32.xlu1 %v7007_v20, %s5178_s26  ;;  %3039 = vrot.lane.b32.xlu0 %v7012_v10, %s5178_s26  ;;  %8454 = vst [vmem:[#allocation44_spill] sm:$0xff] %v7087_v55 }
 0x378   : > { %v2654_v23 = vpop.permute.xlu1 %2653  ;;  %v2656_v4 = vpop.permute.xlu0 %2655 }
 0x37a   : > { %3041 = vrot.lane.b32.xlu1 %v7021_v62, %s5178_s26  ;;  %3043 = vrot.lane.b32.xlu0 %v7026_v51, %s5178_s26  ;;  %v2696_v51 = vsel %vm1014_vm2, %v6887_v38, %v2650_v6  ;;  %v2729_v62 = vmul.f32 %v2697_v36, %v7067_v59  ;;  %v7080_v6 = vld [vmem:[%s8157_s6 + $0x18] sm:$0xff]  ;;  %v2698_v38 = vsel %vm1014_vm2, %v6895_v41, %v2654_v23 }
 0x37b   : > { %v2730_v41 = vmul.f32 %v2698_v38, %v7080_v6 }
 0x37c   : > { %v2658_v9 = vpop.permute.xlu1 %2657  ;;  %v2660_v31 = vpop.permute.xlu0 %2659 }
 0x37e   : > { %3045 = vrot.lane.b32.xlu1 %v7035_v47, %s5178_s26  ;;  %v2727_v47 = vmul.f32 %v2695_v50, %v7050_v21  ;;  %v2711_v50 = vmul.f32 %v6910_v46, %v6734_v16  ;;  %v2728_v21 = vmul.f32 %v2696_v51, %v7060_v63  ;;  %v2699_v46 = vsel %vm1014_vm2, %v6897_v40, %v2656_v4  ;;  %v7105_v4 = vld [vmem:[%s8157_s6 + $0x28] sm:$0xff] }
 0x37f   : > { %v2712_v51 = vmul.f32 %v6923_v54, %v6741_v27  ;;  %v2731_v59 = vmul.f32 %v2699_v46, %v7087_v55  ;;  %8456 = vst [vmem:[#allocation46_spill] sm:$0xff] %v7105_v4  ;;  %v2700_v54 = vsel %vm1014_vm2, %v6903_v0, %v2658_v9  ;;  %v2714_v46 = vmul.f32 %v6941_v11, %v6747_v5 }
 0x380   : > { %v2662_v15 = vpop.permute.xlu1 %2661  ;;  %v2664_v28 = vpop.permute.xlu0 %2663  ;;  %v2743_v1 = vadd.f32 %v2727_v47, %v2711_v50  ;;  %v2713_v50 = vmul.f32 %v6928_v61, %v6739_v2  ;;  %v7112_v61 = vld [vmem:[%s8157_s6 + $0x30] sm:$0xff] }
 0x381   : > { %v2744_v16 = vadd.f32 %v2728_v21, %v2712_v51  ;;  %8457 = vst [vmem:[#allocation42_spill] sm:$0xff] %v7112_v61  ;;  %v2702_v11 = vsel %vm1014_vm2, %v6916_v42, %v2662_v15 }
 0x382   : > { %v2745_v63 = vadd.f32 %v2729_v62, %v2713_v50  ;;  %v2715_v62 = vmul.f32 %v6946_v24, %v6749_v43  ;;  %v7132_v24 = vld [vmem:[%s8157_s6 + $0x38] sm:$0xff] }
 0x383   : > { %8459 = vst [vmem:[#allocation43_spill] sm:$0xff] %v7132_v24 }
 0x384   : > { %v7039_v14 = vpop.permute.xlu1 %2665  ;;  %v7041_v30 = vpop.permute.xlu0 %2667  ;;  %v2747_v2 = vadd.f32 %v2731_v59, %v2715_v62  ;;  %v2703_v59 = vsel %vm1014_vm2, %v6918_v39, %v2664_v28 }
 0x388   : > { %v7043_v45 = vpop.permute.xlu1 %2669  ;;  %v7045_v37 = vpop.permute.xlu0 %2671 }
 0x38c   : > { %v7054_v12 = vpop.permute.xlu1 %2673  ;;  %v7071_v19 = vpop.permute.xlu0 %2675 }
 0x390   : > { %v7093_v47 = vpop.permute.xlu1 %2677 }
 0x399   : > { %v7095_v36 = vpop.permute.xlu0 %2761 }
 0x39a   : > { %8455 = vst [vmem:[#allocation45_spill] sm:$0xff] %v7095_v36  ;;  %v2839_v23 = vmul.f32 %v7095_v36, %v2743_v1  ;;  %v2701_v1 = vsel %vm1014_vm2, %v6905_v26, %v2660_v31  ;;  %v2746_v36 = vadd.f32 %v2730_v41, %v2714_v46  ;;  %v2732_v31 = vmul.f32 %v2700_v54, %v7105_v4 }
 0x39b   : > { %v2716_v54 = vmul.f32 %v6959_v57, %v6757_v18 }
 0x39c   : > { %v4714_v38 = vpack.c.bf16 %v2839_v23, %v2839_v23  ;;  %v2733_v23 = vmul.f32 %v2701_v1, %v7112_v61  ;;  %v2717_v1 = vmul.f32 %v6964_v25, %v6755_v34  ;;  %v7160_v25 = vld [vmem:[%s8157_s6 + $0x48] sm:$0xff] }
 0x39d   : > { %v7120_v21 = vpop.permute.xlu1 %2766  ;;  %v7122_v51 = vpop.permute.xlu0 %2771  ;;  %v2748_v62 = vadd.f32 %v2732_v31, %v2716_v54  ;;  %8461 = vst [vmem:[#allocation60_spill] sm:$0xff] %v7160_v25 }
 0x39e   : > { %8458 = vst [vmem:[#allocation53_spill] sm:$0xff] %v7120_v21  ;;  %2919 = vst.msk [vmem:[#allocation3] sm:$0xf] %vm1239_vm3, %v4714_v38  ;;  %v2840_v9 = vmul.f32 %v7120_v21, %v2744_v16  ;;  %v2841_v50 = vmul.f32 %v7122_v51, %v2745_v63  ;;  %v7139_v16 = vld [vmem:[%s8157_s6 + $0x40] sm:$0xff] }
 0x39f   : > { %8460 = vst [vmem:[#allocation59_spill] sm:$0xff] %v7139_v16  ;;  %v2735_v57 = vmul.f32 %v2703_v59, %v7139_v16 }
 0x3a0   : > { %v4715_v63 = vpack.c.bf16 %v2840_v9, %v2840_v9  ;;  %v4716_v41 = vpack.c.bf16 %v2841_v50, %v2841_v50  ;;  %v2749_v9 = vadd.f32 %v2733_v23, %v2717_v1  ;;  %v2734_v50 = vmul.f32 %v2702_v11, %v7132_v24 }
 0x3a1   : > { %v7147_v38 = vpop.permute.xlu1 %2776  ;;  %v7149_v46 = vpop.permute.xlu0 %2781  ;;  %v2718_v23 = vmul.f32 %v6977_v48, %v6763_v44  ;;  %v7190_v44 = vld [vmem:[%s8157_s6 + $0x58] sm:$0xff] }
 0x3a2   : > { %2920 = vst.msk [vmem:[#allocation3 + $0x4] sm:$0xf] %vm1239_vm3, %v4715_v63  ;;  %2921 = vst.msk [vmem:[#allocation3 + $0x8] sm:$0xf] %vm1239_vm3, %v4716_v41  ;;  %v2842_v15 = vmul.f32 %v7147_v38, %v2746_v36  ;;  %v2843_v28 = vmul.f32 %v7149_v46, %v2747_v2  ;;  %v2704_v63 = vsel %vm1014_vm2, %v6934_v22, %v7039_v14  ;;  %v7168_v36 = vld [vmem:[%s8157_s6 + $0x50] sm:$0xff] }
 0x3a3   : > { %8462 = vst [vmem:[#allocation26_spill] sm:$0xff] %v7168_v36  ;;  %v2705_v2 = vsel %vm1014_vm2, %v6936_v60, %v7041_v30  ;;  %v2719_v14 = vmul.f32 %v6982_v3, %v6765_v49  ;;  %v2750_v1 = vadd.f32 %v2734_v50, %v2718_v23  ;;  %8463 = vst [vmem:[#allocation57_spill] sm:$0xff] %v7190_v44 }
 0x3a4   : > { %v4717_v11 = vpack.c.bf16 %v2842_v15, %v2842_v15  ;;  %v4718_v31 = vpack.c.bf16 %v2843_v28, %v2843_v28  ;;  %v2736_v15 = vmul.f32 %v2704_v63, %v7160_v25  ;;  %v2737_v28 = vmul.f32 %v2705_v2, %v7168_v36 }
 0x3a5   : > { %v7175_v59 = vpop.permute.xlu1 %2786  ;;  %v7177_v41 = vpop.permute.xlu0 %2791  ;;  %v2751_v48 = vadd.f32 %v2735_v57, %v2719_v14  ;;  %v7202_v57 = vld [vmem:[%s8157_s6 + $0x60] sm:$0xff]  ;;  %v2707_v50 = vsel %vm1014_vm2, %v6954_v53, %v7045_v37  ;;  %v7220_v37 = vld [vmem:[%s8157_s6 + $0x68] sm:$0xff] }
 0x3a6   : > { %2922 = vst.msk [vmem:[#allocation3 + $0xc] sm:$0xf] %vm1239_vm3, %v4717_v11  ;;  %2923 = vst.msk [vmem:[#allocation3 + $0x10] sm:$0xf] %vm1239_vm3, %v4718_v31  ;;  %v2844_v54 = vmul.f32 %v7175_v59, %v2748_v62  ;;  %v2845_v30 = vmul.f32 %v7177_v41, %v2749_v9  ;;  %v2706_v11 = vsel %vm1014_vm2, %v6952_v33, %v7043_v45 }
 0x3a7   : > { %v2720_v62 = vmul.f32 %v6993_v32, %v6773_v35  ;;  %v2721_v9 = vmul.f32 %v6998_v56, %v6771_v17  ;;  %8464 = vst [vmem:[#allocation56_spill] sm:$0xff] %v7202_v57  ;;  %v2739_v56 = vmul.f32 %v2707_v50, %v7202_v57  ;;  %8467 = vst [vmem:[#allocation55_spill] sm:$0xff] %v7220_v37 }
 0x3a8   : > { %v4719_v31 = vpack.c.bf16 %v2844_v54, %v2844_v54  ;;  %v4720_v3 = vpack.c.bf16 %v2845_v30, %v2845_v30  ;;  %v2738_v30 = vmul.f32 %v2706_v11, %v7190_v44 }
 0x3a9   : > { %v7207_v63 = vpop.permute.xlu1 %2796  ;;  %v7209_v45 = vpop.permute.xlu0 %2801  ;;  %v2752_v14 = vadd.f32 %v2736_v15, %v2720_v62  ;;  %v2753_v54 = vadd.f32 %v2737_v28, %v2721_v9  ;;  %v2709_v15 = vsel %vm1014_vm2, %v6972_v13, %v7071_v19 }
 0x3aa   : > { %8465 = vst [vmem:[#allocation54_spill] sm:$0xff] %v7207_v63  ;;  %8466 = vst [vmem:[#allocation58_spill] sm:$0xff] %v7209_v45  ;;  %v2846_v2 = vmul.f32 %v7207_v63, %v2750_v1  ;;  %v2847_v23 = vmul.f32 %v7209_v45, %v2751_v48  ;;  %v2722_v48 = vmul.f32 %v7007_v20, %v6780_v7  ;;  %v7230_v1 = vld [vmem:[%s8157_s6 + $0x70] sm:$0xff]  ;;  %v8471_v45 = vld [vmem:[#allocation21_spill] sm:$0xff] }
 0x3ab   : > { %2924 = vst.msk [vmem:[#allocation3 + $0x14] sm:$0xf] %vm1239_vm3, %v4719_v31  ;;  %2925 = vst.msk [vmem:[#allocation3 + $0x18] sm:$0xf] %vm1239_vm3, %v4720_v3  ;;  %v2708_v31 = vsel %vm1014_vm2, %v6970_v58, %v7054_v12  ;;  %v2723_v12 = vmul.f32 %v7012_v10, %v6782_v29  ;;  %v2741_v19 = vmul.f32 %v2709_v15, %v7230_v1 }
 0x3ac   : > { %v4721_v3 = vpack.c.bf16 %v2846_v2, %v2846_v2  ;;  %v4722_v32 = vpack.c.bf16 %v2847_v23, %v2847_v23  ;;  %8468 = vst [vmem:[#allocation61_spill] sm:$0xff] %v7230_v1  ;;  %v2754_v50 = vadd.f32 %v2738_v30, %v2722_v48  ;;  %v2740_v2 = vmul.f32 %v2708_v31, %v7220_v37  ;;  %v8477_v31 = vld [vmem:[#allocation32_spill] sm:$0xff] }
 0x3ad   : > { %v7235_v28 = vpop.permute.xlu1 %2806  ;;  %v7237_v11 = vpop.permute.xlu0 %2811  ;;  %v2755_v23 = vadd.f32 %v2739_v56, %v2723_v12  ;;  %v2724_v63 = vmul.f32 %v8471_v45, %v6792_v8  ;;  %v8476_v56 = vld [vmem:[#allocation29_spill] sm:$0xff] }
 0x3ae   : > { %8469 = vst [vmem:[#allocation62_spill] sm:$0xff] %v7235_v28  ;;  %8470 = vst [vmem:[#allocation63_spill] sm:$0xff] %v7237_v11  ;;  %v2848_v62 = vmul.f32 %v7235_v28, %v2752_v14  ;;  %v2849_v9 = vmul.f32 %v7237_v11, %v2753_v54  ;;  %v2725_v48 = vmul.f32 %v8477_v31, %v8476_v56  ;;  %v8480_v28 = vld [vmem:[#allocation14_spill] sm:$0xff]  ;;  %v8481_v31 = vld [vmem:[#allocation40_spill] sm:$0xff] }
 0x3af   : > { %2926 = vst.msk [vmem:[#allocation3 + $0x1c] sm:$0xf] %vm1239_vm3, %v4721_v3  ;;  %2927 = vst.msk [vmem:[#allocation3 + $0x20] sm:$0xf] %vm1239_vm3, %v4722_v32  ;;  %v7252_v3 = vld [vmem:[%s8157_s6 + $0x78] sm:$0xff]  ;;  %v8473_v32 = vld [vmem:[#allocation51_spill] sm:$0xff]  ;;  %v2726_v56 = vmul.f32 %v8481_v31, %v8480_v28 }
 0x3b0   : > { %v4723_v20 = vpack.c.bf16 %v2848_v62, %v2848_v62  ;;  %v4724_v7 = vpack.c.bf16 %v2849_v9, %v2849_v9  ;;  %8472 = vst [vmem:[#allocation64_spill] sm:$0xff] %v7252_v3  ;;  %v2710_v14 = vsel %vm1014_vm2, %v8473_v32, %v7093_v47  ;;  %v2756_v62 = vadd.f32 %v2740_v2, %v2724_v63 }
 0x3b1   : > { %v7257_v54 = vpop.permute.xlu1 %2816  ;;  %v7259_v30 = vpop.permute.xlu0 %2821  ;;  %v2757_v9 = vadd.f32 %v2741_v19, %v2725_v48  ;;  %v2742_v45 = vmul.f32 %v2710_v14, %v7252_v3  ;;  %v8483_v48 = vld [vmem:[#allocation20_spill] sm:$0xff] }
 0x3b2   : > { %8474 = vst [vmem:[#allocation51_spill] sm:$0xff] %v7257_v54  ;;  %8475 = vst [vmem:[#allocation65_spill] sm:$0xff] %v7259_v30  ;;  %v2850_v15 = vmul.f32 %v7257_v54, %v2754_v50  ;;  %v2851_v12 = vmul.f32 %v7259_v30, %v2755_v23 }
 0x3b3   : > { %2928 = vst.msk [vmem:[#allocation3 + $0x24] sm:$0xf] %vm1239_vm3, %v4723_v20  ;;  %2929 = vst.msk [vmem:[#allocation3 + $0x28] sm:$0xf] %vm1239_vm3, %v4724_v7  ;;  %v2758_v63 = vadd.f32 %v2742_v45, %v2726_v56 }
 0x3b4   : > { %v4725_v47 = vpack.c.bf16 %v2850_v15, %v2850_v15  ;;  %v4726_v10 = vpack.c.bf16 %v2851_v12, %v2851_v12  ;;  %v8484_v15 = vld [vmem:[#allocation41_spill] sm:$0xff] }
 0x3b5   : > { %v7268_v8 = vpop.permute.xlu1 %2826  ;;  %v7270_v11 = vpop.permute.xlu0 %2831 }
 0x3b6   : > { %8478 = vst [vmem:[#allocation66_spill] sm:$0xff] %v7268_v8  ;;  %8479 = vst [vmem:[#allocation67_spill] sm:$0xff] %v7270_v11  ;;  %v2852_v7 = vmul.f32 %v7268_v8, %v2756_v62  ;;  %v2853_v20 = vmul.f32 %v7270_v11, %v2757_v9  ;;  %v8485_v9 = vld [vmem:[#allocation30_spill] sm:$0xff] }
 0x3b7   : > { %2930 = vst.msk [vmem:[#allocation3 + $0x2c] sm:$0xf] %vm1239_vm3, %v4725_v47  ;;  %2931 = vst.msk [vmem:[#allocation3 + $0x30] sm:$0xf] %vm1239_vm3, %v4726_v10 }
 0x3b8   : > { %v4727_v50 = vpack.c.bf16 %v2852_v7, %v2852_v7  ;;  %v4728_v2 = vpack.c.bf16 %v2853_v20, %v2853_v20  ;;  %v8486_v20 = vld [vmem:[#allocation38_spill] sm:$0xff] }
 0x3b9   : > { %v7278_v23 = vpop.permute.xlu1 %2836  ;;  %v7280_v19 = vpop.permute.xlu0 %2935 }
 0x3ba   : > { %8482 = vst [vmem:[#allocation40_spill] sm:$0xff] %v7278_v23  ;;  %2932 = vst.msk [vmem:[#allocation3 + $0x34] sm:$0xf] %vm1239_vm3, %v4727_v50  ;;  %v2854_v14 = vmul.f32 %v7278_v23, %v2758_v63  ;;  %v2983_v10 = vsel %vm1014_vm2, %v7280_v19, %v8483_v48  ;;  %v8487_v50 = vld [vmem:[#allocation39_spill] sm:$0xff] }
 0x3bb   : > { %2933 = vst.msk [vmem:[#allocation3 + $0x38] sm:$0xf] %vm1239_vm3, %v4728_v2  ;;  %v3079_v12 = vmul.f32 %v2983_v10, %v8484_v15  ;;  %v8488_v10 = vld [vmem:[#allocation48_spill] sm:$0xff] }
 0x3bc   : > { %v4729_v62 = vpack.c.bf16 %v2854_v14, %v2854_v14 }
 0x3bd   : > { %v7289_v45 = vpop.permute.xlu1 %2937  ;;  %3111 = vrot.lane.b32.xlu0 %v3079_v12, %s5178_s26  ;;  %v7292_v56 = vpop.permute.xlu0 %2939 }
 0x3be   : > { %2934 = vst.msk [vmem:[#allocation3 + $0x3c] sm:$0xf] %vm1239_vm3, %v4729_v62  ;;  %v2984_v47 = vsel %vm1014_vm2, %v7289_v45, %v8485_v9  ;;  %v2985_v7 = vsel %vm1014_vm2, %v7292_v56, %v6889_v52 }
 0x3bf   : > { %v3080_v63 = vmul.f32 %v2984_v47, %v8486_v20  ;;  %v3081_v2 = vmul.f32 %v2985_v7, %v8487_v50 }
 0x3c1   : > { %3113 = vrot.lane.b32.xlu1 %v3080_v63, %s5178_s26  ;;  %v7304_v14 = vpop.permute.xlu1 %2941  ;;  %3115 = vrot.lane.b32.xlu0 %v3081_v2, %s5178_s26  ;;  %v7307_v48 = vpop.permute.xlu0 %2943 }
 0x3c2   : > { %v2986_v12 = vsel %vm1014_vm2, %v7304_v14, %v8488_v10  ;;  %v2987_v52 = vsel %vm1014_vm2, %v7307_v48, %v6897_v40 }
 0x3c3   : > { %v3082_v62 = vmul.f32 %v2986_v12, %v7080_v6  ;;  %v3083_v9 = vmul.f32 %v2987_v52, %v7087_v55 }
 0x3c5   : > { %3117 = vrot.lane.b32.xlu1 %v3082_v62, %s5178_s26  ;;  %v7318_v47 = vpop.permute.xlu1 %2945  ;;  %3119 = vrot.lane.b32.xlu0 %v3083_v9, %s5178_s26  ;;  %v7321_v7 = vpop.permute.xlu0 %2947 }
 0x3c6   : > { %8489 = vst [vmem:[#allocation20_spill] sm:$0xff] %v7318_v47  ;;  %8490 = vst [vmem:[#allocation41_spill] sm:$0xff] %v7321_v7  ;;  %v2988_v63 = vsel %vm1014_vm2, %v7318_v47, %v6903_v0  ;;  %v2989_v40 = vsel %vm1014_vm2, %v7321_v7, %v6905_v26 }
 0x3c7   : > { %v3084_v2 = vmul.f32 %v2988_v63, %v7105_v4  ;;  %v3085_v10 = vmul.f32 %v2989_v40, %v7112_v61 }
 0x3c9   : > { %3121 = vrot.lane.b32.xlu1 %v3084_v2, %s5178_s26  ;;  %v7332_v12 = vpop.permute.xlu1 %2949  ;;  %3123 = vrot.lane.b32.xlu0 %v3085_v10, %s5178_s26  ;;  %v7335_v52 = vpop.permute.xlu0 %2951 }
 0x3ca   : > { %8491 = vst [vmem:[#allocation30_spill] sm:$0xff] %v7332_v12  ;;  %8492 = vst [vmem:[#allocation38_spill] sm:$0xff] %v7335_v52  ;;  %v2990_v0 = vsel %vm1014_vm2, %v7332_v12, %v6916_v42  ;;  %v2991_v26 = vsel %vm1014_vm2, %v7335_v52, %v6918_v39 }
 0x3cb   : > { %v3086_v62 = vmul.f32 %v2990_v0, %v7132_v24  ;;  %v3087_v9 = vmul.f32 %v2991_v26, %v7139_v16 }
 0x3cd   : > { %3125 = vrot.lane.b32.xlu1 %v3086_v62, %s5178_s26  ;;  %v7346_v63 = vpop.permute.xlu1 %2953  ;;  %3127 = vrot.lane.b32.xlu0 %v3087_v9, %s5178_s26  ;;  %v7349_v40 = vpop.permute.xlu0 %2955 }
 0x3ce   : > { %8493 = vst [vmem:[#allocation39_spill] sm:$0xff] %v7346_v63  ;;  %8494 = vst [vmem:[#allocation48_spill] sm:$0xff] %v7349_v40  ;;  %v2992_v42 = vsel %vm1014_vm2, %v7346_v63, %v6934_v22  ;;  %v2993_v39 = vsel %vm1014_vm2, %v7349_v40, %v6936_v60  ;;  %v8502_v63 = vld [vmem:[#allocation45_spill] sm:$0xff] }
 0x3cf   : > { %v3088_v2 = vmul.f32 %v2992_v42, %v7160_v25  ;;  %v3089_v10 = vmul.f32 %v2993_v39, %v7168_v36  ;;  %v8501_v25 = vld [vmem:[#allocation49_spill] sm:$0xff] }
 0x3d1   : > { %3129 = vrot.lane.b32.xlu1 %v3088_v2, %s5178_s26  ;;  %v7360_v0 = vpop.permute.xlu1 %2957  ;;  %3131 = vrot.lane.b32.xlu0 %v3089_v10, %s5178_s26  ;;  %v7363_v26 = vpop.permute.xlu0 %2959 }
 0x3d2   : > { %8495 = vst [vmem:[#allocation68_spill] sm:$0xff] %v7360_v0  ;;  %8496 = vst [vmem:[#allocation69_spill] sm:$0xff] %v7363_v26  ;;  %v2994_v22 = vsel %vm1014_vm2, %v7360_v0, %v6952_v33  ;;  %v2995_v60 = vsel %vm1014_vm2, %v7363_v26, %v6954_v53 }
 0x3d3   : > { %v3090_v62 = vmul.f32 %v2994_v22, %v7190_v44  ;;  %v3091_v9 = vmul.f32 %v2995_v60, %v7202_v57 }
 0x3d5   : > { %3133 = vrot.lane.b32.xlu1 %v3090_v62, %s5178_s26  ;;  %v7374_v42 = vpop.permute.xlu1 %2961  ;;  %3135 = vrot.lane.b32.xlu0 %v3091_v9, %s5178_s26  ;;  %v7377_v39 = vpop.permute.xlu0 %2963 }
 0x3d6   : > { %8497 = vst [vmem:[#allocation70_spill] sm:$0xff] %v7374_v42  ;;  %8498 = vst [vmem:[#allocation71_spill] sm:$0xff] %v7377_v39  ;;  %v2996_v33 = vsel %vm1014_vm2, %v7374_v42, %v6970_v58  ;;  %v2997_v53 = vsel %vm1014_vm2, %v7377_v39, %v6972_v13 }
 0x3d7   : > { %v3092_v2 = vmul.f32 %v2996_v33, %v7220_v37  ;;  %v3093_v10 = vmul.f32 %v2997_v53, %v7230_v1 }
 0x3d9   : > { %3137 = vrot.lane.b32.xlu1 %v3092_v2, %s5178_s26  ;;  %v7388_v22 = vpop.permute.xlu1 %2965  ;;  %3139 = vrot.lane.b32.xlu0 %v3093_v10, %s5178_s26  ;;  %v3016_v62 = vpop.permute.xlu0 %3015 }
 0x3da   : > { %8499 = vst [vmem:[#allocation72_spill] sm:$0xff] %v7388_v22  ;;  %v2998_v60 = vsel %vm1014_vm2, %v7388_v22, %v8473_v32 }
 0x3db   : > { %v3094_v58 = vmul.f32 %v2998_v60, %v7252_v3 }
 0x3dd   : > { %3141 = vrot.lane.b32.xlu1 %v3094_v58, %s5178_s26  ;;  %v3018_v13 = vpop.permute.xlu1 %3017  ;;  %v3020_v9 = vpop.permute.xlu0 %3019  ;;  %v8500_v58 = vld [vmem:[#allocation31_spill] sm:$0xff]  ;;  %s8511_s26 = smov 32  }
 0x3de   : > { %v3063_v3 = vmul.f32 %v3016_v62, %v8500_v58  ;;  %v3064_v36 = vmul.f32 %v3018_v13, %v6741_v27  ;;  %v3065_v40 = vmul.f32 %v3020_v9, %v8501_v25 }
 0x3e1   : > { %v3022_v33 = vpop.permute.xlu1 %3021  ;;  %v3024_v37 = vpop.permute.xlu0 %3023 }
 0x3e2   : > { %v3066_v7 = vmul.f32 %v3022_v33, %v6747_v5  ;;  %v3067_v47 = vmul.f32 %v3024_v37, %v6749_v43 }
 0x3e5   : > { %v3026_v53 = vpop.permute.xlu1 %3025  ;;  %v3028_v1 = vpop.permute.xlu0 %3027 }
 0x3e9   : > { %v3030_v2 = vpop.permute.xlu1 %3029  ;;  %v3032_v39 = vpop.permute.xlu0 %3031 }
 0x3ea   : > { %v3071_v33 = vmul.f32 %v3032_v39, %v6765_v49 }
 0x3ed   : > { %v3034_v42 = vpop.permute.xlu1 %3033  ;;  %v3036_v57 = vpop.permute.xlu0 %3035 }
 0x3f1   : > { %v7396_v10 = vpop.permute.xlu1 %3037  ;;  %v7398_v44 = vpop.permute.xlu0 %3039 }
 0x3f5   : > { %v7400_v32 = vpop.permute.xlu1 %3041  ;;  %v7402_v60 = vpop.permute.xlu0 %3043 }
 0x3f9   : > { %v7405_v22 = vpop.permute.xlu1 %3045 }
 0x42f   : > { %v3112_v26 = vpop.permute.xlu0 %3111 }
 0x430   : > { %v3159_v0 = vadd.f32 %v3112_v26, %v3063_v3 }
 0x432   : > { %v3175_v16 = vmul.f32 %v3159_v0, %v8502_v63 }
 0x433   : > { %v3114_v24 = vpop.permute.xlu1 %3113  ;;  %v3116_v52 = vpop.permute.xlu0 %3115 }
 0x434   : > { %v4730_v12 = vpack.c.bf16 %v3175_v16, %v3175_v16  ;;  %v3160_v61 = vadd.f32 %v3114_v24, %v3064_v36  ;;  %v3161_v4 = vadd.f32 %v3116_v52, %v3065_v40  ;;  %v3068_v16 = vmul.f32 %v3026_v53, %v6757_v18 }
 0x435   : > { %v3069_v24 = vmul.f32 %v3028_v1, %v6755_v34 }
 0x436   : > { %v3176_v62 = vmul.f32 %v3160_v61, %v7120_v21  ;;  %v3177_v55 = vmul.f32 %v3161_v4, %v7122_v51  ;;  %3239 = vrot.lane.b32.xlu0 %v4730_v12, %s5187_s29 }
 0x437   : > { %v3118_v3 = vpop.permute.xlu1 %3117  ;;  %v3120_v26 = vpop.permute.xlu0 %3119 }
 0x438   : > { %v4731_v13 = vpack.c.bf16 %v3176_v62, %v3176_v62  ;;  %v4732_v9 = vpack.c.bf16 %v3177_v55, %v3177_v55  ;;  %v3162_v0 = vadd.f32 %v3118_v3, %v3066_v7  ;;  %v3163_v63 = vadd.f32 %v3120_v26, %v3067_v47  ;;  %v8503_v7 = vld [vmem:[#allocation33_spill] sm:$0xff] }
 0x439   : > { %v3070_v47 = vmul.f32 %v3030_v2, %v8503_v7  ;;  %v3073_v2 = vmul.f32 %v3036_v57, %v6771_v17  ;;  %v3075_v57 = vmul.f32 %v7398_v44, %v6782_v29 }
 0x43a   : > { %v3178_v36 = vmul.f32 %v3162_v0, %v7147_v38  ;;  %v3179_v37 = vmul.f32 %v3163_v63, %v7149_v46  ;;  %3241 = vrot.lane.b32.xlu1 %v4731_v13, %s5187_s29  ;;  %3243 = vrot.lane.b32.xlu0 %v4732_v9, %s5187_s29  ;;  %v3072_v0 = vmul.f32 %v3034_v42, %v6773_v35  ;;  %v8507_v42 = vld [vmem:[#allocation62_spill] sm:$0xff] }
 0x43b   : > { %v3122_v61 = vpop.permute.xlu1 %3121  ;;  %v3124_v4 = vpop.permute.xlu0 %3123 }
 0x43c   : > { %v4733_v12 = vpack.c.bf16 %v3178_v36, %v3178_v36  ;;  %v4734_v52 = vpack.c.bf16 %v3179_v37, %v3179_v37  ;;  %v3164_v40 = vadd.f32 %v3122_v61, %v3068_v16  ;;  %v3165_v55 = vadd.f32 %v3124_v4, %v3069_v24  ;;  %v8504_v16 = vld [vmem:[#allocation54_spill] sm:$0xff] }
 0x43d   : > { %v8505_v24 = vld [vmem:[#allocation58_spill] sm:$0xff] }
 0x43e   : > { %v3180_v1 = vmul.f32 %v3164_v40, %v7175_v59  ;;  %v3181_v53 = vmul.f32 %v3165_v55, %v7177_v41  ;;  %3245 = vrot.lane.b32.xlu1 %v4733_v12, %s5187_s29  ;;  %3247 = vrot.lane.b32.xlu0 %v4734_v52, %s5187_s29  ;;  %v8506_v55 = vld [vmem:[#allocation17_spill] sm:$0xff] }
 0x43f   : > { %v3126_v63 = vpop.permute.xlu1 %3125  ;;  %v3128_v62 = vpop.permute.xlu0 %3127 }
 0x440   : > { %v4735_v3 = vpack.c.bf16 %v3180_v1, %v3180_v1  ;;  %v4736_v26 = vpack.c.bf16 %v3181_v53, %v3181_v53  ;;  %v3166_v13 = vadd.f32 %v3126_v63, %v3070_v47  ;;  %v3167_v9 = vadd.f32 %v3128_v62, %v3071_v33  ;;  %v8508_v1 = vld [vmem:[#allocation63_spill] sm:$0xff] }
 0x441   : > { %v3074_v47 = vmul.f32 %v7396_v10, %v8506_v55 }
 0x442   : > { %v3182_v39 = vmul.f32 %v3166_v13, %v8504_v16  ;;  %v3183_v36 = vmul.f32 %v3167_v9, %v8505_v24  ;;  %3249 = vrot.lane.b32.xlu1 %v4735_v3, %s5187_s29  ;;  %3251 = vrot.lane.b32.xlu0 %v4736_v26, %s5187_s29  ;;  %v8558_v24 = vld [vmem:[#allocation45_spill] sm:$0xff] }
 0x443   : > { %v3130_v37 = vpop.permute.xlu1 %3129  ;;  %v3132_v61 = vpop.permute.xlu0 %3131 }
 0x444   : > { %v4737_v4 = vpack.c.bf16 %v3182_v39, %v3182_v39  ;;  %v4738_v12 = vpack.c.bf16 %v3183_v36, %v3183_v36  ;;  %v3168_v52 = vadd.f32 %v3130_v37, %v3072_v0  ;;  %v3169_v40 = vadd.f32 %v3132_v61, %v3073_v2  ;;  %v8509_v0 = vld [vmem:[#allocation47_spill] sm:$0xff]  ;;  %v8510_v2 = vld [vmem:[#allocation29_spill] sm:$0xff] }
 0x445   : > { %v3076_v10 = vmul.f32 %v7400_v32, %v8509_v0  ;;  %v3077_v44 = vmul.f32 %v7402_v60, %v8510_v2  ;;  %v3078_v32 = vmul.f32 %v7405_v22, %v8480_v28  ;;  %v8512_v22 = vld [vmem:[#allocation15_spill] sm:$0xff] }
 0x446   : > { %v3184_v33 = vmul.f32 %v3168_v52, %v8507_v42  ;;  %v3185_v53 = vmul.f32 %v3169_v40, %v8508_v1  ;;  %3253 = vrot.lane.b32.xlu1 %v4737_v4, %s5187_s29  ;;  %3255 = vrot.lane.b32.xlu0 %v4738_v12, %s5187_s29 }
 0x447   : > { %v3134_v63 = vpop.permute.xlu1 %3133  ;;  %v3136_v62 = vpop.permute.xlu0 %3135 }
 0x448   : > { %v4739_v3 = vpack.c.bf16 %v3184_v33, %v3184_v33  ;;  %v4740_v26 = vpack.c.bf16 %v3185_v53, %v3185_v53  ;;  %v3170_v13 = vadd.f32 %v3134_v63, %v3074_v47  ;;  %v3171_v9 = vadd.f32 %v3136_v62, %v3075_v57 }
 0x44a   : > { %v3186_v39 = vmul.f32 %v3170_v13, %v7257_v54  ;;  %v3187_v36 = vmul.f32 %v3171_v9, %v7259_v30  ;;  %3257 = vrot.lane.b32.xlu1 %v4739_v3, %s5187_s29  ;;  %3259 = vrot.lane.b32.xlu0 %v4740_v26, %s5187_s29  ;;  %v8513_v26 = vld [vmem:[#allocation24_spill] sm:$0xff]  ;;  %v8515_v9 = vld [vmem:[#allocation22_spill] sm:$0xff] }
 0x44b   : > { %v3138_v37 = vpop.permute.xlu1 %3137  ;;  %v3140_v61 = vpop.permute.xlu0 %3139  ;;  %v8514_v13 = vld [vmem:[#allocation36_spill] sm:$0xff] }
 0x44c   : > { %v4741_v4 = vpack.c.bf16 %v3186_v39, %v3186_v39  ;;  %v4742_v12 = vpack.c.bf16 %v3187_v36, %v3187_v36  ;;  %v3172_v52 = vadd.f32 %v3138_v37, %v3076_v10  ;;  %v3173_v40 = vadd.f32 %v3140_v61, %v3077_v44  ;;  %v8516_v10 = vld [vmem:[#allocation25_spill] sm:$0xff]  ;;  %v8518_v39 = vld [vmem:[#allocation23_spill] sm:$0xff]  ;;  %v8520_v37 = vld [vmem:[#allocation34_spill] sm:$0xff] }
 0x44d   : > { %v8517_v44 = vld [vmem:[#allocation37_spill] sm:$0xff]  ;;  %v8519_v36 = vld [vmem:[#allocation27_spill] sm:$0xff] }
 0x44e   : > { %v3188_v47 = vmul.f32 %v3172_v52, %v7268_v8  ;;  %v3189_v60 = vmul.f32 %v3173_v40, %v7270_v11  ;;  %3261 = vrot.lane.b32.xlu1 %v4741_v4, %s5187_s29  ;;  %3263 = vrot.lane.b32.xlu0 %v4742_v12, %s5187_s29  ;;  %v8521_v61 = vld [vmem:[#allocation19_spill] sm:$0xff]  ;;  %v8522_v4 = vld [vmem:[#allocation28_spill] sm:$0xff]  ;;  %v8525_v40 = vld [vmem:[#allocation21_spill] sm:$0xff] }
 0x44f   : > { %v3142_v57 = vpop.permute.xlu1 %3141  ;;  %v8523_v12 = vld [vmem:[#allocation35_spill] sm:$0xff]  ;;  %v8524_v52 = vld [vmem:[#allocation52_spill] sm:$0xff] }
 0x450   : > { %v4743_v33 = vpack.c.bf16 %v3188_v47, %v3188_v47  ;;  %v4744_v53 = vpack.c.bf16 %v3189_v60, %v3189_v60  ;;  %v3174_v63 = vadd.f32 %v3142_v57, %v3078_v32  ;;  %v8526_v32 = vld [vmem:[#allocation32_spill] sm:$0xff] }
 0x452   : > { %v3190_v62 = vmul.f32 %v3174_v63, %v7278_v23  ;;  %3265 = vrot.lane.b32.xlu1 %v4743_v33, %s5187_s29  ;;  %3267 = vrot.lane.b32.xlu0 %v4744_v53, %s5187_s29  ;;  %v8549_v23 = vld [vmem:[#allocation72_spill] sm:$0xff] }
 0x454   : > { %v4745_v3 = vpack.c.bf16 %v3190_v62, %v3190_v62 }
 0x456   : > { %3269 = vrot.lane.b32.xlu1 %v4745_v3, %s5187_s29  ;;  %3304 = vrot.lane.b32.xlu0 %v8500_v58, %s5184_s14 }
 0x45a   : > { %3306 = vrot.lane.b32.xlu1 %v6741_v27, %s5184_s14  ;;  %3308 = vrot.lane.b32.xlu0 %v8501_v25, %s5184_s14 }
 0x45e   : > { %3310 = vrot.lane.b32.xlu1 %v6747_v5, %s5184_s14  ;;  %3312 = vrot.lane.b32.xlu0 %v6749_v43, %s5184_s14 }
 0x462   : > { %3314 = vrot.lane.b32.xlu1 %v6757_v18, %s5184_s14  ;;  %3316 = vrot.lane.b32.xlu0 %v6755_v34, %s5184_s14 }
 0x466   : > { %3318 = vrot.lane.b32.xlu1 %v8503_v7, %s5184_s14  ;;  %3320 = vrot.lane.b32.xlu0 %v6765_v49, %s5184_s14 }
 0x46a   : > { %3322 = vrot.lane.b32.xlu1 %v6773_v35, %s5184_s14  ;;  %3324 = vrot.lane.b32.xlu0 %v6771_v17, %s5184_s14 }
 0x46e   : > { %3326 = vrot.lane.b32.xlu1 %v8506_v55, %s5184_s14  ;;  %3328 = vrot.lane.b32.xlu0 %v6782_v29, %s5184_s14 }
 0x472   : > { %3330 = vrot.lane.b32.xlu1 %v8509_v0, %s5184_s14  ;;  %3332 = vrot.lane.b32.xlu0 %v8510_v2, %s5184_s14 }
 0x476   : > { %3334 = vrot.lane.b32.xlu1 %v8480_v28, %s5184_s14  ;;  %3368 = vrot.lane.b32.xlu0 %v8512_v22, %s8511_s26  ;;  %s8528_s14 = smov 72  }
 0x47a   : > { %3370 = vrot.lane.b32.xlu1 %v8513_v26, %s8511_s26  ;;  %3372 = vrot.lane.b32.xlu0 %v8514_v13, %s8511_s26 }
 0x47e   : > { %3374 = vrot.lane.b32.xlu1 %v8515_v9, %s8511_s26  ;;  %3376 = vrot.lane.b32.xlu0 %v8516_v10, %s8511_s26 }
 0x482   : > { %3378 = vrot.lane.b32.xlu1 %v8517_v44, %s8511_s26  ;;  %3380 = vrot.lane.b32.xlu0 %v8518_v39, %s8511_s26 }
 0x486   : > { %3382 = vrot.lane.b32.xlu1 %v8519_v36, %s8511_s26  ;;  %3384 = vrot.lane.b32.xlu0 %v8520_v37, %s8511_s26 }
 0x48a   : > { %3386 = vrot.lane.b32.xlu1 %v8521_v61, %s8511_s26  ;;  %3388 = vrot.lane.b32.xlu0 %v8522_v4, %s8511_s26 }
 0x48e   : > { %3390 = vrot.lane.b32.xlu1 %v8523_v12, %s8511_s26  ;;  %3392 = vrot.lane.b32.xlu0 %v8524_v52, %s8511_s26 }
 0x492   : > { %3394 = vrot.lane.b32.xlu1 %v8525_v40, %s8511_s26  ;;  %3396 = vrot.lane.b32.xlu0 %v8526_v32, %s8511_s26 }
 0x496   : > { %3398 = vrot.lane.b32.xlu1 %v8481_v31, %s8511_s26 }
 0x4a8   : > { %v3240_v47 = vpop.permute.xlu0 %3239 }
 0x4a9   : > { %3288 = vst.msk [vmem:[#allocation3 + $0x40] sm:$0xf] %vm1239_vm3, %v3240_v47 }
 0x4ac   : > { %v3242_v60 = vpop.permute.xlu1 %3241  ;;  %v3244_v57 = vpop.permute.xlu0 %3243 }
 0x4ad   : > { %3289 = vst.msk [vmem:[#allocation3 + $0x44] sm:$0xf] %vm1239_vm3, %v3242_v60  ;;  %3290 = vst.msk [vmem:[#allocation3 + $0x48] sm:$0xf] %vm1239_vm3, %v3244_v57  ;;  %v8527_v60 = vld [vmem:[#allocation44_spill] sm:$0xff] }
 0x4b0   : > { %v3246_v33 = vpop.permute.xlu1 %3245  ;;  %v3248_v53 = vpop.permute.xlu0 %3247 }
 0x4b1   : > { %3291 = vst.msk [vmem:[#allocation3 + $0x4c] sm:$0xf] %vm1239_vm3, %v3246_v33  ;;  %3292 = vst.msk [vmem:[#allocation3 + $0x50] sm:$0xf] %vm1239_vm3, %v3248_v53  ;;  %v8529_v53 = vld [vmem:[#allocation20_spill] sm:$0xff] }
 0x4b4   : > { %v3250_v63 = vpop.permute.xlu1 %3249  ;;  %v3252_v62 = vpop.permute.xlu0 %3251 }
 0x4b5   : > { %3293 = vst.msk [vmem:[#allocation3 + $0x54] sm:$0xf] %vm1239_vm3, %v3250_v63  ;;  %3294 = vst.msk [vmem:[#allocation3 + $0x58] sm:$0xf] %vm1239_vm3, %v3252_v62  ;;  %v8530_v62 = vld [vmem:[#allocation41_spill] sm:$0xff] }
 0x4b8   : > { %v3254_v31 = vpop.permute.xlu1 %3253  ;;  %v3256_v3 = vpop.permute.xlu0 %3255 }
 0x4b9   : > { %3295 = vst.msk [vmem:[#allocation3 + $0x5c] sm:$0xf] %vm1239_vm3, %v3254_v31  ;;  %3296 = vst.msk [vmem:[#allocation3 + $0x60] sm:$0xf] %vm1239_vm3, %v3256_v3 }
 0x4bc   : > { %v3258_v22 = vpop.permute.xlu1 %3257  ;;  %v3260_v26 = vpop.permute.xlu0 %3259 }
 0x4bd   : > { %3297 = vst.msk [vmem:[#allocation3 + $0x64] sm:$0xf] %vm1239_vm3, %v3258_v22  ;;  %3298 = vst.msk [vmem:[#allocation3 + $0x68] sm:$0xf] %vm1239_vm3, %v3260_v26  ;;  %v8531_v22 = vld [vmem:[#allocation46_spill] sm:$0xff] }
 0x4c0   : > { %v3262_v13 = vpop.permute.xlu1 %3261  ;;  %v3264_v9 = vpop.permute.xlu0 %3263 }
 0x4c1   : > { %3299 = vst.msk [vmem:[#allocation3 + $0x6c] sm:$0xf] %vm1239_vm3, %v3262_v13  ;;  %3300 = vst.msk [vmem:[#allocation3 + $0x70] sm:$0xf] %vm1239_vm3, %v3264_v9  ;;  %v8532_v13 = vld [vmem:[#allocation42_spill] sm:$0xff] }
 0x4c4   : > { %v3266_v10 = vpop.permute.xlu1 %3265  ;;  %v3268_v44 = vpop.permute.xlu0 %3267 }
 0x4c5   : > { %3301 = vst.msk [vmem:[#allocation3 + $0x74] sm:$0xf] %vm1239_vm3, %v3266_v10  ;;  %3302 = vst.msk [vmem:[#allocation3 + $0x78] sm:$0xf] %vm1239_vm3, %v3268_v44  ;;  %v8533_v10 = vld [vmem:[#allocation30_spill] sm:$0xff] }
 0x4c8   : > { %v3270_v39 = vpop.permute.xlu1 %3269  ;;  %v7538_v36 = vpop.permute.xlu0 %3304 }
 0x4c9   : > { %3303 = vst.msk [vmem:[#allocation3 + $0x7c] sm:$0xf] %vm1239_vm3, %v3270_v39  ;;  %v3352_v37 = vsel %vm1014_vm2, %v7538_v36, %v7280_v19  ;;  %v8534_v39 = vld [vmem:[#allocation38_spill] sm:$0xff] }
 0x4ca   : > { %v3432_v61 = vmul.f32 %v3352_v37, %v8484_v15 }
 0x4cc   : > { %v7545_v4 = vpop.permute.xlu1 %3306  ;;  %3464 = vrot.lane.b32.xlu0 %v3432_v61, %s8511_s26  ;;  %v7548_v12 = vpop.permute.xlu0 %3308 }
 0x4cd   : > { %v3353_v52 = vsel %vm1014_vm2, %v7545_v4, %v7289_v45  ;;  %v3354_v40 = vsel %vm1014_vm2, %v7548_v12, %v7292_v56 }
 0x4ce   : > { %v3433_v32 = vmul.f32 %v3353_v52, %v8486_v20  ;;  %v3434_v19 = vmul.f32 %v3354_v40, %v8487_v50  ;;  %v8535_v52 = vld [vmem:[#allocation43_spill] sm:$0xff] }
 0x4d0   : > { %3466 = vrot.lane.b32.xlu1 %v3433_v32, %s8511_s26  ;;  %v7559_v15 = vpop.permute.xlu1 %3310  ;;  %3468 = vrot.lane.b32.xlu0 %v3434_v19, %s8511_s26  ;;  %v7562_v47 = vpop.permute.xlu0 %3312  ;;  %v8536_v32 = vld [vmem:[#allocation59_spill] sm:$0xff] }
 0x4d1   : > { %v3355_v45 = vsel %vm1014_vm2, %v7559_v15, %v7304_v14  ;;  %v3356_v56 = vsel %vm1014_vm2, %v7562_v47, %v7307_v48 }
 0x4d2   : > { %v3435_v20 = vmul.f32 %v3355_v45, %v7080_v6  ;;  %v3436_v50 = vmul.f32 %v3356_v56, %v8527_v60  ;;  %v8537_v56 = vld [vmem:[#allocation39_spill] sm:$0xff]  ;;  %v8538_v60 = vld [vmem:[#allocation48_spill] sm:$0xff] }
 0x4d4   : > { %3470 = vrot.lane.b32.xlu1 %v3435_v20, %s8511_s26  ;;  %3472 = vrot.lane.b32.xlu0 %v3436_v50, %s8511_s26  ;;  %v7590_v6 = vpop.permute.xlu1 %3314  ;;  %v7592_v14 = vpop.permute.xlu0 %3316 }
 0x4d5   : > { %v3357_v63 = vsel %vm1014_vm2, %v7590_v6, %v8529_v53  ;;  %v3358_v31 = vsel %vm1014_vm2, %v7592_v14, %v8530_v62  ;;  %v8539_v53 = vld [vmem:[#allocation60_spill] sm:$0xff]  ;;  %v8540_v62 = vld [vmem:[#allocation26_spill] sm:$0xff] }
 0x4d6   : > { %v3437_v26 = vmul.f32 %v3357_v63, %v8531_v22  ;;  %v3438_v9 = vmul.f32 %v3358_v31, %v8532_v13 }
 0x4d8   : > { %3657 = vrot.lane.b32.xlu1 %v8500_v58, %s8528_s14  ;;  %3659 = vrot.lane.b32.xlu0 %v6741_v27, %s8528_s14  ;;  %v7598_v48 = vpop.permute.xlu1 %3318  ;;  %v7604_v57 = vpop.permute.xlu0 %3320 }
 0x4d9   : > { %v3359_v44 = vsel %vm1014_vm2, %v7598_v48, %v8533_v10  ;;  %v3360_v37 = vsel %vm1014_vm2, %v7604_v57, %v8534_v39  ;;  %v8543_v39 = vld [vmem:[#allocation57_spill] sm:$0xff] }
 0x4da   : > { %v3439_v40 = vmul.f32 %v3359_v44, %v8535_v52  ;;  %v3440_v19 = vmul.f32 %v3360_v37, %v8536_v32 }
 0x4dc   : > { %3661 = vrot.lane.b32.xlu1 %v8501_v25, %s8528_s14  ;;  %3663 = vrot.lane.b32.xlu0 %v6747_v5, %s8528_s14  ;;  %v7610_v33 = vpop.permute.xlu1 %3322  ;;  %v7618_v3 = vpop.permute.xlu0 %3324 }
 0x4dd   : > { %v3361_v20 = vsel %vm1014_vm2, %v7610_v33, %v8537_v56  ;;  %v3362_v50 = vsel %vm1014_vm2, %v7618_v3, %v8538_v60  ;;  %v8545_v56 = vld [vmem:[#allocation70_spill] sm:$0xff]  ;;  %v8546_v60 = vld [vmem:[#allocation71_spill] sm:$0xff] }
 0x4de   : > { %v3441_v63 = vmul.f32 %v3361_v20, %v8539_v53  ;;  %v3442_v31 = vmul.f32 %v3362_v50, %v8540_v62 }
 0x4e0   : > { %3665 = vrot.lane.b32.xlu1 %v6749_v43, %s8528_s14  ;;  %3667 = vrot.lane.b32.xlu0 %v6757_v18, %s8528_s14  ;;  %v7632_v61 = vpop.permute.xlu1 %3326  ;;  %v7638_v45 = vpop.permute.xlu0 %3328 }
 0x4e4   : > { %3669 = vrot.lane.b32.xlu1 %v6755_v34, %s8528_s14  ;;  %3671 = vrot.lane.b32.xlu0 %v8503_v7, %s8528_s14  ;;  %v7650_v22 = vpop.permute.xlu1 %3330  ;;  %v7658_v44 = vpop.permute.xlu0 %3332 }
 0x4e5   : > { %v3365_v20 = vsel %vm1014_vm2, %v7650_v22, %v8545_v56  ;;  %v3366_v50 = vsel %vm1014_vm2, %v7658_v44, %v8546_v60  ;;  %v8550_v56 = vld [vmem:[#allocation64_spill] sm:$0xff] }
 0x4e8   : > { %3673 = vrot.lane.b32.xlu1 %v6765_v49, %s8528_s14  ;;  %3675 = vrot.lane.b32.xlu0 %v6773_v35, %s8528_s14  ;;  %v3369_v11 = vpop.permute.xlu0 %3368 }
 0x4ec   : > { %3677 = vrot.lane.b32.xlu1 %v6771_v17, %s8528_s14  ;;  %3679 = vrot.lane.b32.xlu0 %v8506_v55, %s8528_s14  ;;  %v7683_v8 = vpop.permute.xlu0 %3372 }
 0x4f0   : > { %3681 = vrot.lane.b32.xlu1 %v6782_v29, %s8528_s14  ;;  %3683 = vrot.lane.b32.xlu0 %v8509_v0, %s8528_s14  ;;  %v3416_v0 = vmul.f32 %v3369_v11, %v8500_v58 }
 0x4f4   : > { %3685 = vrot.lane.b32.xlu1 %v8510_v2, %s8528_s14  ;;  %3687 = vrot.lane.b32.xlu0 %v8480_v28, %s8528_s14 }
 0x4f8   : > { %3474 = vrot.lane.b32.xlu1 %v3437_v26, %s8511_s26  ;;  %3476 = vrot.lane.b32.xlu0 %v3438_v9, %s8511_s26  ;;  %v8541_v26 = vld [vmem:[#allocation68_spill] sm:$0xff]  ;;  %v8542_v9 = vld [vmem:[#allocation69_spill] sm:$0xff] }
 0x4f9   : > { %v3363_v13 = vsel %vm1014_vm2, %v7632_v61, %v8541_v26  ;;  %v3364_v10 = vsel %vm1014_vm2, %v7638_v45, %v8542_v9  ;;  %v7670_v26 = vpop.permute.xlu1 %3334  ;;  %v8548_v9 = vld [vmem:[#allocation61_spill] sm:$0xff] }
 0x4fa   : > { %v3443_v37 = vmul.f32 %v3363_v13, %v8543_v39  ;;  %v3446_v13 = vmul.f32 %v3366_v50, %v8548_v9 }
 0x4fc   : > { %3478 = vrot.lane.b32.xlu1 %v3439_v40, %s8511_s26  ;;  %3480 = vrot.lane.b32.xlu0 %v3440_v19, %s8511_s26  ;;  %v8544_v40 = vld [vmem:[#allocation56_spill] sm:$0xff] }
 0x4fd   : > { %v3444_v19 = vmul.f32 %v3364_v10, %v8544_v40  ;;  %v3367_v10 = vsel %vm1014_vm2, %v7670_v26, %v8549_v23 }
 0x4fe   : > { %v3447_v60 = vmul.f32 %v3367_v10, %v8550_v56 }
 0x500   : > { %3482 = vrot.lane.b32.xlu1 %v3441_v63, %s8511_s26  ;;  %3484 = vrot.lane.b32.xlu0 %v3442_v31, %s8511_s26  ;;  %v8547_v63 = vld [vmem:[#allocation55_spill] sm:$0xff] }
 0x501   : > { %v3445_v31 = vmul.f32 %v3365_v20, %v8547_v63  ;;  %v7687_v20 = vpop.permute.xlu0 %3376 }
 0x504   : > { %3486 = vrot.lane.b32.xlu1 %v3443_v37, %s8511_s26  ;;  %3488 = vrot.lane.b32.xlu0 %v3444_v19, %s8511_s26  ;;  %v3371_v37 = vpop.permute.xlu1 %3370 }
 0x505   : > { %v7691_v28 = vpop.permute.xlu0 %3380  ;;  %v3417_v55 = vmul.f32 %v3371_v37, %v6741_v27 }
 0x508   : > { %3490 = vrot.lane.b32.xlu1 %v3445_v31, %s8511_s26  ;;  %3492 = vrot.lane.b32.xlu0 %v3446_v13, %s8511_s26  ;;  %v7685_v19 = vpop.permute.xlu1 %3374 }
 0x509   : > { %v7695_v31 = vpop.permute.xlu0 %3384 }
 0x50c   : > { %3494 = vrot.lane.b32.xlu1 %v3447_v60, %s8511_s26  ;;  %v7689_v50 = vpop.permute.xlu1 %3378 }
 0x50d   : > { %v7699_v10 = vpop.permute.xlu0 %3388 }
 0x50e   : > { %8552 = vst [vmem:[#allocation33_spill] sm:$0xff] %v7699_v10 }
 0x510   : > { %v7693_v23 = vpop.permute.xlu1 %3382 }
 0x511   : > { %v7703_v30 = vpop.permute.xlu0 %3392 }
 0x512   : > { %8554 = vst [vmem:[#allocation24_spill] sm:$0xff] %v7703_v30 }
 0x514   : > { %v7697_v13 = vpop.permute.xlu1 %3386 }
 0x515   : > { %8551 = vst [vmem:[#allocation49_spill] sm:$0xff] %v7697_v13  ;;  %v7707_v2 = vpop.permute.xlu0 %3396 }
 0x516   : > { %8556 = vst [vmem:[#allocation22_spill] sm:$0xff] %v7707_v2 }
 0x518   : > { %v7701_v60 = vpop.permute.xlu1 %3390 }
 0x519   : > { %8553 = vst [vmem:[#allocation15_spill] sm:$0xff] %v7701_v60 }
 0x51c   : > { %v7705_v54 = vpop.permute.xlu1 %3394 }
 0x51d   : > { %8555 = vst [vmem:[#allocation36_spill] sm:$0xff] %v7705_v54 }
 0x520   : > { %v7710_v1 = vpop.permute.xlu1 %3398 }
 0x521   : > { %8557 = vst [vmem:[#allocation25_spill] sm:$0xff] %v7710_v1 }
 0x53e   : > { %v3465_v42 = vpop.permute.xlu0 %3464 }
 0x53f   : > { %v3512_v29 = vadd.f32 %v3465_v42, %v3416_v0  ;;  %v5048_v0 = vld [vmem:[%s8156_s5 + $0x20] sm:$0xff] }
 0x541   : > { %v3528_v16 = vmul.f32 %v3512_v29, %v8558_v24  ;;  %v5044_v29 = vld [vmem:[%s8156_s5] sm:$0xff] }
 0x542   : > { %v3467_v17 = vpop.permute.xlu1 %3466  ;;  %v7714_v10 = vpop.permute.xlu0 %3468 }
 0x543   : > { %v4746_v60 = vpack.c.bf16 %v3528_v16, %v3528_v16  ;;  %v3513_v13 = vadd.f32 %v3467_v17, %v3417_v55  ;;  %v5045_v17 = vld [vmem:[%s8156_s5 + $0x8] sm:$0xff]  ;;  %v5047_v55 = vld [vmem:[%s8156_s5 + $0x18] sm:$0xff] }
 0x545   : > { %v3529_v30 = vmul.f32 %v3513_v13, %v7120_v21  ;;  %3592 = vrot.lane.b32.xlu0 %v4746_v60, %s5188_s28  ;;  %v5049_v13 = vld [vmem:[%s8156_s5 + $0x28] sm:$0xff]  ;;  %v5050_v60 = vld [vmem:[%s8156_s5 + $0x30] sm:$0xff]  ;;  %v5055_v21 = vld [vmem:[%s8156_s5 + $0x58] sm:$0xff] }
 0x546   : > { %v7718_v2 = vpop.permute.xlu1 %3470  ;;  %v7720_v11 = vpop.permute.xlu0 %3472 }
 0x547   : > { %v4747_v58 = vpack.c.bf16 %v3529_v30, %v3529_v30  ;;  %v5046_v30 = vld [vmem:[%s8156_s5 + $0x10] sm:$0xff] }
 0x549   : > { %3594 = vrot.lane.b32.xlu1 %v4747_v58, %s5188_s28  ;;  %3721 = vrot.lane.b32.xlu0 %v5044_v29, %s5186_s27 }
 0x54a   : > { %v3658_v42 = vpop.permute.xlu1 %3657  ;;  %v3660_v16 = vpop.permute.xlu0 %3659 }
 0x54b   : > { %v3705_v24 = vsel %vm1014_vm2, %v3658_v42, %v7538_v36  ;;  %v3706_v36 = vsel %vm1014_vm2, %v3660_v16, %v7545_v4  ;;  %v5062_v4 = vld [vmem:[%s8157_s6 + $0x10] sm:$0xff] }
 0x54d   : > { %3723 = vrot.lane.b32.xlu1 %v5045_v17, %s5186_s27  ;;  %3725 = vrot.lane.b32.xlu0 %v5046_v30, %s5186_s27  ;;  %v5051_v30 = vld [vmem:[%s8156_s5 + $0x38] sm:$0xff] }
 0x54e   : > { %v3662_v58 = vpop.permute.xlu1 %3661  ;;  %v3664_v37 = vpop.permute.xlu0 %3663 }
 0x54f   : > { %v3707_v42 = vsel %vm1014_vm2, %v3662_v58, %v7548_v12  ;;  %v3708_v16 = vsel %vm1014_vm2, %v3664_v37, %v7559_v15 }
 0x550   : > { %v3787_v12 = vmul.f32 %v5062_v4, %v3707_v42  ;;  %v5064_v42 = vld [vmem:[%s8157_s6 + $0x20] sm:$0xff]  ;;  %v5066_v4 = vld [vmem:[%s8157_s6 + $0x30] sm:$0xff] }
 0x551   : > { %3727 = vrot.lane.b32.xlu1 %v5047_v55, %s5186_s27  ;;  %3729 = vrot.lane.b32.xlu0 %v5048_v0, %s5186_s27  ;;  %v5052_v55 = vld [vmem:[%s8156_s5 + $0x40] sm:$0xff] }
 0x552   : > { %v3666_v29 = vpop.permute.xlu1 %3665  ;;  %v3668_v17 = vpop.permute.xlu0 %3667 }
 0x553   : > { %v3709_v58 = vsel %vm1014_vm2, %v3666_v29, %v7562_v47  ;;  %v3710_v15 = vsel %vm1014_vm2, %v3668_v17, %v7590_v6  ;;  %v5065_v29 = vld [vmem:[%s8157_s6 + $0x28] sm:$0xff] }
 0x555   : > { %3731 = vrot.lane.b32.xlu1 %v5049_v13, %s5186_s27  ;;  %3733 = vrot.lane.b32.xlu0 %v5050_v60, %s5186_s27  ;;  %v5053_v13 = vld [vmem:[%s8156_s5 + $0x48] sm:$0xff]  ;;  %v5054_v60 = vld [vmem:[%s8156_s5 + $0x50] sm:$0xff] }
 0x556   : > { %v3670_v0 = vpop.permute.xlu1 %3669 }
 0x557   : > { %v3711_v47 = vsel %vm1014_vm2, %v3670_v0, %v7592_v14 }
 0x559   : > { %3735 = vrot.lane.b32.xlu1 %v5051_v30, %s5186_s27  ;;  %3737 = vrot.lane.b32.xlu0 %v5052_v55, %s5186_s27  ;;  %v3672_v30 = vpop.permute.xlu0 %3671  ;;  %v5056_v55 = vld [vmem:[%s8156_s5 + $0x60] sm:$0xff] }
 0x55a   : > { %v3712_v6 = vsel %vm1014_vm2, %v3672_v30, %v7598_v48 }
 0x55d   : > { %3739 = vrot.lane.b32.xlu1 %v5053_v13, %s5186_s27  ;;  %3741 = vrot.lane.b32.xlu0 %v5054_v60, %s5186_s27  ;;  %v3674_v13 = vpop.permute.xlu1 %3673  ;;  %v3676_v27 = vpop.permute.xlu0 %3675  ;;  %v5057_v60 = vld [vmem:[%s8156_s5 + $0x68] sm:$0xff] }
 0x55e   : > { %v3713_v14 = vsel %vm1014_vm2, %v3674_v13, %v7604_v57 }
 0x561   : > { %3743 = vrot.lane.b32.xlu1 %v5055_v21, %s5186_s27  ;;  %3745 = vrot.lane.b32.xlu0 %v5056_v55, %s5186_s27  ;;  %v5058_v21 = vld [vmem:[%s8156_s5 + $0x70] sm:$0xff]  ;;  %v5059_v55 = vld [vmem:[%s8157_s6] sm:$0xff]  ;;  %v3678_v54 = vpop.permute.xlu1 %3677 }
 0x562   : > { %v3785_v1 = vmul.f32 %v5059_v55, %v3705_v24  ;;  %v5061_v24 = vld [vmem:[%s8157_s6 + $0x8] sm:$0xff] }
 0x563   : > { %v3786_v55 = vmul.f32 %v5061_v24, %v3706_v36  ;;  %v5063_v36 = vld [vmem:[%s8157_s6 + $0x18] sm:$0xff]  ;;  %v3789_v24 = vmul.f32 %v5064_v42, %v3709_v58  ;;  %v3793_v58 = vmul.f32 %v3713_v14, %v8536_v32 }
 0x565   : > { %3747 = vrot.lane.b32.xlu1 %v5057_v60, %s5186_s27  ;;  %3749 = vrot.lane.b32.xlu0 %v5058_v21, %s5186_s27  ;;  %v5060_v60 = vld [vmem:[%s8156_s5 + $0x78] sm:$0xff]  ;;  %v3680_v21 = vpop.permute.xlu0 %3679 }
 0x569   : > { %3751 = vrot.lane.b32.xlu1 %v5060_v60, %s5186_s27  ;;  %3817 = vrot.lane.b32.xlu0 %v3785_v1, %s5186_s27  ;;  %v3682_v1 = vpop.permute.xlu1 %3681  ;;  %v3788_v60 = vmul.f32 %v5063_v36, %v3708_v16  ;;  %v3684_v37 = vpop.permute.xlu0 %3683  ;;  %v3792_v16 = vmul.f32 %v3712_v6, %v8535_v52  ;;  %v3714_v36 = vsel %vm1014_vm2, %v3676_v27, %v7610_v33 }
 0x56a   : > { %v3794_v57 = vmul.f32 %v3714_v36, %v8539_v53  ;;  %v3716_v52 = vsel %vm1014_vm2, %v3680_v21, %v7632_v61  ;;  %v3717_v32 = vsel %vm1014_vm2, %v3682_v1, %v7638_v45  ;;  %v3418_v27 = vmul.f32 %v7683_v8, %v8501_v25 }
 0x56b   : > { %v3796_v33 = vmul.f32 %v3716_v52, %v8543_v39  ;;  %v3419_v61 = vmul.f32 %v7685_v19, %v6747_v5  ;;  %v3718_v45 = vsel %vm1014_vm2, %v3684_v37, %v7650_v22  ;;  %v3422_v1 = vmul.f32 %v7691_v28, %v6755_v34 }
 0x56c   : > { %v3798_v22 = vmul.f32 %v3718_v45, %v8547_v63  ;;  %v3424_v28 = vmul.f32 %v7695_v31, %v6765_v49 }
 0x56d   : > { %3821 = vrot.lane.b32.xlu0 %v3787_v12, %s5186_s27  ;;  %3819 = vrot.lane.b32.xlu1 %v3786_v55, %s5186_s27  ;;  %v3790_v55 = vmul.f32 %v5065_v29, %v3710_v15  ;;  %v3791_v12 = vmul.f32 %v5066_v4, %v3711_v47  ;;  %v3686_v17 = vpop.permute.xlu1 %3685  ;;  %v3688_v0 = vpop.permute.xlu0 %3687  ;;  %v3515_v39 = vadd.f32 %v7718_v2, %v3419_v61  ;;  %v8568_v61 = vld [vmem:[#allocation62_spill] sm:$0xff] }
 0x56e   : > { %v3719_v53 = vsel %vm1014_vm2, %v3686_v17, %v7658_v44  ;;  %v3421_v44 = vmul.f32 %v7689_v50, %v6757_v18  ;;  %v8561_v17 = vld [vmem:[#allocation33_spill] sm:$0xff] }
 0x56f   : > { %v3799_v21 = vmul.f32 %v3719_v53, %v8548_v9  ;;  %v3531_v2 = vmul.f32 %v3515_v39, %v7147_v38 }
 0x571   : > { %3825 = vrot.lane.b32.xlu0 %v3789_v24, %s5186_s27  ;;  %3823 = vrot.lane.b32.xlu1 %v3788_v60, %s5186_s27  ;;  %v3715_v60 = vsel %vm1014_vm2, %v3678_v54, %v7618_v3  ;;  %v3475_v48 = vpop.permute.xlu1 %3474  ;;  %v3477_v13 = vpop.permute.xlu0 %3476  ;;  %v3514_v54 = vadd.f32 %v7714_v10, %v3418_v27  ;;  %v3797_v3 = vmul.f32 %v3717_v32, %v8544_v40  ;;  %v8564_v32 = vld [vmem:[#allocation17_spill] sm:$0xff] }
 0x572   : > { %v3795_v30 = vmul.f32 %v3715_v60, %v8540_v62  ;;  %v3420_v62 = vmul.f32 %v7687_v20, %v6749_v43  ;;  %v3720_v20 = vsel %vm1014_vm2, %v3688_v0, %v7670_v26  ;;  %v3518_v50 = vadd.f32 %v3477_v13, %v3422_v1  ;;  %v8562_v60 = vld [vmem:[#allocation54_spill] sm:$0xff]  ;;  %v8565_v13 = vld [vmem:[#allocation15_spill] sm:$0xff]  ;;  %v8572_v1 = vld [vmem:[#allocation29_spill] sm:$0xff] }
 0x573   : > { %v3530_v10 = vmul.f32 %v3514_v54, %v7122_v51  ;;  %v3800_v24 = vmul.f32 %v3720_v20, %v8550_v56  ;;  %v3423_v26 = vmul.f32 %v7693_v23, %v8503_v7  ;;  %v4749_v47 = vpack.c.bf16 %v3531_v2, %v3531_v2  ;;  %v8560_v23 = vld [vmem:[#allocation50_spill] sm:$0xff] }
 0x574   : > { %v3516_v19 = vadd.f32 %v7720_v11, %v3420_v62  ;;  %v3517_v11 = vadd.f32 %v3475_v48, %v3421_v44  ;;  %v3426_v0 = vmul.f32 %v8561_v17, %v8560_v23  ;;  %v3427_v27 = vmul.f32 %v8565_v13, %v8564_v32  ;;  %v8566_v54 = vld [vmem:[#allocation18_spill] sm:$0xff]  ;;  %v8571_v44 = vld [vmem:[#allocation36_spill] sm:$0xff] }
 0x575   : > { %3829 = vrot.lane.b32.xlu0 %v3791_v12, %s5186_s27  ;;  %3827 = vrot.lane.b32.xlu1 %v3790_v55, %s5186_s27  ;;  %v3479_v8 = vpop.permute.xlu1 %3478  ;;  %v3481_v40 = vpop.permute.xlu0 %3480  ;;  %v4748_v63 = vpack.c.bf16 %v3530_v10, %v3530_v10  ;;  %v3534_v55 = vmul.f32 %v3518_v50, %v7177_v41  ;;  %v8559_v12 = vld [vmem:[#allocation49_spill] sm:$0xff]  ;;  %v8573_v2 = vld [vmem:[#allocation22_spill] sm:$0xff] }
 0x576   : > { %v3532_v9 = vmul.f32 %v3516_v19, %v7149_v46  ;;  %v3533_v37 = vmul.f32 %v3517_v11, %v7175_v59  ;;  %v3519_v4 = vadd.f32 %v3479_v8, %v3423_v26  ;;  %v3520_v56 = vadd.f32 %v3481_v40, %v3424_v28  ;;  %v8569_v40 = vld [vmem:[#allocation63_spill] sm:$0xff]  ;;  %v8575_v50 = vld [vmem:[#allocation65_spill] sm:$0xff] }
 0x577   : > { %v3425_v6 = vmul.f32 %v8559_v12, %v6773_v35  ;;  %v4752_v36 = vpack.c.bf16 %v3534_v55, %v3534_v55  ;;  %v3430_v11 = vmul.f32 %v8573_v2, %v8572_v1  ;;  %v8578_v12 = vld [vmem:[#allocation66_spill] sm:$0xff] }
 0x578   : > { %v4750_v29 = vpack.c.bf16 %v3532_v9, %v3532_v9  ;;  %v4751_v31 = vpack.c.bf16 %v3533_v37, %v3533_v37  ;;  %v3535_v48 = vmul.f32 %v3519_v4, %v8562_v60  ;;  %v8576_v37 = vld [vmem:[#allocation14_spill] sm:$0xff] }
 0x579   : > { %3833 = vrot.lane.b32.xlu0 %v3793_v58, %s5186_s27  ;;  %3831 = vrot.lane.b32.xlu1 %v3792_v16, %s5186_s27  ;;  %v3483_v42 = vpop.permute.xlu1 %3482  ;;  %v3485_v15 = vpop.permute.xlu0 %3484 }
 0x57a   : > { %v3521_v16 = vadd.f32 %v3483_v42, %v3425_v6  ;;  %v3522_v52 = vadd.f32 %v3485_v15, %v3426_v0  ;;  %v4753_v62 = vpack.c.bf16 %v3535_v48, %v3535_v48 }
 0x57c   : > { %v3537_v45 = vmul.f32 %v3521_v16, %v8568_v61  ;;  %v3538_v10 = vmul.f32 %v3522_v52, %v8569_v40 }
 0x57d   : > { %3837 = vrot.lane.b32.xlu0 %v3795_v30, %s5186_s27  ;;  %3835 = vrot.lane.b32.xlu1 %v3794_v57, %s5186_s27  ;;  %v3487_v14 = vpop.permute.xlu1 %3486  ;;  %v3489_v58 = vpop.permute.xlu0 %3488  ;;  %v8563_v57 = vld [vmem:[#allocation58_spill] sm:$0xff] }
 0x57e   : > { %v3536_v30 = vmul.f32 %v3520_v56, %v8563_v57  ;;  %v3523_v53 = vadd.f32 %v3487_v14, %v3427_v27  ;;  %v4755_v42 = vpack.c.bf16 %v3537_v45, %v3537_v45  ;;  %v8579_v14 = vld [vmem:[#allocation67_spill] sm:$0xff] }
 0x580   : > { %v4754_v39 = vpack.c.bf16 %v3536_v30, %v3536_v30 }
 0x581   : > { %3841 = vrot.lane.b32.xlu0 %v3797_v3, %s5186_s27  ;;  %3839 = vrot.lane.b32.xlu1 %v3796_v33, %s5186_s27  ;;  %v8567_v33 = vld [vmem:[#allocation24_spill] sm:$0xff]  ;;  %v3491_v8 = vpop.permute.xlu1 %3490 }
 0x582   : > { %v3428_v3 = vmul.f32 %v8567_v33, %v8566_v54 }
 0x584   : > { %v3524_v19 = vadd.f32 %v3489_v58, %v3428_v3  ;;  %v8580_v58 = vld [vmem:[#allocation40_spill] sm:$0xff] }
 0x585   : > { %3845 = vrot.lane.b32.xlu0 %v3799_v21, %s5186_s27  ;;  %3843 = vrot.lane.b32.xlu1 %v3798_v22, %s5186_s27  ;;  %v3493_v22 = vpop.permute.xlu0 %3492  ;;  %v8570_v21 = vld [vmem:[#allocation47_spill] sm:$0xff] }
 0x586   : > { %v3429_v20 = vmul.f32 %v8571_v44, %v8570_v21  ;;  %v3540_v15 = vmul.f32 %v3524_v19, %v8575_v50  ;;  %v3526_v28 = vadd.f32 %v3493_v22, %v3430_v11  ;;  %v8581_v11 = vld [vmem:[#allocation31_spill] sm:$0xff] }
 0x588   : > { %v3525_v26 = vadd.f32 %v3491_v8, %v3429_v20  ;;  %v4758_v56 = vpack.c.bf16 %v3540_v15, %v3540_v15  ;;  %v3542_v17 = vmul.f32 %v3526_v28, %v8579_v14 }
 0x589   : > { %3596 = vrot.lane.b32.xlu0 %v4748_v63, %s5188_s28  ;;  %3847 = vrot.lane.b32.xlu1 %v3800_v24, %s5186_s27  ;;  %v8574_v63 = vld [vmem:[#allocation51_spill] sm:$0xff]  ;;  %v4756_v24 = vpack.c.bf16 %v3538_v10, %v3538_v10 }
 0x58a   : > { %v3539_v9 = vmul.f32 %v3523_v53, %v8574_v63  ;;  %v3541_v6 = vmul.f32 %v3525_v26, %v8578_v12  ;;  %v4760_v16 = vpack.c.bf16 %v3542_v17, %v3542_v17  ;;  %v8582_v26 = vld [vmem:[#allocation16_spill] sm:$0xff] }
 0x58c   : > { %v4757_v4 = vpack.c.bf16 %v3539_v9, %v3539_v9 }
 0x58d   : > { %3600 = vrot.lane.b32.xlu0 %v4750_v29, %s5188_s28  ;;  %3598 = vrot.lane.b32.xlu1 %v4749_v47, %s5188_s28  ;;  %v3495_v47 = vpop.permute.xlu1 %3494  ;;  %v8577_v29 = vld [vmem:[#allocation25_spill] sm:$0xff] }
 0x58e   : > { %v3431_v55 = vmul.f32 %v8577_v29, %v8576_v37  ;;  %v8583_v29 = vld [vmem:[#allocation45_spill] sm:$0xff] }
 0x590   : > { %v3527_v0 = vadd.f32 %v3495_v47, %v3431_v55 }
 0x591   : > { %3602 = vrot.lane.b32.xlu1 %v4751_v31, %s5188_s28  ;;  %3604 = vrot.lane.b32.xlu0 %v4752_v36, %s5188_s28  ;;  %v4759_v31 = vpack.c.bf16 %v3541_v6, %v3541_v6 }
 0x592   : > { %v3543_v36 = vmul.f32 %v3527_v0, %v8580_v58 }
 0x594   : > { %v4761_v48 = vpack.c.bf16 %v3543_v36, %v3543_v36  ;;  %v8584_v36 = vld [vmem:[#allocation53_spill] sm:$0xff] }
 0x595   : > { %3606 = vrot.lane.b32.xlu1 %v4753_v62, %s5188_s28  ;;  %3608 = vrot.lane.b32.xlu0 %v4754_v39, %s5188_s28 }
 0x599   : > { %3610 = vrot.lane.b32.xlu1 %v4755_v42, %s5188_s28  ;;  %3612 = vrot.lane.b32.xlu0 %v4756_v24, %s5188_s28 }
 0x59d   : > { %3614 = vrot.lane.b32.xlu1 %v4757_v4, %s5188_s28  ;;  %3616 = vrot.lane.b32.xlu0 %v4758_v56, %s5188_s28 }
 0x5a1   : > { %3618 = vrot.lane.b32.xlu1 %v4759_v31, %s5188_s28  ;;  %3620 = vrot.lane.b32.xlu0 %v4760_v16, %s5188_s28 }
 0x5a5   : > { %3622 = vrot.lane.b32.xlu1 %v4761_v48, %s5188_s28 }
 0x5b7   : > { %v3593_v30 = vpop.permute.xlu0 %3592 }
 0x5b8   : > { %3641 = vst.msk [vmem:[#allocation3 + $0x80] sm:$0xf] %vm1239_vm3, %v3593_v30 }
 0x5bb   : > { %v3595_v52 = vpop.permute.xlu1 %3594  ;;  %v3722_v13 = vpop.permute.xlu0 %3721 }
 0x5bc   : > { %3642 = vst.msk [vmem:[#allocation3 + $0x84] sm:$0xf] %vm1239_vm3, %v3595_v52  ;;  %v3769_v42 = vmul.f32 %v3722_v13, %v8581_v11 }
 0x5bf   : > { %v3724_v27 = vpop.permute.xlu1 %3723  ;;  %v3726_v33 = vpop.permute.xlu0 %3725 }
 0x5c0   : > { %v3770_v28 = vmul.f32 %v3724_v27, %v8582_v26  ;;  %v3771_v47 = vmul.f32 %v3726_v33, %v8501_v25 }
 0x5c3   : > { %v3728_v3 = vpop.permute.xlu1 %3727  ;;  %v3730_v45 = vpop.permute.xlu0 %3729 }
 0x5c4   : > { %v3772_v31 = vmul.f32 %v3728_v3, %v6747_v5  ;;  %v3773_v16 = vmul.f32 %v3730_v45, %v6749_v43 }
 0x5c7   : > { %v3732_v53 = vpop.permute.xlu1 %3731  ;;  %v3734_v8 = vpop.permute.xlu0 %3733 }
 0x5cb   : > { %v3736_v62 = vpop.permute.xlu1 %3735  ;;  %v3738_v39 = vpop.permute.xlu0 %3737 }
 0x5cf   : > { %v3740_v10 = vpop.permute.xlu1 %3739  ;;  %v3742_v19 = vpop.permute.xlu0 %3741 }
 0x5d3   : > { %v7926_v22 = vpop.permute.xlu1 %3743  ;;  %v7928_v44 = vpop.permute.xlu0 %3745 }
 0x5d7   : > { %v7930_v20 = vpop.permute.xlu1 %3747  ;;  %v7932_v2 = vpop.permute.xlu0 %3749 }
 0x5db   : > { %v7935_v9 = vpop.permute.xlu1 %3751  ;;  %v3818_v24 = vpop.permute.xlu0 %3817 }
 0x5dc   : > { %v3865_v15 = vadd.f32 %v3818_v24, %v3769_v42  ;;  %v3774_v42 = vmul.f32 %v3732_v53, %v6757_v18  ;;  %v3775_v24 = vmul.f32 %v3734_v8, %v6755_v34  ;;  %v3777_v18 = vmul.f32 %v3738_v39, %v6765_v49 }
 0x5de   : > { %v3881_v55 = vmul.f32 %v3865_v15, %v8583_v29 }
 0x5df   : > { %v3820_v4 = vpop.permute.xlu1 %3819  ;;  %v3822_v56 = vpop.permute.xlu0 %3821 }
 0x5e0   : > { %v4762_v6 = vpack.c.bf16 %v3881_v55, %v3881_v55  ;;  %v3866_v17 = vadd.f32 %v3820_v4, %v3770_v28  ;;  %v3867_v0 = vadd.f32 %v3822_v56, %v3771_v47  ;;  %v3776_v47 = vmul.f32 %v3736_v62, %v8503_v7 }
 0x5e1   : > { %v3778_v56 = vmul.f32 %v3740_v10, %v6773_v35  ;;  %v3779_v7 = vmul.f32 %v3742_v19, %v8560_v23  ;;  %v3781_v35 = vmul.f32 %v7928_v44, %v8566_v54  ;;  %v3783_v54 = vmul.f32 %v7932_v2, %v8572_v1 }
 0x5e2   : > { %v3882_v48 = vmul.f32 %v3866_v17, %v8584_v36  ;;  %v3883_v30 = vmul.f32 %v3867_v0, %v7122_v51  ;;  %3945 = vrot.lane.b32.xlu0 %v4762_v6, %s5189_s25 }
 0x5e3   : > { %v3824_v52 = vpop.permute.xlu1 %3823  ;;  %v3826_v13 = vpop.permute.xlu0 %3825 }
 0x5e4   : > { %v4763_v25 = vpack.c.bf16 %v3882_v48, %v3882_v48  ;;  %v4764_v27 = vpack.c.bf16 %v3883_v30, %v3883_v30  ;;  %v3868_v33 = vadd.f32 %v3824_v52, %v3772_v31  ;;  %v3869_v11 = vadd.f32 %v3826_v13, %v3773_v16 }
 0x5e5   : > { %v3780_v31 = vmul.f32 %v7926_v22, %v8564_v32  ;;  %v3782_v32 = vmul.f32 %v7930_v20, %v8570_v21  ;;  %v3784_v21 = vmul.f32 %v7935_v9, %v8576_v37 }
 0x5e6   : > { %v3884_v5 = vmul.f32 %v3868_v33, %v7147_v38  ;;  %v3885_v43 = vmul.f32 %v3869_v11, %v7149_v46  ;;  %3947 = vrot.lane.b32.xlu1 %v4763_v25, %s5189_s25  ;;  %3949 = vrot.lane.b32.xlu0 %v4764_v27, %s5189_s25 }
 0x5e7   : > { %v3828_v51 = vpop.permute.xlu1 %3827  ;;  %v3830_v3 = vpop.permute.xlu0 %3829 }
 0x5e8   : > { %v4765_v45 = vpack.c.bf16 %v3884_v5, %v3884_v5  ;;  %v4766_v15 = vpack.c.bf16 %v3885_v43, %v3885_v43  ;;  %v3870_v26 = vadd.f32 %v3828_v51, %v3774_v42  ;;  %v3871_v28 = vadd.f32 %v3830_v3, %v3775_v24 }
 0x5ea   : > { %v3886_v34 = vmul.f32 %v3870_v26, %v7175_v59  ;;  %v3887_v38 = vmul.f32 %v3871_v28, %v7177_v41  ;;  %3951 = vrot.lane.b32.xlu1 %v4765_v45, %s5189_s25  ;;  %3953 = vrot.lane.b32.xlu0 %v4766_v15, %s5189_s25 }
 0x5eb   : > { %v3832_v46 = vpop.permute.xlu1 %3831  ;;  %v3834_v53 = vpop.permute.xlu0 %3833 }
 0x5ec   : > { %v4767_v8 = vpack.c.bf16 %v3886_v34, %v3886_v34  ;;  %v4768_v29 = vpack.c.bf16 %v3887_v38, %v3887_v38  ;;  %v3872_v55 = vadd.f32 %v3832_v46, %v3776_v47  ;;  %v3873_v4 = vadd.f32 %v3834_v53, %v3777_v18 }
 0x5ee   : > { %v3888_v49 = vmul.f32 %v3872_v55, %v8562_v60  ;;  %v3889_v59 = vmul.f32 %v3873_v4, %v8563_v57  ;;  %3955 = vrot.lane.b32.xlu1 %v4767_v8, %s5189_s25  ;;  %3957 = vrot.lane.b32.xlu0 %v4768_v29, %s5189_s25 }
 0x5ef   : > { %v3836_v41 = vpop.permute.xlu1 %3835  ;;  %v3838_v62 = vpop.permute.xlu0 %3837 }
 0x5f0   : > { %v4769_v39 = vpack.c.bf16 %v3888_v49, %v3888_v49  ;;  %v4770_v6 = vpack.c.bf16 %v3889_v59, %v3889_v59  ;;  %v3874_v17 = vadd.f32 %v3836_v41, %v3778_v56  ;;  %v3875_v0 = vadd.f32 %v3838_v62, %v3779_v7 }
 0x5f2   : > { %v3890_v23 = vmul.f32 %v3874_v17, %v8568_v61  ;;  %v3891_v60 = vmul.f32 %v3875_v0, %v8569_v40  ;;  %3959 = vrot.lane.b32.xlu1 %v4769_v39, %s5189_s25  ;;  %3961 = vrot.lane.b32.xlu0 %v4770_v6, %s5189_s25 }
 0x5f3   : > { %v3840_v57 = vpop.permute.xlu1 %3839  ;;  %v3842_v10 = vpop.permute.xlu0 %3841 }
 0x5f4   : > { %v4771_v19 = vpack.c.bf16 %v3890_v23, %v3890_v23  ;;  %v4772_v16 = vpack.c.bf16 %v3891_v60, %v3891_v60  ;;  %v3876_v36 = vadd.f32 %v3840_v57, %v3780_v31  ;;  %v3877_v48 = vadd.f32 %v3842_v10, %v3781_v35 }
 0x5f6   : > { %v3892_v61 = vmul.f32 %v3876_v36, %v8574_v63  ;;  %v3893_v40 = vmul.f32 %v3877_v48, %v8575_v50  ;;  %3963 = vrot.lane.b32.xlu1 %v4771_v19, %s5189_s25  ;;  %3965 = vrot.lane.b32.xlu0 %v4772_v16, %s5189_s25 }
 0x5f7   : > { %v3844_v22 = vpop.permute.xlu1 %3843  ;;  %v3846_v44 = vpop.permute.xlu0 %3845 }
 0x5f8   : > { %v4773_v30 = vpack.c.bf16 %v3892_v61, %v3892_v61  ;;  %v4774_v52 = vpack.c.bf16 %v3893_v40, %v3893_v40  ;;  %v3878_v13 = vadd.f32 %v3844_v22, %v3782_v32  ;;  %v3879_v25 = vadd.f32 %v3846_v44, %v3783_v54 }
 0x5fa   : > { %v3894_v20 = vmul.f32 %v3878_v13, %v8578_v12  ;;  %v3895_v1 = vmul.f32 %v3879_v25, %v8579_v14  ;;  %3967 = vrot.lane.b32.xlu1 %v4773_v30, %s5189_s25  ;;  %3969 = vrot.lane.b32.xlu0 %v4774_v52, %s5189_s25 }
 0x5fb   : > { %v3848_v63 = vpop.permute.xlu1 %3847  ;;  %v3597_v50 = vpop.permute.xlu0 %3596 }
 0x5fc   : > { %v4775_v2 = vpack.c.bf16 %v3894_v20, %v3894_v20  ;;  %v4776_v27 = vpack.c.bf16 %v3895_v1, %v3895_v1  ;;  %v3880_v33 = vadd.f32 %v3848_v63, %v3784_v21  ;;  %3643 = vst.msk [vmem:[#allocation3 + $0x88] sm:$0xf] %vm1239_vm3, %v3597_v50 }
 0x5fe   : > { %v3896_v11 = vmul.f32 %v3880_v33, %v8580_v58  ;;  %3971 = vrot.lane.b32.xlu1 %v4775_v2, %s5189_s25  ;;  %3973 = vrot.lane.b32.xlu0 %v4776_v27, %s5189_s25 }
 0x5ff   : > { %v3599_v37 = vpop.permute.xlu1 %3598  ;;  %v3601_v12 = vpop.permute.xlu0 %3600 }
 0x600   : > { %v4777_v14 = vpack.c.bf16 %v3896_v11, %v3896_v11  ;;  %3644 = vst.msk [vmem:[#allocation3 + $0x8c] sm:$0xf] %vm1239_vm3, %v3599_v37  ;;  %3645 = vst.msk [vmem:[#allocation3 + $0x90] sm:$0xf] %vm1239_vm3, %v3601_v12 }
 0x602   : > { %3975 = vrot.lane.b32.xlu1 %v4777_v14, %s5189_s25 }
 0x603   : > { %v3603_v9 = vpop.permute.xlu1 %3602  ;;  %v3605_v42 = vpop.permute.xlu0 %3604 }
 0x604   : > { %3646 = vst.msk [vmem:[#allocation3 + $0x94] sm:$0xf] %vm1239_vm3, %v3603_v9  ;;  %3647 = vst.msk [vmem:[#allocation3 + $0x98] sm:$0xf] %vm1239_vm3, %v3605_v42 }
 0x607   : > { %v3607_v58 = vpop.permute.xlu1 %3606  ;;  %v3609_v24 = vpop.permute.xlu0 %3608 }
 0x608   : > { %3648 = vst.msk [vmem:[#allocation3 + $0x9c] sm:$0xf] %vm1239_vm3, %v3607_v58  ;;  %3649 = vst.msk [vmem:[#allocation3 + $0xa0] sm:$0xf] %vm1239_vm3, %v3609_v24 }
 0x60b   : > { %v3611_v5 = vpop.permute.xlu1 %3610  ;;  %v3613_v43 = vpop.permute.xlu0 %3612 }
 0x60c   : > { %3650 = vst.msk [vmem:[#allocation3 + $0xa4] sm:$0xf] %vm1239_vm3, %v3611_v5  ;;  %3651 = vst.msk [vmem:[#allocation3 + $0xa8] sm:$0xf] %vm1239_vm3, %v3613_v43 }
 0x60f   : > { %v3615_v51 = vpop.permute.xlu1 %3614  ;;  %v3617_v3 = vpop.permute.xlu0 %3616 }
 0x610   : > { %3652 = vst.msk [vmem:[#allocation3 + $0xac] sm:$0xf] %vm1239_vm3, %v3615_v51  ;;  %3653 = vst.msk [vmem:[#allocation3 + $0xb0] sm:$0xf] %vm1239_vm3, %v3617_v3 }
 0x613   : > { %v3619_v45 = vpop.permute.xlu1 %3618  ;;  %v3621_v15 = vpop.permute.xlu0 %3620 }
 0x614   : > { %3654 = vst.msk [vmem:[#allocation3 + $0xb4] sm:$0xf] %vm1239_vm3, %v3619_v45  ;;  %3655 = vst.msk [vmem:[#allocation3 + $0xb8] sm:$0xf] %vm1239_vm3, %v3621_v15 }
 0x617   : > { %v3623_v26 = vpop.permute.xlu1 %3622 }
 0x618   : > { %3656 = vst.msk [vmem:[#allocation3 + $0xbc] sm:$0xf] %vm1239_vm3, %v3623_v26 }
 0x654   : > { %v3946_v28 = vpop.permute.xlu0 %3945 }
 0x655   : > { %3994 = vst.msk [vmem:[#allocation3 + $0xc0] sm:$0xf] %vm1239_vm3, %v3946_v28 }
 0x658   : > { %v3948_v47 = vpop.permute.xlu1 %3947  ;;  %v3950_v18 = vpop.permute.xlu0 %3949 }
 0x659   : > { %3995 = vst.msk [vmem:[#allocation3 + $0xc4] sm:$0xf] %vm1239_vm3, %v3948_v47  ;;  %3996 = vst.msk [vmem:[#allocation3 + $0xc8] sm:$0xf] %vm1239_vm3, %v3950_v18 }
 0x65c   : > { %v3952_v34 = vpop.permute.xlu1 %3951  ;;  %v3954_v38 = vpop.permute.xlu0 %3953 }
 0x65d   : > { %3997 = vst.msk [vmem:[#allocation3 + $0xcc] sm:$0xf] %vm1239_vm3, %v3952_v34  ;;  %3998 = vst.msk [vmem:[#allocation3 + $0xd0] sm:$0xf] %vm1239_vm3, %v3954_v38 }
 0x660   : > { %v3956_v46 = vpop.permute.xlu1 %3955  ;;  %v3958_v53 = vpop.permute.xlu0 %3957 }
 0x661   : > { %3999 = vst.msk [vmem:[#allocation3 + $0xd4] sm:$0xf] %vm1239_vm3, %v3956_v46  ;;  %4000 = vst.msk [vmem:[#allocation3 + $0xd8] sm:$0xf] %vm1239_vm3, %v3958_v53 }
 0x664   : > { %v3960_v8 = vpop.permute.xlu1 %3959  ;;  %v3962_v29 = vpop.permute.xlu0 %3961 }
 0x665   : > { %4001 = vst.msk [vmem:[#allocation3 + $0xdc] sm:$0xf] %vm1239_vm3, %v3960_v8  ;;  %4002 = vst.msk [vmem:[#allocation3 + $0xe0] sm:$0xf] %vm1239_vm3, %v3962_v29 }
 0x668   : > { %v3964_v55 = vpop.permute.xlu1 %3963  ;;  %v3966_v4 = vpop.permute.xlu0 %3965 }
 0x669   : > { %4003 = vst.msk [vmem:[#allocation3 + $0xe4] sm:$0xf] %vm1239_vm3, %v3964_v55  ;;  %4004 = vst.msk [vmem:[#allocation3 + $0xe8] sm:$0xf] %vm1239_vm3, %v3966_v4 }
 0x66c   : > { %v3968_v56 = vpop.permute.xlu1 %3967  ;;  %v3970_v7 = vpop.permute.xlu0 %3969 }
 0x66d   : > { %4005 = vst.msk [vmem:[#allocation3 + $0xec] sm:$0xf] %vm1239_vm3, %v3968_v56  ;;  %4006 = vst.msk [vmem:[#allocation3 + $0xf0] sm:$0xf] %vm1239_vm3, %v3970_v7 }
 0x670   : > { %v3972_v49 = vpop.permute.xlu1 %3971  ;;  %v3974_v59 = vpop.permute.xlu0 %3973 }
 0x671   : > { %4007 = vst.msk [vmem:[#allocation3 + $0xf4] sm:$0xf] %vm1239_vm3, %v3972_v49  ;;  %4008 = vst.msk [vmem:[#allocation3 + $0xf8] sm:$0xf] %vm1239_vm3, %v3974_v59 }
 0x674   : > { %v3976_v41 = vpop.permute.xlu1 %3975 }
 0x675   : > { %4009 = vst.msk [vmem:[#allocation3 + $0xfc] sm:$0xf] %vm1239_vm3, %v3976_v41 }
 0x676 PF: > { %s4778_s27 = sshll.u32 %s5159_s12, 6  ;;  %vm4143_vm0 = vcmask 130048   ;;  %v4049_v25 = vld [vmem:[#allocation4 + $0x58] sm:$0xff]  ;;  %v4057_v21 = vld [vmem:[#allocation4 + $0x10] sm:$0xff]  ;;  %v4055_v50 = vld [vmem:[#allocation4 + $0x40] sm:$0xff]  ;;  %s4643_s20 = sshll.u32 %s5159_s12, 4 }
 0x677   : > { %s8020_s28 = scalar_lea.vmem [#allocation3], %s4778_s27  ;;  %s8031_s25 = scalar_lea.vmem [#allocation2], %s4778_s27  ;;  %v4047_v63 = vld [vmem:[#allocation4 + $0x30] sm:$0xff]  ;;  %v4050_v37 = vld [vmem:[#allocation4 + $0x18] sm:$0xff]  ;;  %v4048_v24 = vld [vmem:[#allocation4] sm:$0xff] }
 0x678   : > { %v5075_v31 = vld [vmem:[%s8031_s25] sm:$0xff]   ;;  %v5077_v40 = vld [vmem:[%s8031_s25 + $0x8] sm:$0xff]   ;;  %v5079_v44 = vld [vmem:[%s8031_s25 + $0x10] sm:$0xff]   ;;  %s4644_s15 = sshll.u32 %s5163_s13, 6  ;;  %s4323_s13 = sshll.u32 %s5337_s11, 4  ;;  %s8092_s13 = int_to_ptr.vmem [resolvable:$true] %s4323_s13 }
 0x679   : > { %v5076_v35 = vld [vmem:[%s8031_s25 + $0x20] sm:$0xff]   ;;  %4872 = vmatprep.mubr.msk.bf16.mxu0 %vm4143_vm0, %v5075_v31  ;;  %v5078_v22 = vld [vmem:[%s8031_s25 + $0x28] sm:$0xff]   ;;  %v5080_v30 = vld [vmem:[%s8031_s25 + $0x30] sm:$0xff]   ;;  %s4320_s26 = sadd.s32 %s4644_s15, %s4643_s20  ;;  %s8585_s19 = sand.u32 1, %s5151_s10  }
 0x67a   : > { %4880 = vmatprep.mubr.msk.bf16.mxu1 %vm4143_vm0, %v5076_v35  ;;  %v5081_v52 = vld [vmem:[%s8031_s25 + $0x18] sm:$0xff]   ;;  %v4056_v5 = vld [vmem:[#allocation4 + $0x20] sm:$0xff]  ;;  %v4053_v15 = vld [vmem:[#allocation4 + $0x8] sm:$0xff]  ;;  %s4645_s12 = sshll.u32 %s4320_s26, 7  ;;  %s8100_s21 = scalar_lea.sflag [#allocation6], %s8585_s19 }
 0x67b   : > { %v5082_v13 = vld [vmem:[%s8031_s25 + $0x38] sm:$0xff]   ;;  %v4051_v38 = vld [vmem:[#allocation4 + $0x50] sm:$0xff]  ;;  %v4059_v46 = vld [vmem:[#allocation4 + $0x60] sm:$0xff]  ;;  %s8090_s24 = scalar_lea.hbm %s8160_s9, %s4645_s12  ;;  %s5083_s17 = scalar_lea.vmem %s8092_s13, 2048 }
 0x67c   : > { %v5067_v62 = vld [vmem:[%s8020_s28 + $0x38] sm:$0xff]   ;;  %v5068_v39 = vld [vmem:[%s8020_s28 + $0x30] sm:$0xff]   ;;  %v5069_v17 = vld [vmem:[%s8020_s28 + $0x28] sm:$0xff]   ;;  %p5084_p0 = scmp.ne.s32.totalorder %s8092_s13, %s5083_s17  ;;  %s5190_s18 = smov [#allocation5]  }
 0x67d   : > { %4904 = vmatprep.subr.msk.bf16.mxu0 %vm4143_vm0, %v5067_v62  ;;  %4905 = vmatprep.subr.msk.bf16.mxu1 %vm4143_vm0, %v5067_v62  ;;  %v4190_v6 = vsel %vm4143_vm0, %v5067_v62, 0  ;;  %v4187_v0 = vsel %vm4143_vm0, %v5068_v39, 0  ;;  %v4184_v23 = vsel %vm4143_vm0, %v5069_v17, 0  ;;  %v5070_v60 = vld [vmem:[%s8020_s28 + $0x20] sm:$0xff]   ;;  %v5071_v10 = vld [vmem:[%s8020_s28 + $0x18] sm:$0xff]   ;;  %v5072_v16 = vld [vmem:[%s8020_s28 + $0x10] sm:$0xff]  }
 0x67e   : > { %4857 = vmatpush3.bf16.xpose.msra.mxu0 %v4190_v6  ;;  %4896 = vmatpush3.bf16.xpose.msra.mxu1 %v4190_v6  ;;  %v4181_v57 = vsel %vm4143_vm0, %v5070_v60, 0  ;;  %v4178_v19 = vsel %vm4143_vm0, %v5071_v10, 0  ;;  %v4175_v36 = vsel %vm4143_vm0, %v5072_v16, 0  ;;  %v5073_v48 = vld [vmem:[%s8020_s28 + $0x8] sm:$0xff]   ;;  %v5074_v54 = vld [vmem:[%s8020_s28] sm:$0xff]   ;;  %v4058_v12 = vld [vmem:[#allocation4 + $0x38] sm:$0xff]  ;;  %p5085_p1 = pnand %p5084_p0, %p5294_p3 }
 0x67f   : > { %4906 = vmatprep.subr.msk.bf16.mxu0 %vm4143_vm0, %v5068_v39  ;;  %4907 = vmatprep.subr.msk.bf16.mxu1 %vm4143_vm0, %v5068_v39  ;;  %v4172_v32 = vsel %vm4143_vm0, %v5073_v48, 0  ;;  %v4169_v61 = vsel %vm4143_vm0, %v5074_v54, 0  ;;  %v4061_v26 = vld [vmem:[#allocation4 + $0x78] sm:$0xff]  ;;  %v4054_v4 = vld [vmem:[#allocation4 + $0x48] sm:$0xff]  ;;  %v4060_v39 = vld [vmem:[#allocation4 + $0x70] sm:$0xff]  ;;  %s5087_s27 = sshll.u32 %s5190_s18, 4  ;;  %s5088_s27 = int_to_ptr.vmem [resolvable:$false] %s5087_s27 }
 0x680   : > { %v4062_v56 = vld [vmem:[#allocation4 + $0x28] sm:$0xff]  ;;  %p5086_p2 = pneg %p5085_p1  ;;  %s5089_s28 = scalar_lea.vmem %s5088_s27, 4096 }
 0x681   : > { %v4052_v62 = vld [vmem:[#allocation4 + $0x68] sm:$0xff]  ;;  %p5090_p4 = scmp.lt.s32.totalorder %s8092_s13, %s5088_s27  ;;  %p5091_p5 = scmp.lt.s32.totalorder %s5089_s28, %s5083_s17 }
 0x683   : > { %p5092_p6 = por %p5091_p5, %p5090_p4 }
 0x685   : > { %p5093_p7 = pnand %p5092_p6, %p5086_p2 }
 0x686   : > { %4859 = vmatpush3.bf16.xpose.msra.mxu0 %v4187_v0  ;;  %4897 = vmatpush3.bf16.xpose.msra.mxu1 %v4187_v0 }
 0x687   : > { %4908 = vmatprep.subr.msk.bf16.mxu0 %vm4143_vm0, %v5069_v17  ;;  %4909 = vmatprep.subr.msk.bf16.mxu1 %vm4143_vm0, %v5069_v17 }
 0x68e   : > { %4861 = vmatpush3.bf16.xpose.msra.mxu0 %v4184_v23  ;;  %4898 = vmatpush3.bf16.xpose.msra.mxu1 %v4184_v23 }
 0x68f   : > { %4910 = vmatprep.subr.msk.bf16.mxu0 %vm4143_vm0, %v5070_v60  ;;  %4911 = vmatprep.subr.msk.bf16.mxu1 %vm4143_vm0, %v5070_v60 }
 0x696   : > { %4863 = vmatpush3.bf16.xpose.msra.mxu0 %v4181_v57  ;;  %4899 = vmatpush3.bf16.xpose.msra.mxu1 %v4181_v57 }
 0x697   : > { %4912 = vmatprep.subr.msk.bf16.mxu0 %vm4143_vm0, %v5071_v10  ;;  %4913 = vmatprep.subr.msk.bf16.mxu1 %vm4143_vm0, %v5071_v10 }
 0x69e   : > { %4865 = vmatpush3.bf16.xpose.msra.mxu0 %v4178_v19  ;;  %4900 = vmatpush3.bf16.xpose.msra.mxu1 %v4178_v19 }
 0x69f   : > { %4914 = vmatprep.subr.msk.bf16.mxu0 %vm4143_vm0, %v5072_v16  ;;  %4915 = vmatprep.subr.msk.bf16.mxu1 %vm4143_vm0, %v5072_v16 }
 0x6a6   : > { %4867 = vmatpush3.bf16.xpose.msra.mxu0 %v4175_v36  ;;  %4901 = vmatpush3.bf16.xpose.msra.mxu1 %v4175_v36 }
 0x6a7   : > { %4916 = vmatprep.subr.msk.bf16.mxu0 %vm4143_vm0, %v5073_v48  ;;  %4917 = vmatprep.subr.msk.bf16.mxu1 %vm4143_vm0, %v5073_v48 }
 0x6ae   : > { %4869 = vmatpush3.bf16.xpose.msra.mxu0 %v4172_v32  ;;  %4902 = vmatpush3.bf16.xpose.msra.mxu1 %v4172_v32 }
 0x6af   : > { %4918 = vmatprep.subr.msk.bf16.mxu0 %vm4143_vm0, %v5074_v54  ;;  %4919 = vmatprep.subr.msk.bf16.mxu1 %vm4143_vm0, %v5074_v54 }
 0x6b6   : > { %4871 = vmatpush3.bf16.xpose.msra.mxu0 %v4169_v61  ;;  %4903 = vmatpush3.bf16.xpose.msra.mxu1 %v4169_v61 }
 0x6bd   : > { %4873 = vmatmul.mubr.msk.bf16.vlgmr.msra.gmra.mxu0 %vm4143_vm0, %v5077_v40  ;;  %4881 = vmatmul.mubr.msk.bf16.vlgmr.msra.gmra.mxu1 %vm4143_vm0, %v5078_v22 }
 0x6be   : > { %4876 = vmatprep.mubr.msk.bf16.mxu0 %vm4143_vm0, %v5079_v44  ;;  %4884 = vmatprep.mubr.msk.bf16.mxu1 %vm4143_vm0, %v5080_v30 }
 0x6c5   : > { %4877 = vmatmul.mubr.msk.bf16.gmra.mxu0 %vm4143_vm0, %v5081_v52  ;;  %4885 = vmatmul.mubr.msk.bf16.gmra.mxu1 %vm4143_vm0, %v5082_v13 }
 0x77d   : > { %v4874_v20 = vpop.f32.mrf.mxu0  ;;  %v4882_v1 = vpop.f32.mrf.mxu1 }
 0x77e   : > { %v4235_v2 = vadd.f32 %v4874_v20, %v4049_v25  ;;  %v4267_v27 = vadd.f32 %v4882_v1, %v4057_v21 }
 0x77f   : > { %v4226_v33 = vpop.f32.mrf.mxu0  ;;  %v4258_v11 = vpop.f32.mrf.mxu1 }
 0x780   : > { %4291 = vst [vmem:[%s5337_s11 + $0x10] sm:$0xff] %v4235_v2  ;;  %4299 = vst [vmem:[%s5337_s11 + $0x50] sm:$0xff] %v4267_v27  ;;  %v4227_v14 = vadd.f32 %v4226_v33, %v4047_v63  ;;  %v4259_v9 = vadd.f32 %v4258_v11, %v4055_v50 }
 0x781   : > { %v4875_v42 = vpop.f32.mrf.mxu0  ;;  %v4883_v58 = vpop.f32.mrf.mxu1 }
 0x782   : > { %4289 = vst [vmem:[%s5337_s11] sm:$0xff] %v4227_v14  ;;  %4297 = vst [vmem:[%s5337_s11 + $0x40] sm:$0xff] %v4259_v9  ;;  %v4238_v43 = vadd.f32 %v4875_v42, %v4050_v37  ;;  %v4270_v51 = vadd.f32 %v4883_v58, %v4058_v12 }
 0x783   : > { %v4229_v3 = vpop.f32.mrf.mxu0  ;;  %v4261_v45 = vpop.f32.mrf.mxu1 }
 0x784   : > { %4292 = vst [vmem:[%s5337_s11 + $0x18] sm:$0xff] %v4238_v43  ;;  %4300 = vst [vmem:[%s5337_s11 + $0x58] sm:$0xff] %v4270_v51  ;;  %v4230_v28 = vadd.f32 %v4229_v3, %v4048_v24  ;;  %v4262_v47 = vadd.f32 %v4261_v45, %v4056_v5 }
 0x785   : > { %v4878_v18 = vpop.f32.mrf.mxu0  ;;  %v4886_v34 = vpop.f32.mrf.mxu1 }
 0x786   : > { %4290 = vst [vmem:[%s5337_s11 + $0x8] sm:$0xff] %v4230_v28  ;;  %4298 = vst [vmem:[%s5337_s11 + $0x48] sm:$0xff] %v4262_v47  ;;  %v4251_v53 = vadd.f32 %v4878_v18, %v4053_v15  ;;  %v4283_v8 = vadd.f32 %v4886_v34, %v4061_v26 }
 0x787   : > { %v4242_v29 = vpop.f32.mrf.mxu0  ;;  %v4274_v55 = vpop.f32.mrf.mxu1 }
 0x788   : > { %4295 = vst [vmem:[%s5337_s11 + $0x30] sm:$0xff] %v4251_v53  ;;  %4303 = vst [vmem:[%s5337_s11 + $0x70] sm:$0xff] %v4283_v8  ;;  %v4243_v7 = vadd.f32 %v4242_v29, %v4051_v38  ;;  %v4275_v49 = vadd.f32 %v4274_v55, %v4059_v46 }
 0x789   : > { %v4879_v59 = vpop.f32.mrf.mxu0  ;;  %v4887_v41 = vpop.f32.mrf.mxu1 }
 0x78a   : > { %4293 = vst [vmem:[%s5337_s11 + $0x20] sm:$0xff] %v4243_v7  ;;  %4301 = vst [vmem:[%s5337_s11 + $0x60] sm:$0xff] %v4275_v49  ;;  %v4254_v6 = vadd.f32 %v4879_v59, %v4054_v4  ;;  %v4286_v17 = vadd.f32 %v4887_v41, %v4062_v56 }
 0x78b   : > { %v4245_v0 = vpop.f32.mrf.mxu0  ;;  %v4277_v31 = vpop.f32.mrf.mxu1 }
 0x78c   : > { %4296 = vst [vmem:[%s5337_s11 + $0x38] sm:$0xff] %v4254_v6  ;;  %4304 = vst [vmem:[%s5337_s11 + $0x78] sm:$0xff] %v4286_v17  ;;  %v4246_v35 = vadd.f32 %v4245_v0, %v4052_v62  ;;  %v4278_v23 = vadd.f32 %v4277_v31, %v4060_v39 }
 0x78e   : > { %4294 = vst [vmem:[%s5337_s11 + $0x28] sm:$0xff] %v4246_v35  ;;  %4302 = vst [vmem:[%s5337_s11 + $0x68] sm:$0xff] %v4278_v23 }
 0x78f   : > { %5096 = shalt.err (!%p5093_p7)
}
 0x790   : > { %s5097_s11 = scalar_lea.hbm %s8090_s24, 2048  ;;  %s5101_s15 = scalar_lea.hbm %s8160_s9, 16384 }
 0x791   : > { %p5098_p9 = scmp.ne.s32.totalorder %s8090_s24, %s5097_s11  ;;  %p5102_p12 = scmp.lt.s32.totalorder %s8090_s24, %s8160_s9 }
 0x792   : > { %p5103_p13 = scmp.lt.s32.totalorder %s5101_s15, %s5097_s11 }
 0x793   : > { %p5099_p10 = pnand %p5098_p9, %p5294_p3 }
 0x794   : > { %p5104_p0 = por %p5103_p13, %p5102_p12 }
 0x795   : > { %p5100_p11 = pneg %p5099_p10 }
 0x797   : > { %p5105_p1 = pnand %p5104_p0, %p5100_p11 }
 0x799   : > { %5108 = shalt.err (!%p5105_p1)
}
 0x79a   : > { %s5191_s14 = smov 128   ;;  %s5192_s29 = smov 8  }
 0x79b   : > { %4920 = dma.vmem_to_hbm [thread:$0]  (%p5294_p3), %s8092_s13, 2048, %s8090_s24, %s8100_s21, %s5191_s14, %s5191_s14, %s5192_s29  }
 0x79c PF: > { %p4926_p2 = scmp.ge.s32.totalorder %s5175_s16, 2  ;;  %s4338_s19 = sand.u32 1, %s5147_s30  }
 0x79d   : > { %s4339_s17 = scalar_lea.sflag [#allocation6], %s4338_s19 }
 0x79e   : > { %p4923_p4 = pnand %p4926_p2, %p5303_p8 }
 0x7a0   : > { %p4924_p5 = pneg %p4923_p4 }
 0x7a2   : > { %5142 = dma.done.wait (%p4924_p5), %s4339_s17, 2048  }
 0x7a3   : > { %5144 = vsyncadd (%p4924_p5), %s4339_s17, 4294965248  ;;  %s22_s16 = sadd.s32 1, %s5175_s16   ;;  %s8586_s18 = sld [smem:[#allocation8_spill]] }
 0x7a4   : > { %p19_p6 = scmp.ge.s32.totalorder %s22_s16, 10   ;;  %s8587_s11 = sld [smem:[#allocation13_spill]] }
 0x7a5   : > { %s8588_s12 = sld [smem:[#allocation9_spill]]  ;;  %s8592_s30 = smov %s5151_s10 }
 0x7a6   : > { %s8589_s13 = sld [smem:[#allocation10_spill]]  ;;  %21 = sbr.rel (!%p19_p6) target bundleno = 5 (0x5), region = 117 }
 0x7a7   : > { %s8590_s14 = sld [smem:[#allocation11_spill]] }
 0x7a8   : > { %s8591_s15 = sld [smem:[#allocation12_spill]] }
 0x7a9   : > { %s8593_s10 = smov %s8586_s18 }
 0x7ab   :  { %4344 = vsyncpa [#allocation6], 1 }
 0x7ac   :  { %4346 = vsyncpa [#allocation6 + $0x1], 1 }

</bundles_post_ra>
